<compile_context>
chip_gen: v6e
topology: v6e:2x2x1
jax: 0.10.0
libtpu: 0.0.40
codegen_flags: <defaults>
</compile_context>

<pallas_src>
import jax
import jax.numpy as jnp
from jax.experimental import pallas as pl
from jax.experimental.pallas import tpu as pltpu


# ---------------------------------------------------------------------------
# Kernel
# ---------------------------------------------------------------------------
def _mlp_norm_kernel(x_ref,
                     w1_ref, b1_ref,
                     w2_ref, b2_ref,
                     w3_ref, b3_ref,
                     w4_ref, b4_ref,
                     o_ref):
    cdt = w2_ref.dtype          # MXU input dtype (bf16); accumulation is f32.

    x = x_ref[...]              # (tile_b, C) float32
    w1 = w1_ref[...]            # (C, d0)    float32
    C = x.shape[1]

    # ---- Layer 1 on the VPU: C broadcast FMAs (avoids a degenerate-K matmul).
    h = x[:, 0:1] * w1[0:1, :] + b1_ref[...]          # (tile_b, d0) f32
    for c in range(1, C):
        h = h + x[:, c:c+1] * w1[c:c+1, :]
    h = jnp.maximum(h.astype(cdt), 0.0)               # ReLU (== relu-then-cast)

    # ---- Layers 2-3 on the MXU (bf16 in, f32 accumulate).
    h = jnp.dot(h, w2_ref[...], preferred_element_type=jnp.float32) + b2_ref[...]
    h = jnp.maximum(h.astype(cdt), 0.0)

    h = jnp.dot(h, w3_ref[...], preferred_element_type=jnp.float32) + b3_ref[...]
    h = jnp.maximum(h.astype(cdt), 0.0)

    # Dropout is identity at inference time (training mode rejected in wrapper).
    # TODO(synk): training-mode dropout via pltpu.prng_seed + prng_random_bits.

    y = jnp.dot(h, w4_ref[...], preferred_element_type=jnp.float32) + b4_ref[...]

    # F.normalize: y / max(||y||_2, 1e-12)  ==  y * rsqrt(max(||y||^2, 1e-24))
    sq = jnp.sum(y * y, axis=-1, keepdims=True)
    inv = jax.lax.rsqrt(jnp.maximum(sq, 1e-24))
    o_ref[...] = (y * inv).astype(o_ref.dtype)


# ---------------------------------------------------------------------------
# Helpers
# ---------------------------------------------------------------------------
def _round_up(n, m):
    return ((n + m - 1) // m) * m


def _vmem_capacity_bytes():
    try:
        info = pltpu.get_tpu_info()
        return int(getattr(info, "vmem_capacity_bytes", 128 * 1024 * 1024))
    except Exception:
        return 128 * 1024 * 1024


def _pick_tile_b(B):
    """Target ~512-row tiles, multiples of 256 (MXU M-fill on v6e/v7x, 2x128 on
    v5e); keep >= 2 grid steps when batch allows so the parallel batch axis can
    shard across v7x's two TensorCores."""
    B_align = _round_up(B, 8)
    if B_align <= 256:
        return B_align
    half = _round_up(pl.cdiv(B_align, 2), 256)
    return min(512, half)


_SINGLE_BUFFER_OK = None


def _single_buffer_supported():
    """One-time, narrow feature probe: does this build accept
    pipeline_mode=pl.Buffered(1) on grid-invariant BlockSpecs?  Only the tiny
    probe kernel is guarded; errors from the real kernel always surface."""
    global _SINGLE_BUFFER_OK
    if _SINGLE_BUFFER_OK is not None:
        return _SINGLE_BUFFER_OK
    ok = hasattr(pl, "Buffered")
    if ok:
        try:
            const_spec = pl.BlockSpec((8, 128), lambda i: (0, 0),
                                      pipeline_mode=pl.Buffered(1))

            def _probe(a_ref, c_ref, o_ref):
                o_ref[...] = a_ref[...] + c_ref[...]

            fn = pl.pallas_call(
                _probe,
                out_shape=jax.ShapeDtypeStruct((16, 128), jnp.float32),
                grid_spec=pltpu.PrefetchScalarGridSpec(
                    num_scalar_prefetch=0,
                    grid=(2,),
                    in_specs=[pl.BlockSpec((8, 128), lambda i: (i, 0)),
                              const_spec],
                    out_specs=pl.BlockSpec((8, 128), lambda i: (i, 0))))
            jax.jit(fn).lower(jnp.zeros((16, 128), jnp.float32),
                              jnp.zeros((8, 128), jnp.float32)).compile()
        except Exception:
            ok = False
    _SINGLE_BUFFER_OK = ok
    return ok


def _const_spec(shape, single_buffer):
    if single_buffer:
        return pl.BlockSpec(shape, lambda i: (0, 0), pipeline_mode=pl.Buffered(1))
    return pl.BlockSpec(shape, lambda i: (0, 0))


# ---------------------------------------------------------------------------
# Parameter preparation (hoisted out of the per-call forward)
# ---------------------------------------------------------------------------
def prepare_params(params, compute_dtype=jnp.bfloat16):
    """One-time conversion:
      * biases -> (1, out) float32 (accepts torch-style (out,) too)
      * w1 stays float32 (layer 1 runs on the VPU in-kernel)
      * w2..w4 cast to the MXU compute dtype (bf16)
    Weights are stored as (in, out) = torch W.T."""
    def bias(b):
        return jnp.asarray(b, jnp.float32).reshape(1, -1)
    return {
        "w1": jnp.asarray(params["w1"], jnp.float32),
        "b1": bias(params["b1"]),
        "w2": jnp.asarray(params["w2"], compute_dtype),
        "b2": bias(params["b2"]),
        "w3": jnp.asarray(params["w3"], compute_dtype),
        "b3": bias(params["b3"]),
        "w4": jnp.asarray(params["w4"], compute_dtype),
        "b4": bias(params["b4"]),
    }


# ---------------------------------------------------------------------------
# Forward
# ---------------------------------------------------------------------------
def obs_average_net_forward(x, prep, *, tile_b=None, out_dtype=jnp.float32,
                            training=False):
    """x: (B, C). prep: output of prepare_params() (already cast / reshaped)."""
    if training:
        # TODO(synk): training-mode dropout (pltpu.prng_seed + prng_random_bits mask).
        raise NotImplementedError(
            "ObsAverageNet Pallas kernel is inference-only (Dropout == identity).")

    B, C = x.shape
    d0 = prep["w1"].shape[1]
    d1 = prep["w2"].shape[1]
    d2 = prep["w3"].shape[1]
    assert prep["w1"].shape[0] == C
    assert prep["w4"].shape == (d2, d2)

    if tile_b is None:
        tile_b = _pick_tile_b(B)
    tile_b = max(8, (tile_b // 8) * 8)
    B_pad = _round_up(B, tile_b)

    if x.dtype != jnp.float32:
        x = x.astype(jnp.float32)
    if B_pad != B:
        x = jnp.pad(x, ((0, B_pad - B), (0, 0)))

    cdt = prep["w2"].dtype
    w_itemsize = jnp.dtype(cdt).itemsize
    out_itemsize = jnp.dtype(out_dtype).itemsize
    flops = 2 * B_pad * (C * d0 + d0 * d1 + d1 * d2 + d2 * d2)
    bytes_accessed = (B_pad * C * 4
                      + C * d0 * 4
                      + (d0 * d1 + d1 * d2 + d2 * d2) * w_itemsize
                      + (d0 + d1 + 2 * d2) * 4
                      + B_pad * d2 * out_itemsize)
    cost = pl.CostEstimate(flops=flops, transcendentals=B_pad,
                           bytes_accessed=bytes_accessed)

    vmem_limit = int(min(_vmem_capacity_bytes() // 2, 64 * 1024 * 1024))
    single_buffer = _single_buffer_supported()

    call = pl.pallas_call(
        _mlp_norm_kernel,
        out_shape=jax.ShapeDtypeStruct((B_pad, d2), out_dtype),
        grid_spec=pltpu.PrefetchScalarGridSpec(
            num_scalar_prefetch=0,
            grid=(B_pad // tile_b,),
            in_specs=[
                pl.BlockSpec((tile_b, C), lambda i: (i, 0)),       # x batch tile
                _const_spec((C, d0), single_buffer),               # layer 1 (VPU)
                _const_spec((1, d0), single_buffer),
                _const_spec((d0, d1), single_buffer),              # layer 2
                _const_spec((1, d1), single_buffer),
                _const_spec((d1, d2), single_buffer),              # layer 3
                _const_spec((1, d2), single_buffer),
                _const_spec((d2, d2), single_buffer),              # layer 4
                _const_spec((1, d2), single_buffer),
            ],
            out_specs=pl.BlockSpec((tile_b, d2), lambda i: (i, 0)),
        ),
        compiler_params=pltpu.CompilerParams(
            dimension_semantics=("parallel",),
            vmem_limit_bytes=vmem_limit),
        cost_estimate=cost,
    )

    out = call(x,
               prep["w1"], prep["b1"],
               prep["w2"], prep["b2"],
               prep["w3"], prep["b3"],
               prep["w4"], prep["b4"])
    if B_pad != B:
        out = out[:B]
    return out


# ---------------------------------------------------------------------------
# Synthetic init + references
# ---------------------------------------------------------------------------
def init_params(key, channel, dims):
    """Deterministic synthetic init. Weights stored as (in, out) = torch W.T."""
    d0, d1, d2 = dims
    shapes = [(channel, d0), (d0, d1), (d1, d2), (d2, d2)]
    params = {}
    keys = jax.random.split(key, 8)
    for idx, (fan_in, fan_out) in enumerate(shapes):
        scale = 1.0 / jnp.sqrt(jnp.float32(fan_in))
        params[f"w{idx+1}"] = (
            jax.random.uniform(keys[2 * idx], (fan_in, fan_out),
                               jnp.float32, -1.0, 1.0) * scale)
        params[f"b{idx+1}"] = (
            jax.random.uniform(keys[2 * idx + 1], (1, fan_out),
                               jnp.float32, -1.0, 1.0) * scale)
    return params


def reference_forward_f32(x, params):
    h = jnp.maximum(x @ params["w1"] + params["b1"], 0.0)
    h = jnp.maximum(h @ params["w2"] + params["b2"], 0.0)
    h = jnp.maximum(h @ params["w3"] + params["b3"], 0.0)
    y = h @ params["w4"] + params["b4"]
    n = jnp.maximum(jnp.linalg.norm(y, axis=1, keepdims=True), 1e-12)
    return y / n


def reference_forward_matched(x, params, compute_dtype=jnp.bfloat16):
    """Same math with the kernel's precision: layer 1 in f32 (VPU path),
    layers 2-4 bf16-in / f32-accumulate."""
    cdt = compute_dtype
    h = x.astype(jnp.float32) @ params["w1"].astype(jnp.float32) + params["b1"]
    h = jnp.maximum(h, 0.0).astype(cdt)
    h = jnp.dot(h, params["w2"].astype(cdt),
                preferred_element_type=jnp.float32) + params["b2"]
    h = jnp.maximum(h, 0.0).astype(cdt)
    h = jnp.dot(h, params["w3"].astype(cdt),
                preferred_element_type=jnp.float32) + params["b3"]
    h = jnp.maximum(h, 0.0).astype(cdt)
    y = jnp.dot(h, params["w4"].astype(cdt),
                preferred_element_type=jnp.float32) + params["b4"]
    n = jnp.maximum(jnp.linalg.norm(y, axis=1, keepdims=True), 1e-12)
    return y / n


# ---------------------------------------------------------------------------
# Main
# ---------------------------------------------------------------------------
if __name__ == "__main__":
    key = jax.random.PRNGKey(0)
    k_x, k_p = jax.random.split(key)

    # Small shapes consistent with the module; B=512 gives a 2-step grid with
    # tile_b=256 (pipelining + v7x dual-TC sharding of the parallel batch axis).
    B, C = 512, 4
    dims = [128, 256, 256]

    x = jax.random.normal(k_x, (B, C), jnp.float32)
    params = init_params(k_p, C, dims)
    prep = prepare_params(params)          # one-time weight cast / bias reshape

    fwd = jax.jit(obs_average_net_forward)
    out = jax.block_until_ready(fwd(x, prep))
    assert out.shape == (B, dims[2])

    # Tight check vs. an XLA reference with matching precision.
    ref_m = reference_forward_matched(x, params)
    assert jnp.allclose(out, ref_m, atol=2e-3, rtol=2e-3), \
        "mismatch vs matched-precision reference"

    # Loose sanity check vs. the pure-f32 reference (bf16 quantization only).
    ref_f = reference_forward_f32(x, params)
    assert float(jnp.max(jnp.abs(out - ref_f))) < 1e-1, "mismatch vs f32 reference"

    # Output rows must be unit-norm.
    assert jnp.allclose(jnp.linalg.norm(out, axis=1), 1.0, atol=1e-2), \
        "not L2-normalized"

    print("KERNEL_OK")
</pallas_src>

<mosaic_0001>
module attributes {stable_mosaic.version = 11 : i64} {
  func.func @_mlp_norm_kernel(%arg0: i32, %arg1: memref<256x4xf32, #tpu.memory_space<vmem>>, %arg2: memref<4x128xf32, #tpu.memory_space<vmem>>, %arg3: memref<1x128xf32, #tpu.memory_space<vmem>>, %arg4: memref<128x256xbf16, #tpu.memory_space<vmem>>, %arg5: memref<1x256xf32, #tpu.memory_space<vmem>>, %arg6: memref<256x256xbf16, #tpu.memory_space<vmem>>, %arg7: memref<1x256xf32, #tpu.memory_space<vmem>>, %arg8: memref<256x256xbf16, #tpu.memory_space<vmem>>, %arg9: memref<1x256xf32, #tpu.memory_space<vmem>>, %arg10: memref<256x256xf32, #tpu.memory_space<vmem>>) attributes {dimension_semantics = [#tpu.dimension_semantics<parallel>], iteration_bounds = array<i64: 2>, scalar_prefetch = 0 : i64, scratch_operands = 0 : i64, tpu.core_type = #tpu.core_type<tc>, window_params = [{transform_indices = @transform_0, window_bounds = array<i64: 256, 4>}, {pipeline_mode = #tpu.pipeline_mode<synchronous>, transform_indices = @transform_1, window_bounds = array<i64: 4, 128>}, {pipeline_mode = #tpu.pipeline_mode<synchronous>, transform_indices = @transform_2, window_bounds = array<i64: 1, 128>}, {pipeline_mode = #tpu.pipeline_mode<synchronous>, transform_indices = @transform_3, window_bounds = array<i64: 128, 256>}, {pipeline_mode = #tpu.pipeline_mode<synchronous>, transform_indices = @transform_4, window_bounds = array<i64: 1, 256>}, {pipeline_mode = #tpu.pipeline_mode<synchronous>, transform_indices = @transform_5, window_bounds = array<i64: 256, 256>}, {pipeline_mode = #tpu.pipeline_mode<synchronous>, transform_indices = @transform_6, window_bounds = array<i64: 1, 256>}, {pipeline_mode = #tpu.pipeline_mode<synchronous>, transform_indices = @transform_7, window_bounds = array<i64: 256, 256>}, {pipeline_mode = #tpu.pipeline_mode<synchronous>, transform_indices = @transform_8, window_bounds = array<i64: 1, 256>}, {transform_indices = @transform_9, window_bounds = array<i64: 256, 256>}]} {
    %c0 = arith.constant 0 : index
    %c0_0 = arith.constant 0 : index
    %0 = vector.load %arg1[%c0, %c0_0] : memref<256x4xf32, #tpu.memory_space<vmem>>, vector<256x4xf32>
    %c0_1 = arith.constant 0 : index
    %c0_2 = arith.constant 0 : index
    %1 = vector.load %arg2[%c0_1, %c0_2] : memref<4x128xf32, #tpu.memory_space<vmem>>, vector<4x128xf32>
    %2 = vector.extract_strided_slice %0 {offsets = [0, 0], sizes = [256, 1], strides = [1, 1]} : vector<256x4xf32> to vector<256x1xf32>
    %3 = vector.extract_strided_slice %1 {offsets = [0, 0], sizes = [1, 128], strides = [1, 1]} : vector<4x128xf32> to vector<1x128xf32>
    %4 = vector.broadcast %2 : vector<256x1xf32> to vector<256x128xf32>
    %5 = vector.broadcast %3 : vector<1x128xf32> to vector<256x128xf32>
    %6 = arith.mulf %4, %5 : vector<256x128xf32>
    %c0_3 = arith.constant 0 : index
    %c0_4 = arith.constant 0 : index
    %7 = vector.load %arg3[%c0_3, %c0_4] : memref<1x128xf32, #tpu.memory_space<vmem>>, vector<1x128xf32>
    %8 = vector.broadcast %7 : vector<1x128xf32> to vector<256x128xf32>
    %9 = arith.addf %6, %8 : vector<256x128xf32>
    %10 = vector.extract_strided_slice %0 {offsets = [0, 1], sizes = [256, 1], strides = [1, 1]} : vector<256x4xf32> to vector<256x1xf32>
    %11 = vector.extract_strided_slice %1 {offsets = [1, 0], sizes = [1, 128], strides = [1, 1]} : vector<4x128xf32> to vector<1x128xf32>
    %12 = vector.broadcast %10 : vector<256x1xf32> to vector<256x128xf32>
    %13 = vector.broadcast %11 : vector<1x128xf32> to vector<256x128xf32>
    %14 = arith.mulf %12, %13 : vector<256x128xf32>
    %15 = arith.addf %9, %14 : vector<256x128xf32>
    %16 = vector.extract_strided_slice %0 {offsets = [0, 2], sizes = [256, 1], strides = [1, 1]} : vector<256x4xf32> to vector<256x1xf32>
    %17 = vector.extract_strided_slice %1 {offsets = [2, 0], sizes = [1, 128], strides = [1, 1]} : vector<4x128xf32> to vector<1x128xf32>
    %18 = vector.broadcast %16 : vector<256x1xf32> to vector<256x128xf32>
    %19 = vector.broadcast %17 : vector<1x128xf32> to vector<256x128xf32>
    %20 = arith.mulf %18, %19 : vector<256x128xf32>
    %21 = arith.addf %15, %20 : vector<256x128xf32>
    %22 = vector.extract_strided_slice %0 {offsets = [0, 3], sizes = [256, 1], strides = [1, 1]} : vector<256x4xf32> to vector<256x1xf32>
    %23 = vector.extract_strided_slice %1 {offsets = [3, 0], sizes = [1, 128], strides = [1, 1]} : vector<4x128xf32> to vector<1x128xf32>
    %24 = vector.broadcast %22 : vector<256x1xf32> to vector<256x128xf32>
    %25 = vector.broadcast %23 : vector<1x128xf32> to vector<256x128xf32>
    %26 = arith.mulf %24, %25 : vector<256x128xf32>
    %27 = arith.addf %21, %26 : vector<256x128xf32>
    %28 = arith.truncf %27 : vector<256x128xf32> to vector<256x128xbf16>
    %cst = arith.constant 0.000000e+00 : bf16
    %29 = vector.broadcast %cst : bf16 to vector<256x128xbf16>
    %30 = arith.maximumf %28, %29 : vector<256x128xbf16>
    %c0_5 = arith.constant 0 : index
    %c0_6 = arith.constant 0 : index
    %31 = vector.load %arg4[%c0_5, %c0_6] : memref<128x256xbf16, #tpu.memory_space<vmem>>, vector<128x256xbf16>
    %cst_7 = arith.constant dense<0.000000e+00> : vector<256x256xf32>
    %32 = tpu.matmul %30, %31, %cst_7 {dimension_numbers = #tpu.dot_dimension_numbers<[1], [0], [0], [1], [0, 0, 1, 1], [], []>} : vector<256x128xbf16>, vector<128x256xbf16>, vector<256x256xf32> -> vector<256x256xf32>
    %c0_8 = arith.constant 0 : index
    %c0_9 = arith.constant 0 : index
    %33 = vector.load %arg5[%c0_8, %c0_9] : memref<1x256xf32, #tpu.memory_space<vmem>>, vector<1x256xf32>
    %34 = vector.broadcast %33 : vector<1x256xf32> to vector<256x256xf32>
    %35 = arith.addf %32, %34 : vector<256x256xf32>
    %36 = arith.truncf %35 : vector<256x256xf32> to vector<256x256xbf16>
    %cst_10 = arith.constant 0.000000e+00 : bf16
    %37 = vector.broadcast %cst_10 : bf16 to vector<256x256xbf16>
    %38 = arith.maximumf %36, %37 : vector<256x256xbf16>
    %c0_11 = arith.constant 0 : index
    %c0_12 = arith.constant 0 : index
    %39 = vector.load %arg6[%c0_11, %c0_12] : memref<256x256xbf16, #tpu.memory_space<vmem>>, vector<256x256xbf16>
    %cst_13 = arith.constant dense<0.000000e+00> : vector<256x256xf32>
    %40 = tpu.matmul %38, %39, %cst_13 {dimension_numbers = #tpu.dot_dimension_numbers<[1], [0], [0], [1], [0, 0, 1, 1], [], []>} : vector<256x256xbf16>, vector<256x256xbf16>, vector<256x256xf32> -> vector<256x256xf32>
    %c0_14 = arith.constant 0 : index
    %c0_15 = arith.constant 0 : index
    %41 = vector.load %arg7[%c0_14, %c0_15] : memref<1x256xf32, #tpu.memory_space<vmem>>, vector<1x256xf32>
    %42 = vector.broadcast %41 : vector<1x256xf32> to vector<256x256xf32>
    %43 = arith.addf %40, %42 : vector<256x256xf32>
    %44 = arith.truncf %43 : vector<256x256xf32> to vector<256x256xbf16>
    %cst_16 = arith.constant 0.000000e+00 : bf16
    %45 = vector.broadcast %cst_16 : bf16 to vector<256x256xbf16>
    %46 = arith.maximumf %44, %45 : vector<256x256xbf16>
    %c0_17 = arith.constant 0 : index
    %c0_18 = arith.constant 0 : index
    %47 = vector.load %arg8[%c0_17, %c0_18] : memref<256x256xbf16, #tpu.memory_space<vmem>>, vector<256x256xbf16>
    %cst_19 = arith.constant dense<0.000000e+00> : vector<256x256xf32>
    %48 = tpu.matmul %46, %47, %cst_19 {dimension_numbers = #tpu.dot_dimension_numbers<[1], [0], [0], [1], [0, 0, 1, 1], [], []>} : vector<256x256xbf16>, vector<256x256xbf16>, vector<256x256xf32> -> vector<256x256xf32>
    %c0_20 = arith.constant 0 : index
    %c0_21 = arith.constant 0 : index
    %49 = vector.load %arg9[%c0_20, %c0_21] : memref<1x256xf32, #tpu.memory_space<vmem>>, vector<1x256xf32>
    %50 = vector.broadcast %49 : vector<1x256xf32> to vector<256x256xf32>
    %51 = arith.addf %48, %50 : vector<256x256xf32>
    %52 = arith.mulf %51, %51 : vector<256x256xf32>
    %cst_22 = arith.constant dense<0.000000e+00> : vector<256xf32>
    %53 = vector.multi_reduction <add>, %52, %cst_22 [1] : vector<256x256xf32> to vector<256xf32>
    %54 = vector.shape_cast %53 : vector<256xf32> to vector<256x1xf32>
    %cst_23 = arith.constant 1.000000e-24 : f32
    %55 = vector.broadcast %cst_23 : f32 to vector<256x1xf32>
    %56 = arith.maximumf %54, %55 : vector<256x1xf32>
    %57 = math.rsqrt %56 : vector<256x1xf32>
    %58 = vector.broadcast %57 : vector<256x1xf32> to vector<256x256xf32>
    %59 = arith.mulf %51, %58 : vector<256x256xf32>
    %c0_24 = arith.constant 0 : index
    %c0_25 = arith.constant 0 : index
    %60 = vector.load %arg10[%c0_24, %c0_25] : memref<256x256xf32, #tpu.memory_space<vmem>>, vector<256x256xf32>
    tpu.vector_store %arg10[%c0_24, %c0_25], %59 {strides = array<i32>} : memref<256x256xf32, #tpu.memory_space<vmem>>, vector<256x256xf32>,
    return
  }
  func.func @transform_0(%arg0: i32) -> (i32, i32) {
    %c0_i32 = arith.constant 0 : i32
    %c0_i32_0 = arith.constant 0 : i32
    return %arg0, %c0_i32 : i32, i32
  }
  func.func @transform_1(%arg0: i32) -> (i32, i32) {
    %c0_i32 = arith.constant 0 : i32
    %c0_i32_0 = arith.constant 0 : i32
    %c0_i32_1 = arith.constant 0 : i32
    return %c0_i32, %c0_i32_0 : i32, i32
  }
  func.func @transform_2(%arg0: i32) -> (i32, i32) {
    %c0_i32 = arith.constant 0 : i32
    %c0_i32_0 = arith.constant 0 : i32
    %c0_i32_1 = arith.constant 0 : i32
    return %c0_i32, %c0_i32_0 : i32, i32
  }
  func.func @transform_3(%arg0: i32) -> (i32, i32) {
    %c0_i32 = arith.constant 0 : i32
    %c0_i32_0 = arith.constant 0 : i32
    %c0_i32_1 = arith.constant 0 : i32
    return %c0_i32, %c0_i32_0 : i32, i32
  }
  func.func @transform_4(%arg0: i32) -> (i32, i32) {
    %c0_i32 = arith.constant 0 : i32
    %c0_i32_0 = arith.constant 0 : i32
    %c0_i32_1 = arith.constant 0 : i32
    return %c0_i32, %c0_i32_0 : i32, i32
  }
  func.func @transform_5(%arg0: i32) -> (i32, i32) {
    %c0_i32 = arith.constant 0 : i32
    %c0_i32_0 = arith.constant 0 : i32
    %c0_i32_1 = arith.constant 0 : i32
    return %c0_i32, %c0_i32_0 : i32, i32
  }
  func.func @transform_6(%arg0: i32) -> (i32, i32) {
    %c0_i32 = arith.constant 0 : i32
    %c0_i32_0 = arith.constant 0 : i32
    %c0_i32_1 = arith.constant 0 : i32
    return %c0_i32, %c0_i32_0 : i32, i32
  }
  func.func @transform_7(%arg0: i32) -> (i32, i32) {
    %c0_i32 = arith.constant 0 : i32
    %c0_i32_0 = arith.constant 0 : i32
    %c0_i32_1 = arith.constant 0 : i32
    return %c0_i32, %c0_i32_0 : i32, i32
  }
  func.func @transform_8(%arg0: i32) -> (i32, i32) {
    %c0_i32 = arith.constant 0 : i32
    %c0_i32_0 = arith.constant 0 : i32
    %c0_i32_1 = arith.constant 0 : i32
    return %c0_i32, %c0_i32_0 : i32, i32
  }
  func.func @transform_9(%arg0: i32) -> (i32, i32) {
    %c0_i32 = arith.constant 0 : i32
    %c0_i32_0 = arith.constant 0 : i32
    return %arg0, %c0_i32 : i32, i32
  }
}

</mosaic_0001>

<bundles_post_ra>
// kernel: obs_average_net_forward.1
= control target key start
LH: loop header
LB: loop body
LE: loop exit
PB: predicated region body
PF: predicated region fallthrough
CT: control target
= control target key end

     0   :  { %14 = vsyncpa [#allocation3], 0  ;;  %s5134_s0 = inlined_call_operand.vmem [shape: f32[512,4], index: 0, kind: input, shape index: {}]   ;;  %s5135_s1 = inlined_call_operand.vmem [shape: f32[4,128], index: 1, kind: input, shape index: {}]   ;;  %s5136_s2 = inlined_call_operand.vmem [shape: f32[1,128], index: 2, kind: input, shape index: {}]   ;;  %s5137_s3 = inlined_call_operand.hbm [shape: bf16[128,256], index: 3, kind: input, shape index: {}]   ;;  %s5138_s4 = inlined_call_operand.vmem [shape: f32[1,256], index: 4, kind: input, shape index: {}]   ;;  %s5139_s5 = inlined_call_operand.vmem [shape: bf16[256,256], index: 5, kind: input, shape index: {}]   ;;  %s5140_s6 = inlined_call_operand.vmem [shape: f32[1,256], index: 6, kind: input, shape index: {}]   ;;  %s5141_s7 = inlined_call_operand.vmem [shape: bf16[256,256], index: 7, kind: input, shape index: {}]   ;;  %s5142_s8 = inlined_call_operand.vmem [shape: f32[1,256], index: 8, kind: input, shape index: {}]   ;;  %s5143_s9 = inlined_call_operand.hbm [shape: f32[512,256], index: 9, kind: output, shape index: {}]  }
   0x1   :  { %15 = vsyncpa [#allocation4], 0 }
   0x2   :  { %17 = vsyncpa [#allocation4 + $0x1], 0  ;;  %s3484_s30 = smov 0   ;;  %s3486_s10 = smov 0  }
   0x3   :  { %s3488_s11 = smov 0   ;;  %s3490_s12 = smov 0  }
   0x4 LB: > { %s3505_s13 = sadd.s32 4294967295, %s3422_s12   ;;  %s2902_s14 = sadd.s32 4294967294, %s3422_s12   ;;  %s3422_s12 = sphi %s3490_s12, %s5185_s12   ;;  %s3418_s11 = sphi %s3488_s11, %s5184_s11   ;;  %s3414_s10 = sphi %s3486_s10, %s5183_s10   ;;  %s3410_s30 = sphi %s3484_s30, %s5182_s30  }
   0x5   : > { %s3509_s15 = sadd.s32 1, %s3422_s12   ;;  %s224_s16 = sadd.s32 1, %s3418_s11 }
   0x6   : > { %s221_s17 = ssub.s32 %s3422_s12, %s3509_s15  ;;  %p234_p0 = scmp.ne.s32.totalorder %s3418_s11, %s3414_s10 }
   0x7   : > { %p222_p1 = scmp.eq.s32.totalorder %s221_s17, 0  ;;  %p235_p2 = scmp.eq.s32.totalorder %s3505_s13, 1 }
   0x8   : > { %p240_p3 = scmp.ne.s32.totalorder %s3414_s10, %s3410_s30  ;;  %p241_p4 = scmp.eq.s32.totalorder %s2902_s14, 1 }
   0x9   : > { %s3520_s18 = scalar_select %p222_p1, %s3418_s11, %s224_s16  }
   0xa   : > { %p3522_p5 = por %p235_p2, %p234_p0  ;;  %p3526_p6 = por %p241_p4, %p240_p3 }
   0xb   : > { %p2903_p7 = scmp.ge.s32.totalorder %s3422_s12, 1  ;;  %p248_p8 = scmp.lt.s32.totalorder %s3422_s12, 3 }
   0xc   : > { %s5161_s20 = scalar_select %p3526_p6, 1, 0 }
   0xd   : > { %p3030_p9 = scmp.eq.s32.totalorder %s3505_s13, 0  ;;  %p3533_p10 = pnand %p2903_p7, %p248_p8 }
   0xe   : > { %s3424_s22 = smov [#allocation2]  }
   0xf   : > { %s266_s23 = sshll.u32 %s3424_s22, 4  ;;  %p3022_p11 = pneg %p3533_p10  ;;  %s267_s23 = int_to_ptr.vmem [resolvable:$true] %s266_s23 }
  0x10   : > { %s3343_s24 = scalar_lea.vmem %s267_s23, 2048  ;;  %p3351_p3 = scmp.lt.s32.totalorder %s267_s23, %s267_s23 }
  0x11   : > { %p3023_p12 = pnand %p3030_p9, %p3022_p11  ;;  %p3344_p0 = scmp.ne.s32.totalorder %s267_s23, %s3343_s24 }
  0x12   : > { %p3352_p4 = scmp.lt.s32.totalorder %s3343_s24, %s3343_s24 }
  0x13   : > { %p3334_p13 = pneg %p3023_p12 }
  0x14   : > { %p3353_p6 = por %p3352_p4, %p3351_p3 }
  0x15   : > { %p3346_p1 = pnand %p3344_p0, %p3334_p13 }
  0x17   : > { %p3347_p2 = pneg %p3346_p1 }
  0x19   : > { %p3354_p7 = pnand %p3353_p6, %p3347_p2 }
  0x1b   : > { %3357 = shalt.err (!%p3354_p7)
}
  0x1c   : > { %s3425_s25 = smov 128   ;;  %s3426_s26 = smov 8  }
  0x1d   : > { %3025 = dma.hbm_to_vmem [thread:$0]  (!%p3023_p12), %s5137_s3, 2048, %s267_s23, [#allocation3], %s3425_s25, %s3425_s25, %s3426_s26  }
  0x1e   : > { %306 = sbr.rel (%p3533_p10) target bundleno = 1357 (0x54d), region = 56 }
  0x23   : > { %3401 = dma.done.wait (%p3030_p9), [#allocation3], 2048  }
  0x24   : > { %3403 = vsyncadd (%p3030_p9), [#allocation3], 4294965248  ;;  %s2909_s29 = sshll.u32 %s3505_s13, 5  ;;  %v5144_v0 = vmov 2   ;;  %v5146_v1 = vmov 1   ;;  %v5150_v2 = vmov 0  }
  0x25   : > { %3075 = vset.pattern.permute.xlu0 %v5144_v0  ;;  %3074 = vset.pattern.permute.xlu1 %v5146_v1  ;;  %p343_p6 = scmp.lt.s32.totalorder %s2909_s29, 63  ;;  %v5148_v8 = vmov 3   ;;  %v3147_v16 = vld [vmem:[#allocation2 + $0x74] ss:$8 sps:$4 sm:$0xff]   ;;  %v3149_v17 = vld [vmem:[#allocation2 + $0x70] ss:$8 sps:$4 sm:$0xff]  }
  0x26   : > { %1378 = vmatprep.mubr.bf16.mxu0 %v5150_v2  ;;  %1458 = vmatprep.mubr.bf16.mxu1 %v5150_v2  ;;  %v3150_v19 = vld [vmem:[#allocation2 + $0x64] ss:$8 sps:$4 sm:$0xff]   ;;  %v3152_v20 = vld [vmem:[#allocation2 + $0x60] ss:$8 sps:$4 sm:$0xff]   ;;  %v3153_v22 = vld [vmem:[#allocation2 + $0x54] ss:$8 sps:$4 sm:$0xff]  }
  0x27   : > { %s5187_s29 = smov (!%p343_p6, %s2909_s29), 63  ;;  %1346 = vmatprep.subr.bf16.mxu0 %v3147_v16  ;;  %3000 = vmatprep.subr.bf16.mxu1 %v3147_v16  ;;  %v3155_v23 = vld [vmem:[#allocation2 + $0x50] ss:$8 sps:$4 sm:$0xff]   ;;  %v3156_v25 = vld [vmem:[#allocation2 + $0x44] ss:$8 sps:$4 sm:$0xff]   ;;  %s3431_s27 = smov [#allocation5]  }
  0x28   : > { %s2910_s14 = sshll.u32 %s5187_s29, 3  ;;  %1347 = vmatpush1.bf16.msra.mxu0 %v3149_v17  ;;  %3008 = vmatpush1.bf16.msra.mxu1 %v3149_v17  ;;  %v3158_v26 = vld [vmem:[#allocation2 + $0x40] ss:$8 sps:$4 sm:$0xff]   ;;  %v3159_v27 = vld [vmem:[#allocation2 + $0x34] ss:$8 sps:$4 sm:$0xff]   ;;  %s3362_s28 = sshll.u32 %s3431_s27, 4  ;;  %s3363_s28 = int_to_ptr.vmem [resolvable:$false] %s3362_s28 }
  0x29   : > { %s3558_s21 = scalar_lea.vmem %s5134_s0, %s2910_s14  ;;  %1348 = vmatprep.subr.bf16.mxu0 %v3150_v19  ;;  %3001 = vmatprep.subr.bf16.mxu1 %v3150_v19  ;;  %v3161_v28 = vld [vmem:[#allocation2 + $0x30] ss:$8 sps:$4 sm:$0xff]   ;;  %v3162_v29 = vld [vmem:[#allocation2 + $0x24] ss:$8 sps:$4 sm:$0xff]   ;;  %v3164_v30 = vld [vmem:[#allocation2 + $0x20] ss:$8 sps:$4 sm:$0xff]  }
  0x2a   : > { %v3561_v3 = vld [vmem:[%s3558_s21] sm:$0xff]  ;;  %v353_v4 = vld [vmem:[%s3558_s21 + $0x18] sm:$0xff]  ;;  %v3567_v5 = vld [vmem:[%s3558_s21 + $0x8] sm:$0xff]  ;;  %s339_s14 = sand.u32 1, %s3414_s10   ;;  %s3364_s29 = scalar_lea.vmem %s3363_s28, 16384 }
  0x2b   : > { %815 = vperm.xlu0 %3075, %v3561_v3   ;;  %619 = vperm.xlu1 %3074, %v3561_v3   ;;  %v3571_v6 = vld [vmem:[%s3558_s21 + $0x30] sm:$0xff]  ;;  %v3581_v9 = vld [vmem:[%s3558_s21 + $0x28] sm:$0xff]  ;;  %v3586_v10 = vld [vmem:[%s3558_s21 + $0x40] sm:$0xff]  ;;  %s2908_s16 = sshll.u32 %s339_s14, 9 }
  0x2c   : > { %v352_v7 = vld [vmem:[%s3558_s21 + $0x10] sm:$0xff]  ;;  %v3589_v11 = vld [vmem:[%s3558_s21 + $0x58] sm:$0xff]  ;;  %v3602_v13 = vld [vmem:[%s3558_s21 + $0x20] sm:$0xff]  ;;  %1349 = vmatpush1.bf16.msra.mxu0 %v3152_v20  ;;  %3009 = vmatpush1.bf16.msra.mxu1 %v3152_v20  ;;  %s4915_s17 = scalar_lea.vmem [#allocation5], %s2908_s16 }
  0x2d   : > { %v3593_v12 = vld [vmem:[%s3558_s21 + $0x70] sm:$0xff]  ;;  %v3607_v14 = vld [vmem:[%s3558_s21 + $0x38] sm:$0xff]  ;;  %v3617_v18 = vld [vmem:[%s3558_s21 + $0x68] sm:$0xff]  ;;  %1350 = vmatprep.subr.bf16.mxu0 %v3153_v22  ;;  %3002 = vmatprep.subr.bf16.mxu1 %v3153_v22  ;;  %s2828_s22 = sshll.u32 %s4915_s17, 4  ;;  %s5086_s22 = int_to_ptr.vmem [resolvable:$true] %s2828_s22 }
  0x2e   : > { %v3611_v15 = vld [vmem:[%s3558_s21 + $0x50] sm:$0xff]  ;;  %v3622_v21 = vld [vmem:[%s3558_s21 + $0x80] sm:$0xff]  ;;  %v3627_v24 = vld [vmem:[%s3558_s21 + $0x98] sm:$0xff]  ;;  %s3358_s26 = scalar_lea.vmem %s5086_s22, 8192  ;;  %p3365_p11 = scmp.lt.s32.totalorder %s5086_s22, %s3363_s28 }
  0x2f   : > { %827 = vperm.xlu0 %3075, %v353_v4   ;;  %623 = vperm.xlu1 %3074, %v3567_v5   ;;  %v3165_v31 = vld [vmem:[#allocation2 + $0x14] ss:$8 sps:$4 sm:$0xff]   ;;  %v3167_v32 = vld [vmem:[#allocation2 + $0x10] ss:$8 sps:$4 sm:$0xff]   ;;  %v3168_v33 = vld [vmem:[#allocation2 + $0x4] ss:$8 sps:$4 sm:$0xff]   ;;  %p3359_p8 = scmp.ne.s32.totalorder %s5086_s22, %s3358_s26  ;;  %p3366_p12 = scmp.lt.s32.totalorder %s3364_s29, %s3358_s26 }
  0x30   : > { %1351 = vmatpush1.bf16.msra.mxu0 %v3155_v23  ;;  %3010 = vmatpush1.bf16.msra.mxu1 %v3155_v23  ;;  %v3170_v34 = vld [vmem:[#allocation2] ss:$8 sps:$4 sm:$0xff]   ;;  %v3654_v35 = vld [vmem:[%s3558_s21 + $0xb0] sm:$0xff]  ;;  %v3673_v39 = vld [vmem:[%s3558_s21 + $0x78] sm:$0xff] }
  0x31   : > { %1352 = vmatprep.subr.bf16.mxu0 %v3156_v25  ;;  %3003 = vmatprep.subr.bf16.mxu1 %v3156_v25  ;;  %v359_v36 = vld [vmem:[%s3558_s21 + $0x48] sm:$0xff]  ;;  %v3667_v38 = vld [vmem:[%s3558_s21 + $0x60] sm:$0xff]  ;;  %v3678_v40 = vld [vmem:[%s3558_s21 + $0x90] sm:$0xff]  ;;  %p3360_p9 = pnand %p3359_p8, %p3522_p5  ;;  %p3367_p13 = por %p3366_p12, %p3365_p11 }
  0x32   : > { %v3661_v37 = vld [vmem:[%s3558_s21 + $0xc8] sm:$0xff]  ;;  %v3687_v42 = vld [vmem:[%s3558_s21 + $0xc0] sm:$0xff]  ;;  %v3697_v45 = vld [vmem:[%s3558_s21 + $0xd8] sm:$0xff] }
  0x33   : > { %839 = vperm.xlu0 %3075, %v3571_v6   ;;  %3076 = vset.pattern.permute.xlu1 %v5144_v0  ;;  %v3683_v41 = vld [vmem:[%s3558_s21 + $0xa8] sm:$0xff]  ;;  %v3720_v52 = vld [vmem:[%s3558_s21 + $0xa0] sm:$0xff]  ;;  %v3735_v57 = vld [vmem:[%s3558_s21 + $0xb8] sm:$0xff]  ;;  %p3361_p10 = pneg %p3360_p9 }
  0x34   : > { %819 = vperm.xlu1 %3076, %v3567_v5   ;;  %1353 = vmatpush1.bf16.msra.mxu0 %v3158_v26  ;;  %v3712_v50 = vld [vmem:[%s3558_s21 + $0x88] sm:$0xff]  ;;  %v3743_v60 = vld [vmem:[%s3558_s21 + $0xd0] sm:$0xff]  ;;  %v382_v23 = vld [vmem:[%s5135_s1] sm:$0xf] }
  0x35   : > { %3011 = vmatpush1.bf16.msra.mxu1 %v3158_v26  ;;  %1354 = vmatprep.subr.bf16.mxu0 %v3159_v27  ;;  %v3751_v63 = vld [vmem:[%s3558_s21 + $0xe8] sm:$0xff]  ;;  %p3368_p0 = pnand %p3367_p13, %p3361_p10 }
  0x36   : > { %3004 = vmatprep.subr.bf16.mxu1 %v3159_v27 }
  0x37   : > { %3088 = vset.pattern.permute.xlu0 %v5146_v1 }
  0x38   : > { %627 = vperm.xlu0 %3088, %v352_v7   ;;  %3077 = vset.pattern.permute.xlu1 %v5148_v8 }
  0x39   : > { %1011 = vperm.xlu1 %3077, %v3561_v3   ;;  %1355 = vmatpush1.bf16.msra.mxu0 %v3161_v28 }
  0x3a   : > { %3012 = vmatpush1.bf16.msra.mxu1 %v3161_v28  ;;  %1356 = vmatprep.subr.bf16.mxu0 %v3162_v29 }
  0x3b   : > { %3005 = vmatprep.subr.bf16.mxu1 %v3162_v29 }
  0x3c   : > { %639 = vperm.xlu0 %3088, %v3581_v9  }
  0x3d   : > { %3078 = vset.pattern.permute.xlu1 %v5150_v2  ;;  %1357 = vmatpush1.bf16.msra.mxu0 %v3164_v30 }
  0x3e   : > { %395 = vperm.xlu1 %3078, %v352_v7   ;;  %3013 = vmatpush1.bf16.msra.mxu1 %v3164_v30 }
  0x3f   : > { %1358 = vmatprep.subr.bf16.mxu0 %v3165_v31  ;;  %3006 = vmatprep.subr.bf16.mxu1 %v3165_v31  ;;  %v3810_v31 = vld [vmem:[%s5136_s2] ss:$0 sm:$0xff] }
  0x40   : > { %651 = vperm.xlu0 %3088, %v3586_v10  }
  0x41   : > { %1359 = vmatpush1.bf16.msra.mxu0 %v3167_v32 }
  0x42   : > { %400 = vperm.xlu1 %3078, %v353_v4   ;;  %3014 = vmatpush1.bf16.msra.mxu1 %v3167_v32 }
  0x43   : > { %1360 = vmatprep.subr.bf16.mxu0 %v3168_v33  ;;  %3007 = vmatprep.subr.bf16.mxu1 %v3168_v33 }
  0x44   : > { %663 = vperm.xlu0 %3088, %v3589_v11  }
  0x45   : > { %1361 = vmatpush1.bf16.msra.mxu0 %v3170_v34 }
  0x46   : > { %3079 = vset.pattern.permute.xlu1 %v5146_v1  ;;  %3015 = vmatpush1.bf16.msra.mxu1 %v3170_v34 }
  0x47   : > { %631 = vperm.xlu1 %3079, %v353_v4  }
  0x48   : > { %675 = vperm.xlu0 %3088, %v3593_v12  }
  0x4b   : > { %3080 = vset.pattern.permute.xlu1 %v5144_v0 }
  0x4c   : > { %3104 = vset.pattern.permute.xlu0 %v5148_v8  ;;  %823 = vperm.xlu1 %3080, %v352_v7  }
  0x4d   : > { %1015 = vperm.xlu0 %3104, %v3567_v5  }
  0x50   : > { %3081 = vset.pattern.permute.xlu1 %v5148_v8 }
  0x51   : > { %1027 = vperm.xlu0 %3104, %v3602_v13   ;;  %1019 = vperm.xlu1 %3081, %v352_v7  }
  0x55   : > { %1039 = vperm.xlu0 %3104, %v3607_v14   ;;  %1023 = vperm.xlu1 %3081, %v353_v4  }
  0x59   : > { %1051 = vperm.xlu0 %3104, %v3611_v15   ;;  %3082 = vset.pattern.permute.xlu1 %v5150_v2 }
  0x5a   : > { %410 = vperm.xlu1 %3082, %v3581_v9  }
  0x5d   : > { %1063 = vperm.xlu0 %3104, %v3617_v18  }
  0x5e   : > { %3083 = vset.pattern.permute.xlu1 %v5146_v1 }
  0x5f   : > { %635 = vperm.xlu1 %3083, %v3602_v13  }
  0x61   : > { %1075 = vperm.xlu0 %3104, %v3622_v21  }
  0x63   : > { %3084 = vset.pattern.permute.xlu1 %v5144_v0 }
  0x64   : > { %831 = vperm.xlu1 %3084, %v3602_v13  }
  0x65   : > { %1087 = vperm.xlu0 %3104, %v3627_v24  }
  0x68   : > { %835 = vperm.xlu1 %3084, %v3581_v9  }
  0x69   : > { %3116 = vset.pattern.permute.xlu0 %v5150_v2 }
  0x6a   : > { %385 = vperm.xlu0 %3116, %v3561_v3  }
  0x6c   : > { %3085 = vset.pattern.permute.xlu1 %v5148_v8 }
  0x6d   : > { %1031 = vperm.xlu1 %3085, %v3581_v9  }
  0x6e   : > { %390 = vperm.xlu0 %3116, %v3567_v5  }
  0x71   : > { %3086 = vset.pattern.permute.xlu1 %v5150_v2 }
  0x72   : > { %405 = vperm.xlu0 %3116, %v3602_v13   ;;  %415 = vperm.xlu1 %3086, %v3571_v6   ;;  %v543_v13 = vlaneseq }
  0x74   : > { %v544_v16 = vshrl.u32 %v543_v13, 7 }
  0x76   : > { %3087 = vset.pattern.permute.xlu1 %v5146_v1  ;;  %420 = vperm.xlu0 %3116, %v3607_v14   ;;  %v3787_v19 = vsub.s32 1, %v544_v16  ;;  %v3789_v20 = vsub.s32 0, %v544_v16  ;;  %v944_v27 = vsub.s32 2, %v544_v16  ;;  %v1140_v34 = vsub.s32 3, %v544_v16 }
  0x77   : > { %643 = vperm.xlu1 %3087, %v3571_v6  }
  0x78   : > { %5163 = vst [vmem:[#allocation8_spill] sm:$0xff] %v3789_v20  ;;  %v3800_v26 = vrot.slane %v382_v23, %v3787_v19  ;;  %v3803_v28 = vrot.slane %v382_v23, %v3789_v20  ;;  %v3814_v33 = vrot.slane %v382_v23, %v944_v27  ;;  %v5165_v20 = vmov 1  }
  0x7a   : > { %435 = vperm.xlu0 %3116, %v3611_v15  }
  0x7b   : > { %647 = vperm.xlu1 %3087, %v3607_v14  }
  0x7e   : > { %450 = vperm.xlu0 %3116, %v3617_v18  }
  0x7f   : > { %3089 = vset.pattern.permute.xlu1 %v5144_v0 }
  0x80   : > { %843 = vperm.xlu1 %3089, %v3607_v14  }
  0x82   : > { %465 = vperm.xlu0 %3116, %v3622_v21  }
  0x84   : > { %3090 = vset.pattern.permute.xlu1 %v5148_v8 }
  0x85   : > { %1035 = vperm.xlu1 %3090, %v3571_v6  }
  0x86   : > { %480 = vperm.xlu0 %3116, %v3627_v24  }
  0x89   : > { %3091 = vset.pattern.permute.xlu1 %v5150_v2 }
  0x8a   : > { %425 = vperm.xlu1 %3091, %v3586_v10   ;;  %495 = vperm.xlu0 %3116, %v3654_v35  }
  0x8e   : > { %430 = vperm.xlu1 %3091, %v359_v36   ;;  %510 = vperm.xlu0 %3116, %v3661_v37  }
  0x92   : > { %3092 = vset.pattern.permute.xlu1 %v5146_v1  ;;  %3126 = vset.pattern.permute.xlu0 %v5144_v0 }
  0x93   : > { %655 = vperm.xlu1 %3092, %v359_v36   ;;  %851 = vperm.xlu0 %3126, %v359_v36  }
  0x97   : > { %3093 = vset.pattern.permute.xlu1 %v5144_v0  ;;  %863 = vperm.xlu0 %3126, %v3667_v38  }
  0x98   : > { %847 = vperm.xlu1 %3093, %v3586_v10  }
  0x9b   : > { %875 = vperm.xlu0 %3126, %v3673_v39  }
  0x9c   : > { %3094 = vset.pattern.permute.xlu1 %v5148_v8 }
  0x9d   : > { %1043 = vperm.xlu1 %3094, %v3586_v10  }
  0x9f   : > { %887 = vperm.xlu0 %3126, %v3678_v40  }
  0xa1   : > { %1047 = vperm.xlu1 %3094, %v359_v36  }
  0xa3   : > { %899 = vperm.xlu0 %3126, %v3683_v41  }
  0xa5   : > { %3095 = vset.pattern.permute.xlu1 %v5150_v2 }
  0xa6   : > { %440 = vperm.xlu1 %3095, %v3589_v11   ;;  %v3691_v43 = vpop.permute.xlu1 %619  ;;  %v3693_v44 = vpop.permute.xlu0 %815 }
  0xa7   : > { %911 = vperm.xlu0 %3126, %v3687_v42   ;;  %v750_v32 = vmul.f32 %v3800_v26, %v3691_v43 }
  0xaa   : > { %3096 = vset.pattern.permute.xlu1 %v5146_v1  ;;  %v3700_v46 = vpop.permute.xlu1 %623  ;;  %v3702_v47 = vpop.permute.xlu0 %827 }
  0xab   : > { %659 = vperm.xlu1 %3096, %v3611_v15   ;;  %923 = vperm.xlu0 %3126, %v3697_v45  }
  0xae   : > { %v3706_v48 = vpop.permute.xlu0 %839 }
  0xaf   : > { %3097 = vset.pattern.permute.xlu1 %v5144_v0  ;;  %v3709_v49 = vpop.permute.xlu1 %819  ;;  %3133 = vset.pattern.permute.xlu0 %v5146_v1 }
  0xb0   : > { %855 = vperm.xlu1 %3097, %v3611_v15   ;;  %687 = vperm.xlu0 %3133, %v3712_v50  }
  0xb3   : > { %v3717_v51 = vpop.permute.xlu0 %627 }
  0xb4   : > { %859 = vperm.xlu1 %3097, %v3589_v11   ;;  %v3723_v53 = vpop.permute.xlu1 %1011  ;;  %699 = vperm.xlu0 %3133, %v3720_v52  }
  0xb7   : > { %v3726_v54 = vpop.permute.xlu0 %639 }
  0xb8   : > { %3098 = vset.pattern.permute.xlu1 %v5148_v8  ;;  %711 = vperm.xlu0 %3133, %v3735_v57  }
  0xb9   : > { %1055 = vperm.xlu1 %3098, %v3589_v11   ;;  %v3730_v55 = vpop.permute.xlu1 %395 }
  0xba   : > { %v549_v16 = vmul.f32 %v3803_v28, %v3730_v55 }
  0xbb   : > { %v3732_v56 = vpop.permute.xlu0 %651 }
  0xbc   : > { %723 = vperm.xlu0 %3133, %v3743_v60  }
  0xbd   : > { %3099 = vset.pattern.permute.xlu1 %v5150_v2  ;;  %v401_v58 = vpop.permute.xlu1 %400 }
  0xbe   : > { %445 = vperm.xlu1 %3099, %v3667_v38   ;;  %v550_v13 = vmul.f32 %v3803_v28, %v401_v58 }
  0xbf   : > { %v3740_v59 = vpop.permute.xlu0 %663 }
  0xc0   : > { %735 = vperm.xlu0 %3133, %v3751_v63  }
  0xc2   : > { %3100 = vset.pattern.permute.xlu1 %v5146_v1  ;;  %v632_v61 = vpop.permute.xlu1 %631 }
  0xc3   : > { %667 = vperm.xlu1 %3100, %v3667_v38   ;;  %v3748_v62 = vpop.permute.xlu0 %675  ;;  %v753_v27 = vmul.f32 %v3800_v26, %v632_v61 }
  0xc4   : > { %3137 = vset.pattern.permute.xlu0 %v5148_v8 }
  0xc5   : > { %1099 = vperm.xlu0 %3137, %v3654_v35  }
  0xc7   : > { %671 = vperm.xlu1 %3100, %v3617_v18   ;;  %v3755_v3 = vpop.permute.xlu1 %823 }
  0xc8   : > { %v1016_v4 = vpop.permute.xlu0 %1015 }
  0xc9   : > { %1111 = vperm.xlu0 %3137, %v3661_v37  }
  0xcb   : > { %3101 = vset.pattern.permute.xlu1 %v5144_v0 }
  0xcc   : > { %867 = vperm.xlu1 %3101, %v3617_v18   ;;  %v3761_v5 = vpop.permute.xlu1 %1019  ;;  %v3763_v6 = vpop.permute.xlu0 %1027 }
  0xd0   : > { %3102 = vset.pattern.permute.xlu1 %v5148_v8  ;;  %v1024_v7 = vpop.permute.xlu1 %1023  ;;  %v3767_v9 = vpop.permute.xlu0 %1039 }
  0xd1   : > { %1059 = vperm.xlu1 %3102, %v3667_v38  }
  0xd4   : > { %v3770_v10 = vpop.permute.xlu0 %1051 }
  0xd5   : > { %3103 = vset.pattern.permute.xlu1 %v5150_v2  ;;  %v3773_v11 = vpop.permute.xlu1 %410 }
  0xd6   : > { %455 = vperm.xlu1 %3103, %v3593_v12  }
  0xd8   : > { %v3776_v14 = vpop.permute.xlu0 %1063 }
  0xda   : > { %460 = vperm.xlu1 %3103, %v3673_v39   ;;  %v3779_v15 = vpop.permute.xlu1 %635 }
  0xdc   : > { %v3781_v17 = vpop.permute.xlu0 %1075 }
  0xde   : > { %3105 = vset.pattern.permute.xlu1 %v5146_v1 }
  0xdf   : > { %679 = vperm.xlu1 %3105, %v3673_v39   ;;  %v3785_v18 = vpop.permute.xlu1 %831 }
  0xe0   : > { %v3791_v22 = vpop.permute.xlu0 %1087 }
  0xe3   : > { %3106 = vset.pattern.permute.xlu1 %v5144_v0  ;;  %v3797_v25 = vpop.permute.xlu1 %835  ;;  %v946_v0 = vmul.f32 %v3814_v33, %v3693_v44  ;;  %v589_v44 = vadd.f32 %v3810_v31, %v550_v13 }
  0xe4   : > { %871 = vperm.xlu1 %3106, %v3593_v12  }
  0xe5   : > { %v386_v29 = vpop.permute.xlu0 %385 }
  0xe6   : > { %v547_v30 = vmul.f32 %v3803_v28, %v386_v29 }
  0xe8   : > { %v586_v36 = vadd.f32 %v3810_v31, %v547_v30  ;;  %3107 = vset.pattern.permute.xlu1 %v5148_v8  ;;  %v3818_v38 = vpop.permute.xlu1 %1031  ;;  %v751_v30 = vmul.f32 %v3800_v26, %v3700_v46  ;;  %v3830_v8 = vrot.slane %v382_v23, %v1140_v34  ;;  %v949_v46 = vmul.f32 %v3814_v33, %v3702_v47 }
  0xe9   : > { %v391_v29 = vpop.permute.xlu0 %390  ;;  %1067 = vperm.xlu1 %3107, %v3593_v12   ;;  %v947_v12 = vmul.f32 %v3814_v33, %v3709_v49  ;;  %v752_v23 = vmul.f32 %v3800_v26, %v3717_v51  ;;  %v588_v49 = vadd.f32 %v3810_v31, %v549_v16  ;;  %v785_v34 = vadd.f32 %v753_v27, %v589_v44 }
  0xea   : > { %v782_v1 = vadd.f32 %v750_v32, %v586_v36  ;;  %v548_v43 = vmul.f32 %v3803_v28, %v391_v29  ;;  %v1143_v55 = vmul.f32 %v3830_v8, %v1016_v4  ;;  %v1142_v13 = vmul.f32 %v3830_v8, %v3723_v53 }
  0xeb   : > { %v948_v4 = vmul.f32 %v3814_v33, %v3755_v3  ;;  %v784_v27 = vadd.f32 %v752_v23, %v588_v49  ;;  %v1144_v53 = vmul.f32 %v3830_v8, %v3761_v5  ;;  %v552_v3 = vmul.f32 %v3803_v28, %v3773_v11 }
  0xec   : > { %v587_v58 = vadd.f32 %v3810_v31, %v548_v43  ;;  %v978_v29 = vadd.f32 %v946_v0, %v782_v1  ;;  %v1145_v0 = vmul.f32 %v3830_v8, %v1024_v7  ;;  %v5164_v1 = vmov 0  }
  0xed   : > { %v406_v32 = vpop.permute.xlu0 %405  ;;  %1071 = vperm.xlu1 %3107, %v3673_v39   ;;  %v416_v36 = vpop.permute.xlu1 %415  ;;  %v754_v7 = vmul.f32 %v3800_v26, %v3779_v15  ;;  %v980_v44 = vadd.f32 %v948_v4, %v784_v27  ;;  %v755_v5 = vmul.f32 %v3800_v26, %v3726_v54  ;;  %v591_v11 = vadd.f32 %v3810_v31, %v552_v3 }
  0xee   : > { %v783_v61 = vadd.f32 %v751_v30, %v587_v58  ;;  %v551_v2 = vmul.f32 %v3803_v28, %v406_v32  ;;  %v1174_v30 = vadd.f32 %v1142_v13, %v978_v29  ;;  %v981_v58 = vadd.f32 %v949_v46, %v785_v34 }
  0xef   : > { %v1176_v46 = vadd.f32 %v1144_v53, %v980_v44  ;;  %v950_v15 = vmul.f32 %v3814_v33, %v3785_v18  ;;  %v951_v49 = vmul.f32 %v3814_v33, %v3797_v25  ;;  %v1146_v54 = vmul.f32 %v3830_v8, %v3763_v6 }
  0xf0   : > { %v979_v39 = vadd.f32 %v947_v12, %v783_v61  ;;  %v590_v47 = vadd.f32 %v3810_v31, %v551_v2  ;;  %v1177_v32 = vadd.f32 %v1145_v0, %v981_v58  ;;  %v787_v0 = vadd.f32 %v755_v5, %v591_v11 }
  0xf1   : > { %3108 = vset.pattern.permute.xlu1 %v5164_v1  ;;  %v421_v43 = vpop.permute.xlu0 %420  ;;  %v952_v3 = vmul.f32 %v3814_v33, %v3706_v48  ;;  %v5167_v5 = vmov 3  }
  0xf2   : > { %470 = vperm.xlu1 %3108, %v3712_v50   ;;  %v644_v51 = vpop.permute.xlu1 %643  ;;  %v1175_v16 = vadd.f32 %v1143_v55, %v979_v39  ;;  %v786_v61 = vadd.f32 %v754_v7, %v590_v47  ;;  %v1207_v23 = vpack.c.bf16 %v1177_v32, %v1176_v46  ;;  %v553_v39 = vmul.f32 %v3803_v28, %v416_v36 }
  0xf3   : > { %v554_v4 = vmul.f32 %v3803_v28, %v421_v43  ;;  %v5166_v47 = vmov 2   ;;  %v756_v25 = vmul.f32 %v3800_v26, %v644_v51 }
  0xf4   : > { %v1206_v12 = vpack.c.bf16 %v1175_v16, %v1174_v30  ;;  %v982_v13 = vadd.f32 %v950_v15, %v786_v61  ;;  %v1147_v30 = vmul.f32 %v3830_v8, %v3818_v38  ;;  %v983_v16 = vadd.f32 %v951_v49, %v787_v0 }
  0xf5   : > { %v3858_v2 = vpop.permute.xlu0 %435  ;;  %v1223_v27 = vmax.bf16 %v5164_v1, %v1207_v23  ;;  %v592_v6 = vadd.f32 %v3810_v31, %v553_v39  ;;  %v593_v36 = vadd.f32 %v3810_v31, %v554_v4  ;;  %v1149_v61 = vmul.f32 %v3830_v8, %v3767_v9  ;;  %v3902_v23 = vld [vmem:[%s3558_s21 + $0xe0] sm:$0xff] }
  0xf6   : > { %3109 = vset.pattern.permute.xlu1 %v5165_v20  ;;  %v648_v55 = vpop.permute.xlu1 %647  ;;  %v1222_v29 = vmax.bf16 %v5164_v1, %v1206_v12  ;;  %v1178_v58 = vadd.f32 %v1146_v54, %v982_v13  ;;  %v1179_v38 = vadd.f32 %v1147_v30, %v983_v16  ;;  %1123 = vperm.xlu0 %3137, %v3902_v23  }
  0xf7   : > { %683 = vperm.xlu1 %3109, %v3622_v21   ;;  %v757_v43 = vmul.f32 %v3800_v26, %v648_v55  ;;  %v788_v7 = vadd.f32 %v756_v25, %v592_v6 }
  0xf8   : > { %1379 = vmatmul.mubr.bf16.vlgmr.msra.gmra.mxu0 %v1222_v29  ;;  %v1208_v32 = vpack.c.bf16 %v1179_v38, %v1178_v58 }
  0xf9   : > { %v3870_v34 = vpop.permute.xlu0 %450  ;;  %1388 = vmatprep.mubr.bf16.mxu0 %v5164_v1  ;;  %v789_v12 = vadd.f32 %v757_v43, %v593_v36  ;;  %v984_v48 = vadd.f32 %v952_v3, %v788_v7 }
  0xfa   : > { %v1224_v15 = vmax.bf16 %v5164_v1, %v1208_v32  ;;  %3139 = vset.pattern.permute.xlu0 %v5164_v1 }
  0xfb   : > { %3110 = vset.pattern.permute.xlu1 %v5166_v47  ;;  %v844_v18 = vpop.permute.xlu1 %843  ;;  %525 = vperm.xlu0 %3139, %v3902_v23  }
  0xfc   : > { %879 = vperm.xlu1 %3110, %v3622_v21   ;;  %v953_v51 = vmul.f32 %v3814_v33, %v844_v18 }
  0xfd   : > { %v3886_v53 = vpop.permute.xlu0 %465 }
  0xfe   : > { %v985_v55 = vadd.f32 %v953_v51, %v789_v12 }
 0x100   : > { %883 = vperm.xlu1 %3110, %v3712_v50   ;;  %1389 = vmatmul.mubr.bf16.gmra.mxu0 %v1223_v27  ;;  %v1036_v21 = vpop.permute.xlu1 %1035  ;;  %v1181_v49 = vadd.f32 %v1149_v61, %v985_v55  ;;  %v758_v27 = vmul.f32 %v3800_v26, %v3732_v56 }
 0x101   : > { %1398 = vmatprep.mubr.bf16.mxu0 %v5164_v1  ;;  %v1148_v44 = vmul.f32 %v3830_v8, %v1036_v21  ;;  %v3896_v29 = vpop.permute.xlu0 %480 }
 0x103   : > { %v1180_v11 = vadd.f32 %v1148_v44, %v984_v48 }
 0x104   : > { %3111 = vset.pattern.permute.xlu1 %v5167_v5 }
 0x105   : > { %1079 = vperm.xlu1 %3111, %v3712_v50   ;;  %v426_v46 = vpop.permute.xlu1 %425  ;;  %v1209_v54 = vpack.c.bf16 %v1181_v49, %v1180_v11  ;;  %v3907_v13 = vpop.permute.xlu0 %495 }
 0x106   : > { %v555_v0 = vmul.f32 %v3803_v28, %v426_v46  ;;  %v3938_v46 = vld [vmem:[%s3558_s21 + $0xf8] sm:$0xff] }
 0x107   : > { %v1225_v39 = vmax.bf16 %v5164_v1, %v1209_v54  ;;  %540 = vperm.xlu0 %3139, %v3938_v46  }
 0x108   : > { %1399 = vmatmul.mubr.bf16.gmra.mxu0 %v1224_v15  ;;  %v594_v6 = vadd.f32 %v3810_v31, %v555_v0  ;;  %v557_v15 = vmul.f32 %v3803_v28, %v3858_v2  ;;  %v761_v2 = vmul.f32 %v3800_v26, %v3740_v59 }
 0x109   : > { %3112 = vset.pattern.permute.xlu1 %v5164_v1  ;;  %v431_v9 = vpop.permute.xlu1 %430  ;;  %1408 = vmatprep.mubr.bf16.mxu0 %v5164_v1  ;;  %v3915_v4 = vpop.permute.xlu0 %510 }
 0x10a   : > { %475 = vperm.xlu1 %3112, %v3678_v40   ;;  %v556_v18 = vmul.f32 %v3803_v28, %v431_v9  ;;  %v790_v7 = vadd.f32 %v758_v27, %v594_v6  ;;  %v596_v54 = vadd.f32 %v3810_v31, %v557_v15 }
 0x10b   : > { %3143 = vset.pattern.permute.xlu0 %v5166_v47 }
 0x10c   : > { %v595_v36 = vadd.f32 %v3810_v31, %v556_v18 }
 0x10e   : > { %3113 = vset.pattern.permute.xlu1 %v5165_v20  ;;  %v656_v50 = vpop.permute.xlu1 %655  ;;  %v852_v16 = vpop.permute.xlu0 %851 }
 0x10f   : > { %691 = vperm.xlu1 %3113, %v3678_v40   ;;  %v759_v25 = vmul.f32 %v3800_v26, %v656_v50  ;;  %v955_v3 = vmul.f32 %v3814_v33, %v852_v16  ;;  %v1152_v16 = vmul.f32 %v3830_v8, %v3770_v10 }
 0x110   : > { %1409 = vmatmul.mubr.bf16.gmra.mxu0 %v1225_v39 }
 0x111   : > { %1418 = vmatprep.mubr.bf16.mxu0 %v5164_v1  ;;  %v791_v58 = vadd.f32 %v759_v25, %v595_v36 }
 0x113   : > { %695 = vperm.xlu1 %3113, %v3627_v24   ;;  %v848_v30 = vpop.permute.xlu1 %847  ;;  %v987_v21 = vadd.f32 %v955_v3, %v791_v58 }
 0x114   : > { %v954_v38 = vmul.f32 %v3814_v33, %v848_v30 }
 0x116   : > { %v986_v12 = vadd.f32 %v954_v38, %v790_v7 }
 0x117   : > { %3114 = vset.pattern.permute.xlu1 %v5166_v47 }
 0x118   : > { %891 = vperm.xlu1 %3114, %v3627_v24   ;;  %v1044_v43 = vpop.permute.xlu1 %1043 }
 0x119   : > { %v1150_v51 = vmul.f32 %v3830_v8, %v1044_v43 }
 0x11b   : > { %v1182_v24 = vadd.f32 %v1150_v51, %v986_v12 }
 0x11c   : > { %3115 = vset.pattern.permute.xlu1 %v5167_v5  ;;  %v1048_v56 = vpop.permute.xlu1 %1047 }
 0x11d   : > { %v1151_v44 = vmul.f32 %v3830_v8, %v1048_v56  ;;  %1083 = vperm.xlu1 %3115, %v3678_v40   ;;  %v3944_v40 = vld [vmem:[%s3558_s21 + $0xf0] sm:$0xff]  ;;  %v560_v56 = vmul.f32 %v3803_v28, %v3870_v34  ;;  %v1155_v34 = vmul.f32 %v3830_v8, %v3776_v14  ;;  %s2999_s21 = sshll.u32 %s3505_s13, 13  ;;  %s5094_s13 = scalar_lea.sflag [#allocation4], %s339_s14 }
 0x11e   : > { %935 = vperm.xlu0 %3143, %v3944_v40   ;;  %s5084_s25 = scalar_lea.hbm %s5143_s9, %s2999_s21 }
 0x11f   : > { %v1183_v32 = vadd.f32 %v1151_v44, %v987_v21 }
 0x121   : > { %v1210_v61 = vpack.c.bf16 %v1183_v32, %v1182_v24  ;;  %3117 = vset.pattern.permute.xlu1 %v5164_v1  ;;  %v441_v55 = vpop.permute.xlu1 %440  ;;  %v864_v24 = vpop.permute.xlu0 %863 }
 0x122   : > { %485 = vperm.xlu1 %3117, %v3720_v52   ;;  %v558_v49 = vmul.f32 %v3803_v28, %v441_v55  ;;  %3146 = vset.pattern.permute.xlu0 %v5167_v5  ;;  %v958_v15 = vmul.f32 %v3814_v33, %v864_v24 }
 0x123   : > { %v1226_v48 = vmax.bf16 %v5164_v1, %v1210_v61  ;;  %1135 = vperm.xlu0 %3146, %v3938_v46  }
 0x124   : > { %v597_v39 = vadd.f32 %v3810_v31, %v558_v49 }
 0x125   : > { %1419 = vmatmul.mubr.bf16.gmra.mxu0 %v1226_v48 }
 0x126   : > { %490 = vperm.xlu1 %3117, %v3683_v41   ;;  %v660_v11 = vpop.permute.xlu1 %659  ;;  %1428 = vmatprep.mubr.bf16.mxu0 %v5164_v1  ;;  %v793_v6 = vadd.f32 %v761_v2, %v597_v39 }
 0x127   : > { %v760_v50 = vmul.f32 %v3800_v26, %v660_v11 }
 0x129   : > { %v792_v30 = vadd.f32 %v760_v50, %v596_v54 }
 0x12a   : > { %3118 = vset.pattern.permute.xlu1 %v5165_v20 }
 0x12b   : > { %703 = vperm.xlu1 %3118, %v3683_v41   ;;  %v856_v9 = vpop.permute.xlu1 %855 }
 0x12c   : > { %v956_v0 = vmul.f32 %v3814_v33, %v856_v9 }
 0x12e   : > { %v988_v27 = vadd.f32 %v956_v0, %v792_v30 }
 0x12f   : > { %3119 = vset.pattern.permute.xlu1 %v5166_v47  ;;  %v860_v18 = vpop.permute.xlu1 %859 }
 0x130   : > { %895 = vperm.xlu1 %3119, %v3720_v52   ;;  %v957_v25 = vmul.f32 %v3814_v33, %v860_v18  ;;  %v1184_v58 = vadd.f32 %v1152_v16, %v988_v27 }
 0x132   : > { %v989_v36 = vadd.f32 %v957_v25, %v793_v6  ;;  %v876_v25 = vpop.permute.xlu0 %875 }
 0x134   : > { %3120 = vset.pattern.permute.xlu1 %v5167_v5  ;;  %v1056_v59 = vpop.permute.xlu1 %1055 }
 0x135   : > { %v1153_v43 = vmul.f32 %v3830_v8, %v1056_v59  ;;  %1091 = vperm.xlu1 %3120, %v3720_v52  }
 0x136   : > { %v4002_v6 = vpop.permute.xlu0 %887 }
 0x137   : > { %v1185_v3 = vadd.f32 %v1153_v43, %v989_v36  ;;  %v764_v36 = vmul.f32 %v3800_v26, %v3748_v62 }
 0x139   : > { %v1211_v38 = vpack.c.bf16 %v1185_v3, %v1184_v58  ;;  %1095 = vperm.xlu1 %3120, %v3683_v41   ;;  %v446_v7 = vpop.permute.xlu1 %445  ;;  %v599_v41 = vadd.f32 %v3810_v31, %v560_v56 }
 0x13a   : > { %v559_v21 = vmul.f32 %v3803_v28, %v446_v7  ;;  %v961_v7 = vmul.f32 %v3814_v33, %v876_v25 }
 0x13b   : > { %v1227_v51 = vmax.bf16 %v5164_v1, %v1211_v38 }
 0x13c   : > { %v598_v32 = vadd.f32 %v3810_v31, %v559_v21 }
 0x13d   : > { %3121 = vset.pattern.permute.xlu1 %v5164_v1  ;;  %1429 = vmatmul.mubr.bf16.gmra.mxu0 %v1227_v51 }
 0x13e   : > { %500 = vperm.xlu1 %3121, %v3735_v57   ;;  %v668_v10 = vpop.permute.xlu1 %667  ;;  %1438 = vmatprep.mubr.bf16.mxu0 %v5164_v1 }
 0x13f   : > { %v762_v44 = vmul.f32 %v3800_v26, %v668_v10  ;;  %v4013_v10 = vpop.permute.xlu0 %899 }
 0x141   : > { %v794_v11 = vadd.f32 %v762_v44, %v598_v32 }
 0x142   : > { %3122 = vset.pattern.permute.xlu1 %v5165_v20  ;;  %v672_v52 = vpop.permute.xlu1 %671 }
 0x143   : > { %707 = vperm.xlu1 %3122, %v3654_v35   ;;  %v763_v12 = vmul.f32 %v3800_v26, %v672_v52  ;;  %v990_v50 = vadd.f32 %v958_v15, %v794_v11  ;;  %v4019_v24 = vpop.permute.xlu0 %911 }
 0x145   : > { %v795_v55 = vadd.f32 %v763_v12, %v599_v41 }
 0x147   : > { %3123 = vset.pattern.permute.xlu1 %v5166_v47  ;;  %v868_v61 = vpop.permute.xlu1 %867 }
 0x148   : > { %v959_v48 = vmul.f32 %v3814_v33, %v868_v61  ;;  %903 = vperm.xlu1 %3123, %v3654_v35  }
 0x14a   : > { %v991_v49 = vadd.f32 %v959_v48, %v795_v55  ;;  %v563_v55 = vmul.f32 %v3803_v28, %v3886_v53  ;;  %v4026_v48 = vpop.permute.xlu0 %923  ;;  %v1158_v53 = vmul.f32 %v3830_v8, %v3781_v17  ;;  %v3173_v17 = vld [vmem:[%s5139_s5 + $0x74] ss:$8 sps:$4 sm:$0xff]  }
 0x14b   : > { %1807 = vmatprep.subr.bf16.mxu1 %v3173_v17  ;;  %v3197_v17 = vld [vmem:[%s5139_s5 + $0xf4] ss:$8 sps:$4 sm:$0xff]  }
 0x14c   : > { %v1187_v9 = vadd.f32 %v1155_v34, %v991_v49  ;;  %907 = vperm.xlu1 %3123, %v3735_v57   ;;  %v1060_v54 = vpop.permute.xlu1 %1059  ;;  %v602_v11 = vadd.f32 %v3810_v31, %v563_v55  ;;  %v3185_v55 = vld [vmem:[%s5139_s5 + $0x34] ss:$8 sps:$4 sm:$0xff]  }
 0x14d   : > { %v1154_v2 = vmul.f32 %v3830_v8, %v1060_v54 }
 0x14e   : > { %v688_v54 = vpop.permute.xlu0 %687 }
 0x14f   : > { %v1186_v39 = vadd.f32 %v1154_v2, %v990_v50 }
 0x150   : > { %3124 = vset.pattern.permute.xlu1 %v5167_v5 }
 0x151   : > { %v1212_v14 = vpack.c.bf16 %v1187_v9, %v1186_v39  ;;  %1103 = vperm.xlu1 %3124, %v3735_v57   ;;  %v456_v0 = vpop.permute.xlu1 %455 }
 0x152   : > { %v561_v16 = vmul.f32 %v3803_v28, %v456_v0  ;;  %v767_v0 = vmul.f32 %v3800_v26, %v688_v54  ;;  %v3188_v54 = vld [vmem:[%s5139_s5 + $0x24] ss:$8 sps:$4 sm:$0xff]  }
 0x153   : > { %v1228_v35 = vmax.bf16 %v5164_v1, %v1212_v14 }
 0x154   : > { %v600_v43 = vadd.f32 %v3810_v31, %v561_v16 }
 0x155   : > { %3125 = vset.pattern.permute.xlu1 %v5164_v1  ;;  %1439 = vmatmul.mubr.bf16.gmra.mxu0 %v1228_v35  ;;  %v461_v18 = vpop.permute.xlu1 %460 }
 0x156   : > { %505 = vperm.xlu1 %3125, %v3687_v42   ;;  %1448 = vmatprep.mubr.bf16.mxu0 %v5164_v1  ;;  %v562_v57 = vmul.f32 %v3803_v28, %v461_v18  ;;  %v796_v56 = vadd.f32 %v764_v36, %v600_v43 }
 0x158   : > { %v601_v58 = vadd.f32 %v3810_v31, %v562_v57 }
 0x15a   : > { %3127 = vset.pattern.permute.xlu1 %v5165_v20  ;;  %v680_v30 = vpop.permute.xlu1 %679 }
 0x15b   : > { %715 = vperm.xlu1 %3127, %v3687_v42   ;;  %v765_v59 = vmul.f32 %v3800_v26, %v680_v30 }
 0x15d   : > { %v797_v38 = vadd.f32 %v765_v59, %v601_v58 }
 0x15f   : > { %719 = vperm.xlu1 %3127, %v3661_v37   ;;  %v872_v27 = vpop.permute.xlu1 %871  ;;  %v993_v21 = vadd.f32 %v961_v7, %v797_v38  ;;  %v3176_v38 = vld [vmem:[%s5139_s5 + $0x64] ss:$8 sps:$4 sm:$0xff]   ;;  %v566_v7 = vmul.f32 %v3803_v28, %v3896_v29 }
 0x160   : > { %v960_v51 = vmul.f32 %v3814_v33, %v872_v27 }
 0x162   : > { %v992_v41 = vadd.f32 %v960_v51, %v796_v56  ;;  %v3179_v51 = vld [vmem:[%s5139_s5 + $0x54] ss:$8 sps:$4 sm:$0xff]  }
 0x163   : > { %3128 = vset.pattern.permute.xlu1 %v5166_v47 }
 0x164   : > { %915 = vperm.xlu1 %3128, %v3661_v37   ;;  %v1068_v3 = vpop.permute.xlu1 %1067 }
 0x165   : > { %v1156_v52 = vmul.f32 %v3830_v8, %v1068_v3  ;;  %v3171_v3 = vld [vmem:[%s5139_s5 + $0x70] ss:$8 sps:$4 sm:$0xff]  }
 0x167   : > { %v1188_v37 = vadd.f32 %v1156_v52, %v992_v41  ;;  %v3182_v41 = vld [vmem:[%s5139_s5 + $0x44] ss:$8 sps:$4 sm:$0xff]  }
 0x168   : > { %3129 = vset.pattern.permute.xlu1 %v5167_v5  ;;  %v1072_v62 = vpop.permute.xlu1 %1071 }
 0x169   : > { %v1157_v12 = vmul.f32 %v3830_v8, %v1072_v62  ;;  %1107 = vperm.xlu1 %3129, %v3687_v42   ;;  %v3177_v62 = vld [vmem:[%s5139_s5 + $0x50] ss:$8 sps:$4 sm:$0xff]  }
 0x16b   : > { %v1189_v44 = vadd.f32 %v1157_v12, %v993_v21  ;;  %v605_v21 = vadd.f32 %v3810_v31, %v566_v7 }
 0x16d   : > { %v1213_v32 = vpack.c.bf16 %v1189_v44, %v1188_v37  ;;  %3130 = vset.pattern.permute.xlu1 %v5164_v1  ;;  %v471_v61 = vpop.permute.xlu1 %470 }
 0x16e   : > { %515 = vperm.xlu1 %3130, %v3743_v60   ;;  %v564_v49 = vmul.f32 %v3803_v28, %v471_v61 }
 0x16f   : > { %v1229_v34 = vmax.bf16 %v5164_v1, %v1213_v32  ;;  %v3180_v32 = vld [vmem:[%s5139_s5 + $0x40] ss:$8 sps:$4 sm:$0xff]  }
 0x170   : > { %v603_v14 = vadd.f32 %v3810_v31, %v564_v49 }
 0x171   : > { %1449 = vmatmul.mubr.bf16.gmra.mxu0 %v1229_v34 }
 0x172   : > { %520 = vperm.xlu1 %3130, %v3697_v45   ;;  %v684_v42 = vpop.permute.xlu1 %683  ;;  %v799_v25 = vadd.f32 %v767_v0, %v603_v14 }
 0x173   : > { %v766_v15 = vmul.f32 %v3800_v26, %v684_v42  ;;  %v964_v42 = vmul.f32 %v3814_v33, %v4002_v6 }
 0x175   : > { %v798_v50 = vadd.f32 %v766_v15, %v602_v11  ;;  %v1161_v15 = vmul.f32 %v3830_v8, %v3791_v22  ;;  %v3186_v22 = vld [vmem:[%s5139_s5 + $0x20] ss:$8 sps:$4 sm:$0xff]  }
 0x176   : > { %3131 = vset.pattern.permute.xlu1 %v5165_v20 }
 0x177   : > { %727 = vperm.xlu1 %3131, %v3697_v45   ;;  %v880_v9 = vpop.permute.xlu1 %879 }
 0x178   : > { %v962_v2 = vmul.f32 %v3814_v33, %v880_v9  ;;  %v3183_v9 = vld [vmem:[%s5139_s5 + $0x30] ss:$8 sps:$4 sm:$0xff]  }
 0x17a   : > { %v994_v39 = vadd.f32 %v962_v2, %v798_v50 }
 0x17b   : > { %3132 = vset.pattern.permute.xlu1 %v5166_v47  ;;  %v884_v35 = vpop.permute.xlu1 %883 }
 0x17c   : > { %v1190_v18 = vadd.f32 %v1158_v53, %v994_v39  ;;  %919 = vperm.xlu1 %3132, %v3743_v60   ;;  %v963_v30 = vmul.f32 %v3814_v33, %v884_v35  ;;  %v3191_v39 = vld [vmem:[%s5139_s5 + $0x14] ss:$8 sps:$4 sm:$0xff]  }
 0x17e   : > { %v995_v57 = vadd.f32 %v963_v30, %v799_v25  ;;  %v3194_v30 = vld [vmem:[%s5139_s5 + $0x4] ss:$8 sps:$4 sm:$0xff]  }
 0x180   : > { %3134 = vset.pattern.permute.xlu1 %v5167_v5  ;;  %v1080_v16 = vpop.permute.xlu1 %1079 }
 0x181   : > { %v1159_v27 = vmul.f32 %v3830_v8, %v1080_v16  ;;  %1115 = vperm.xlu1 %3134, %v3743_v60  }
 0x183   : > { %v1191_v59 = vadd.f32 %v1159_v27, %v995_v57  ;;  %v3195_v57 = vld [vmem:[%s5139_s5 + $0xf0] ss:$8 sps:$4 sm:$0xff]   ;;  %v3200_v27 = vld [vmem:[%s5139_s5 + $0xe4] ss:$8 sps:$4 sm:$0xff]  }
 0x185   : > { %v1214_v36 = vpack.c.bf16 %v1191_v59, %v1190_v18  ;;  %1119 = vperm.xlu1 %3134, %v3697_v45   ;;  %v476_v43 = vpop.permute.xlu1 %475  ;;  %v3174_v45 = vld [vmem:[%s5139_s5 + $0x60] ss:$8 sps:$4 sm:$0xff]   ;;  %v3189_v18 = vld [vmem:[%s5139_s5 + $0x10] ss:$8 sps:$4 sm:$0xff]  }
 0x186   : > { %v565_v52 = vmul.f32 %v3803_v28, %v476_v43  ;;  %v3198_v43 = vld [vmem:[%s5139_s5 + $0xe0] ss:$8 sps:$4 sm:$0xff]  }
 0x187   : > { %v1230_v58 = vmax.bf16 %v5164_v1, %v1214_v36 }
 0x188   : > { %v604_v37 = vadd.f32 %v3810_v31, %v565_v52  ;;  %v3206_v52 = vld [vmem:[%s5139_s5 + $0xc4] ss:$8 sps:$4 sm:$0xff]  }
 0x189   : > { %3135 = vset.pattern.permute.xlu1 %v5164_v1  ;;  %1459 = vmatmul.mubr.bf16.vlgmr.msra.gmra.mxu1 %v1230_v58  ;;  %v700_v58 = vpop.permute.xlu0 %699 }
 0x18a   : > { %530 = vperm.xlu1 %3135, %v3751_v63   ;;  %v692_v60 = vpop.permute.xlu1 %691  ;;  %1468 = vmatprep.mubr.bf16.mxu1 %v5164_v1 }
 0x18b   : > { %1808 = vmatpush1.bf16.msra.mxu1 %v3171_v3  ;;  %v768_v12 = vmul.f32 %v3800_v26, %v692_v60  ;;  %v3203_v3 = vld [vmem:[%s5139_s5 + $0xd4] ss:$8 sps:$4 sm:$0xff]  }
 0x18c   : > { %1809 = vmatprep.subr.bf16.mxu1 %v3176_v38 }
 0x18d   : > { %v800_v11 = vadd.f32 %v768_v12, %v604_v37  ;;  %v3209_v37 = vld [vmem:[%s5139_s5 + $0xb4] ss:$8 sps:$4 sm:$0xff]  }
 0x18e   : > { %3136 = vset.pattern.permute.xlu1 %v5165_v20  ;;  %v696_v56 = vpop.permute.xlu1 %695 }
 0x18f   : > { %731 = vperm.xlu1 %3136, %v3902_v23   ;;  %1810 = vmatpush1.bf16.msra.mxu1 %v3174_v45  ;;  %v769_v29 = vmul.f32 %v3800_v26, %v696_v56  ;;  %v996_v6 = vadd.f32 %v964_v42, %v800_v11  ;;  %v770_v45 = vmul.f32 %v3800_v26, %v700_v58  ;;  %v3212_v42 = vld [vmem:[%s5139_s5 + $0xa4] ss:$8 sps:$4 sm:$0xff]  }
 0x190   : > { %1811 = vmatprep.subr.bf16.mxu1 %v3179_v51  ;;  %v3201_v51 = vld [vmem:[%s5139_s5 + $0xd0] ss:$8 sps:$4 sm:$0xff]  }
 0x191   : > { %v801_v61 = vadd.f32 %v769_v29, %v605_v21 }
 0x193   : > { %3138 = vset.pattern.permute.xlu1 %v5166_v47  ;;  %v892_v44 = vpop.permute.xlu1 %891  ;;  %1812 = vmatpush1.bf16.msra.mxu1 %v3177_v62  ;;  %v967_v62 = vmul.f32 %v3814_v33, %v4013_v10 }
 0x194   : > { %v965_v34 = vmul.f32 %v3814_v33, %v892_v44  ;;  %927 = vperm.xlu1 %3138, %v3902_v23   ;;  %1813 = vmatprep.subr.bf16.mxu1 %v3182_v41 }
 0x196   : > { %v997_v49 = vadd.f32 %v965_v34, %v801_v61  ;;  %v712_v61 = vpop.permute.xlu0 %711 }
 0x197   : > { %1814 = vmatpush1.bf16.msra.mxu1 %v3180_v32 }
 0x198   : > { %v1193_v53 = vadd.f32 %v1161_v15, %v997_v49  ;;  %931 = vperm.xlu1 %3138, %v3751_v63   ;;  %v1084_v23 = vpop.permute.xlu1 %1083  ;;  %1815 = vmatprep.subr.bf16.mxu1 %v3185_v55 }
 0x199   : > { %v1160_v50 = vmul.f32 %v3830_v8, %v1084_v23 }
 0x19b   : > { %v1192_v2 = vadd.f32 %v1160_v50, %v996_v6  ;;  %1816 = vmatpush1.bf16.msra.mxu1 %v3183_v9  ;;  %v4177_v9 = vpop.permute.xlu0 %723  ;;  %v3218_v6 = vld [vmem:[%s5139_s5 + $0x84] ss:$8 sps:$4 sm:$0xff]  }
 0x19c   : > { %3140 = vset.pattern.permute.xlu1 %v5167_v5  ;;  %1817 = vmatprep.subr.bf16.mxu1 %v3188_v54  ;;  %v3213_v54 = vld [vmem:[%s5139_s5 + $0x90] ss:$8 sps:$4 sm:$0xff]  }
 0x19d   : > { %v1215_v14 = vpack.c.bf16 %v1193_v53, %v1192_v2  ;;  %1127 = vperm.xlu1 %3140, %v3751_v63   ;;  %v486_v0 = vpop.permute.xlu1 %485  ;;  %v3192_v63 = vld [vmem:[%s5139_s5] ss:$8 sps:$4 sm:$0xff]   ;;  %v3215_v53 = vld [vmem:[%s5139_s5 + $0x94] ss:$8 sps:$4 sm:$0xff]   ;;  %v569_v2 = vmul.f32 %v3803_v28, %v3907_v13 }
 0x19e   : > { %v567_v59 = vmul.f32 %v3803_v28, %v486_v0 }
 0x19f   : > { %v1231_v35 = vmax.bf16 %v5164_v1, %v1215_v14  ;;  %1818 = vmatpush1.bf16.msra.mxu1 %v3186_v22  ;;  %v4189_v50 = vpop.permute.xlu0 %735  ;;  %v3216_v14 = vld [vmem:[%s5139_s5 + $0x80] ss:$8 sps:$4 sm:$0xff]  }
 0x1a0   : > { %1819 = vmatprep.subr.bf16.mxu1 %v3191_v39  ;;  %v606_v60 = vadd.f32 %v3810_v31, %v567_v59 }
 0x1a1   : > { %3141 = vset.pattern.permute.xlu1 %v5164_v1  ;;  %1469 = vmatmul.mubr.bf16.gmra.mxu1 %v1231_v35  ;;  %v491_v25 = vpop.permute.xlu1 %490  ;;  %v608_v35 = vadd.f32 %v3810_v31, %v569_v2 }
 0x1a2   : > { %535 = vperm.xlu1 %3141, %v3944_v40   ;;  %1478 = vmatprep.mubr.bf16.mxu1 %v5164_v1  ;;  %v568_v36 = vmul.f32 %v3803_v28, %v491_v25 }
 0x1a3   : > { %1820 = vmatpush1.bf16.msra.mxu1 %v3189_v18  ;;  %v773_v18 = vmul.f32 %v3800_v26, %v712_v61 }
 0x1a4   : > { %1821 = vmatprep.subr.bf16.mxu1 %v3194_v30  ;;  %v607_v7 = vadd.f32 %v3810_v31, %v568_v36 }
 0x1a6   : > { %3142 = vset.pattern.permute.xlu1 %v5165_v20  ;;  %v704_v16 = vpop.permute.xlu1 %703 }
 0x1a7   : > { %739 = vperm.xlu1 %3142, %v3944_v40   ;;  %1822 = vmatpush1.bf16.msra.mxu1 %v3192_v63  ;;  %v771_v38 = vmul.f32 %v3800_v26, %v704_v16  ;;  %v1100_v63 = vpop.permute.xlu0 %1099 }
 0x1a8   : > { %1823 = vmatprep.subr.bf16.mxu1 %v3197_v17 }
 0x1a9   : > { %v803_v21 = vadd.f32 %v771_v38, %v607_v7 }
 0x1ab   : > { %743 = vperm.xlu1 %3142, %v3938_v46   ;;  %v896_v20 = vpop.permute.xlu1 %895  ;;  %1824 = vmatpush2.bf16.msra.mxu1 %v3195_v57  ;;  %v999_v44 = vadd.f32 %v967_v62, %v803_v21 }
 0x1ac   : > { %1825 = vmatprep.subr.bf16.mxu1 %v3200_v27  ;;  %v966_v29 = vmul.f32 %v3814_v33, %v896_v20  ;;  %v1164_v27 = vmul.f32 %v3830_v8, %v1100_v63  ;;  %v973_v63 = vmul.f32 %v3814_v33, %v4026_v48 }
 0x1af   : > { %3144 = vset.pattern.permute.xlu1 %v5166_v47  ;;  %1826 = vmatpush2.bf16.msra.mxu1 %v3198_v43  ;;  %v802_v47 = vadd.f32 %v770_v45, %v606_v60 }
 0x1b0   : > { %939 = vperm.xlu1 %3144, %v3938_v46   ;;  %v1092_v56 = vpop.permute.xlu1 %1091  ;;  %1827 = vmatprep.subr.bf16.mxu1 %v3203_v3  ;;  %v3204_v46 = vld [vmem:[%s5139_s5 + $0xc0] ss:$8 sps:$4 sm:$0xff]  }
 0x1b1   : > { %v1162_v41 = vmul.f32 %v3830_v8, %v1092_v56  ;;  %v998_v10 = vadd.f32 %v966_v29, %v802_v47  ;;  %v572_v56 = vmul.f32 %v3803_v28, %v3915_v4 }
 0x1b3   : > { %1828 = vmatpush2.bf16.msra.mxu1 %v3201_v51  ;;  %v1194_v34 = vadd.f32 %v1162_v41, %v998_v10  ;;  %v611_v29 = vadd.f32 %v3810_v31, %v572_v56 }
 0x1b4   : > { %3145 = vset.pattern.permute.xlu1 %v5167_v5  ;;  %v1096_v12 = vpop.permute.xlu1 %1095  ;;  %1829 = vmatprep.subr.bf16.mxu1 %v3206_v52  ;;  %v3207_v5 = vld [vmem:[%s5139_s5 + $0xb0] ss:$8 sps:$4 sm:$0xff]  }
 0x1b5   : > { %v1163_v32 = vmul.f32 %v3830_v8, %v1096_v12  ;;  %1131 = vperm.xlu1 %3145, %v3944_v40   ;;  %v3210_v40 = vld [vmem:[%s5139_s5 + $0xa0] ss:$8 sps:$4 sm:$0xff]   ;;  %v1112_v12 = vpop.permute.xlu0 %1111 }
 0x1b7   : > { %v1195_v55 = vadd.f32 %v1163_v32, %v999_v44  ;;  %1830 = vmatpush2.bf16.msra.mxu1 %v3204_v46  ;;  %v970_v44 = vmul.f32 %v3814_v33, %v4019_v24  ;;  %v1167_v32 = vmul.f32 %v3830_v8, %v1112_v12 }
 0x1b8   : > { %1831 = vmatprep.subr.bf16.mxu1 %v3209_v37 }
 0x1b9   : > { %v1216_v11 = vpack.c.bf16 %v1195_v55, %v1194_v34  ;;  %v501_v15 = vpop.permute.xlu1 %500 }
 0x1ba   : > { %v570_v22 = vmul.f32 %v3803_v28, %v501_v15 }
 0x1bb   : > { %v1232_v49 = vmax.bf16 %v5164_v1, %v1216_v11  ;;  %1832 = vmatpush2.bf16.msra.mxu1 %v3207_v5 }
 0x1bc   : > { %1833 = vmatprep.subr.bf16.mxu1 %v3212_v42  ;;  %v609_v30 = vadd.f32 %v3810_v31, %v570_v22 }
 0x1bd   : > { %1479 = vmatmul.mubr.bf16.gmra.mxu1 %v1232_v49 }
 0x1be   : > { %v708_v23 = vpop.permute.xlu1 %707  ;;  %1488 = vmatprep.mubr.bf16.mxu1 %v5164_v1  ;;  %v805_v59 = vadd.f32 %v773_v18, %v609_v30 }
 0x1bf   : > { %1834 = vmatpush2.bf16.msra.mxu1 %v3210_v40  ;;  %v772_v0 = vmul.f32 %v3800_v26, %v708_v23 }
 0x1c0   : > { %1835 = vmatprep.subr.bf16.mxu1 %v3215_v53  ;;  %v4221_v53 = vpop.f32.mrf.mxu0 }
 0x1c1   : > { %v804_v17 = vadd.f32 %v772_v0, %v608_v35 }
 0x1c2   : > { %v4223_v23 = vpop.f32.mrf.mxu0 }
 0x1c3   : > { %v904_v39 = vpop.permute.xlu1 %903  ;;  %1836 = vmatpush2.bf16.msra.mxu1 %v3213_v54 }
 0x1c4   : > { %1837 = vmatprep.subr.bf16.mxu1 %v3218_v6  ;;  %v968_v25 = vmul.f32 %v3814_v33, %v904_v39  ;;  %v4227_v22 = vpop.f32.mrf.mxu0 }
 0x1c6   : > { %v1000_v57 = vadd.f32 %v968_v25, %v804_v17  ;;  %v4234_v30 = vpop.f32.mrf.mxu0 }
 0x1c7   : > { %v908_v13 = vpop.permute.xlu1 %907  ;;  %1838 = vmatpush2.bf16.msra.mxu1 %v3216_v14  ;;  %v776_v14 = vmul.f32 %v3800_v26, %v4177_v9 }
 0x1c8   : > { %v969_v16 = vmul.f32 %v3814_v33, %v908_v13  ;;  %v1196_v58 = vadd.f32 %v1164_v27, %v1000_v57  ;;  %v4240_v27 = vpop.f32.mrf.mxu0 }
 0x1ca   : > { %v1001_v20 = vadd.f32 %v969_v16, %v805_v59 }
 0x1cc   : > { %v1104_v36 = vpop.permute.xlu1 %1103 }
 0x1cd   : > { %v1165_v43 = vmul.f32 %v3830_v8, %v1104_v36 }
 0x1cf   : > { %v1197_v3 = vadd.f32 %v1165_v43, %v1001_v20  ;;  %v1124_v43 = vpop.permute.xlu0 %1123 }
 0x1d1   : > { %v1217_v38 = vpack.c.bf16 %v1197_v3, %v1196_v58  ;;  %v506_v60 = vpop.permute.xlu1 %505  ;;  %v4243_v58 = vpop.f32.mrf.mxu0 }
 0x1d2   : > { %v571_v52 = vmul.f32 %v3803_v28, %v506_v60 }
 0x1d3   : > { %v1233_v45 = vmax.bf16 %v5164_v1, %v1217_v38  ;;  %v4246_v48 = vpop.f32.mrf.mxu0 }
 0x1d4   : > { %v610_v47 = vadd.f32 %v3810_v31, %v571_v52 }
 0x1d5   : > { %1489 = vmatmul.mubr.bf16.gmra.mxu1 %v1233_v45  ;;  %v526_v45 = vpop.permute.xlu0 %525 }
 0x1d6   : > { %v716_v7 = vpop.permute.xlu1 %715  ;;  %1498 = vmatprep.mubr.bf16.mxu1 %v5164_v1  ;;  %v575_v56 = vmul.f32 %v3803_v28, %v526_v45 }
 0x1d7   : > { %v774_v62 = vmul.f32 %v3800_v26, %v716_v7 }
 0x1d9   : > { %v806_v37 = vadd.f32 %v774_v62, %v610_v47 }
 0x1da   : > { %v720_v51 = vpop.permute.xlu1 %719 }
 0x1db   : > { %v775_v21 = vmul.f32 %v3800_v26, %v720_v51  ;;  %v1002_v34 = vadd.f32 %v970_v44, %v806_v37  ;;  %v4249_v51 = vpop.f32.mrf.mxu0 }
 0x1dd   : > { %v807_v10 = vadd.f32 %v775_v21, %v611_v29  ;;  %v4253_v21 = vpop.f32.mrf.mxu0  ;;  %v3331_v29 = vld [vmem:[%s5136_s2] ss:$0 sm:$0xff] }
 0x1de   : > { %v614_v47 = vadd.f32 %v3331_v29, %v575_v56 }
 0x1df   : > { %v916_v41 = vpop.permute.xlu1 %915  ;;  %v4262_v44 = vpop.f32.mrf.mxu0 }
 0x1e0   : > { %v971_v46 = vmul.f32 %v3814_v33, %v916_v41 }
 0x1e2   : > { %v1003_v4 = vadd.f32 %v971_v46, %v807_v10  ;;  %v779_v10 = vmul.f32 %v3800_v26, %v4189_v50 }
 0x1e4   : > { %v1108_v61 = vpop.permute.xlu1 %1107  ;;  %v1199_v5 = vadd.f32 %v1167_v32, %v1003_v4 }
 0x1e5   : > { %v1166_v55 = vmul.f32 %v3830_v8, %v1108_v61  ;;  %v1170_v61 = vmul.f32 %v3830_v8, %v1124_v43 }
 0x1e7   : > { %v1198_v42 = vadd.f32 %v1166_v55, %v1002_v34 }
 0x1e9   : > { %v1218_v11 = vpack.c.bf16 %v1199_v5, %v1198_v42  ;;  %v516_v15 = vpop.permute.xlu1 %515  ;;  %v4266_v42 = vpop.f32.mrf.mxu0 }
 0x1ea   : > { %v573_v54 = vmul.f32 %v3803_v28, %v516_v15 }
 0x1eb   : > { %v1234_v49 = vmax.bf16 %v5164_v1, %v1218_v11 }
 0x1ec   : > { %v612_v0 = vadd.f32 %v3810_v31, %v573_v54 }
 0x1ed   : > { %1499 = vmatmul.mubr.bf16.gmra.mxu1 %v1234_v49  ;;  %v521_v40 = vpop.permute.xlu1 %520 }
 0x1ee   : > { %1508 = vmatprep.mubr.bf16.mxu1 %v5164_v1  ;;  %v574_v6 = vmul.f32 %v3803_v28, %v521_v40  ;;  %v808_v17 = vadd.f32 %v776_v14, %v612_v0 }
 0x1f0   : > { %v613_v35 = vadd.f32 %v3810_v31, %v574_v6 }
 0x1f2   : > { %v728_v24 = vpop.permute.xlu1 %727 }
 0x1f3   : > { %v777_v39 = vmul.f32 %v3800_v26, %v728_v24  ;;  %v1406_v24 = vpop.f32.mrf.mxu0 }
 0x1f5   : > { %v809_v25 = vadd.f32 %v777_v39, %v613_v35  ;;  %v541_v39 = vpop.permute.xlu0 %540 }
 0x1f7   : > { %v920_v2 = vpop.permute.xlu1 %919  ;;  %v1005_v59 = vadd.f32 %v973_v63, %v809_v25  ;;  %v578_v25 = vmul.f32 %v3803_v28, %v541_v39 }
 0x1f8   : > { %v972_v13 = vmul.f32 %v3814_v33, %v920_v2  ;;  %v4270_v2 = vpop.f32.mrf.mxu0 }
 0x1fa   : > { %v1004_v9 = vadd.f32 %v972_v13, %v808_v17  ;;  %v4273_v0 = vpop.f32.mrf.mxu0  ;;  %v936_v13 = vpop.permute.xlu0 %935 }
 0x1fc   : > { %v1116_v18 = vpop.permute.xlu1 %1115  ;;  %v4277_v63 = vpop.f32.mrf.mxu0 }
 0x1fd   : > { %v1168_v16 = vmul.f32 %v3830_v8, %v1116_v18 }
 0x1fe   : > { %v1416_v43 = vpop.f32.mrf.mxu0 }
 0x1ff   : > { %v1200_v31 = vadd.f32 %v1168_v16, %v1004_v9  ;;  %v617_v9 = vadd.f32 %v3331_v29, %v578_v25 }
 0x200   : > { %v1120_v57 = vpop.permute.xlu1 %1119  ;;  %v4289_v45 = vpop.f32.mrf.mxu0 }
 0x201   : > { %v1169_v36 = vmul.f32 %v3830_v8, %v1120_v57 }
 0x203   : > { %v1201_v20 = vadd.f32 %v1169_v36, %v1005_v59 }
 0x205   : > { %v1219_v3 = vpack.c.bf16 %v1201_v20, %v1200_v31  ;;  %v531_v38 = vpop.permute.xlu1 %530  ;;  %v1136_v31 = vpop.permute.xlu0 %1135  ;;  %v1254_v20 = vld [vmem:[%s5138_s4] sm:$0x3] }
 0x206   : > { %v576_v52 = vmul.f32 %v3803_v28, %v531_v38 }
 0x207   : > { %v1235_v60 = vmax.bf16 %v5164_v1, %v1219_v3 }
 0x208   : > { %v615_v46 = vadd.f32 %v3331_v29, %v576_v52 }
 0x209   : > { %1509 = vmatmul.mubr.bf16.gmra.mxu1 %v1235_v60  ;;  %v4287_v60 = vrot.slane %v1254_v20, %v3787_v19 }
 0x20a   : > { %v732_v7 = vpop.permute.xlu1 %731  ;;  %1518 = vmatprep.mubr.bf16.mxu1 %v5164_v1  ;;  %v811_v55 = vadd.f32 %v779_v10, %v615_v46 }
 0x20b   : > { %v778_v41 = vmul.f32 %v3800_v26, %v732_v7  ;;  %v1173_v7 = vmul.f32 %v3830_v8, %v1136_v31  ;;  %v1387_v56 = vadd.f32 %v4234_v30, %v4287_v60 }
 0x20d   : > { %v810_v4 = vadd.f32 %v778_v41, %v614_v47  ;;  %v1383_v47 = vadd.f32 %v4223_v23, %v4287_v60 }
 0x20f   : > { %v928_v62 = vpop.permute.xlu1 %927 }
 0x210   : > { %v974_v12 = vmul.f32 %v3814_v33, %v928_v62 }
 0x212   : > { %v1006_v34 = vadd.f32 %v974_v12, %v810_v4  ;;  %v1540_v12 = vpack.c.bf16 %v1387_v56, %v1383_v47 }
 0x213   : > { %v932_v37 = vpop.permute.xlu1 %931 }
 0x214   : > { %v975_v32 = vmul.f32 %v3814_v33, %v932_v37  ;;  %v1202_v49 = vadd.f32 %v1170_v61, %v1006_v34  ;;  %v5168_v37 = vld [vmem:[#allocation8_spill] sm:$0xff]  ;;  %v1572_v34 = vmax.bf16 %v5164_v1, %v1540_v12  ;;  %v3233_v12 = vld [vmem:[%s5141_s7 + $0x34] ss:$8 sps:$4 sm:$0xff]  }
 0x215   : > { %v4298_v10 = vrot.slane %v1254_v20, %v5168_v37  ;;  %v3224_v20 = vld [vmem:[%s5141_s7 + $0x64] ss:$8 sps:$4 sm:$0xff]  }
 0x216   : > { %v1007_v11 = vadd.f32 %v975_v32, %v811_v55  ;;  %v1393_v55 = vadd.f32 %v4243_v58, %v4287_v60  ;;  %v1403_v58 = vadd.f32 %v4262_v44, %v4287_v60  ;;  %v1413_v44 = vadd.f32 %v4273_v0, %v4287_v60 }
 0x217   : > { %v1385_v32 = vadd.f32 %v4227_v22, %v4298_v10  ;;  %v1381_v23 = vadd.f32 %v4221_v53, %v4298_v10  ;;  %v1391_v53 = vadd.f32 %v4240_v27, %v4298_v10  ;;  %v1401_v27 = vadd.f32 %v4253_v21, %v4298_v10 }
 0x218   : > { %v1128_v5 = vpop.permute.xlu1 %1127  ;;  %v1415_v21 = vadd.f32 %v4277_v63, %v4298_v10  ;;  %v1411_v31 = vadd.f32 %v4270_v2, %v4298_v10  ;;  %v3222_v63 = vld [vmem:[%s5141_s7 + $0x60] ss:$8 sps:$4 sm:$0xff]   ;;  %v3227_v2 = vld [vmem:[%s5141_s7 + $0x54] ss:$8 sps:$4 sm:$0xff]  }
 0x219   : > { %v1171_v15 = vmul.f32 %v3830_v8, %v1128_v5  ;;  %v1539_v5 = vpack.c.bf16 %v1385_v32, %v1381_v23 }
 0x21b   : > { %v1203_v40 = vadd.f32 %v1171_v15, %v1007_v11 }
 0x21d   : > { %v1220_v54 = vpack.c.bf16 %v1203_v40, %v1202_v49  ;;  %v536_v50 = vpop.permute.xlu1 %535  ;;  %v1571_v49 = vmax.bf16 %v5164_v1, %v1539_v5  ;;  %v1407_v40 = vadd.f32 %v1406_v24, %v4287_v60  ;;  %v1417_v24 = vadd.f32 %v1416_v43, %v4287_v60 }
 0x21e   : > { %v577_v18 = vmul.f32 %v3803_v28, %v536_v50  ;;  %v976_v28 = vmul.f32 %v3814_v33, %v936_v13 }
 0x21f   : > { %v1236_v6 = vmax.bf16 %v5164_v1, %v1220_v54  ;;  %v1544_v39 = vpack.c.bf16 %v1407_v40, %v1403_v58 }
 0x220   : > { %v616_v57 = vadd.f32 %v3331_v29, %v577_v18 }
 0x221   : > { %1519 = vmatmul.mubr.bf16.gmra.mxu1 %v1236_v6  ;;  %v1576_v18 = vmax.bf16 %v5164_v1, %v1544_v39  ;;  %v3237_v39 = vld [vmem:[%s5141_s7 + $0x10] ss:$8 sps:$4 sm:$0xff]  }
 0x222   : > { %v740_v14 = vpop.permute.xlu1 %739  ;;  %1528 = vmatprep.mubr.bf16.mxu1 %v5164_v1 }
 0x223   : > { %v780_v17 = vmul.f32 %v3800_v26, %v740_v14 }
 0x225   : > { %v812_v3 = vadd.f32 %v780_v17, %v616_v57  ;;  %v3219_v57 = vld [vmem:[%s5141_s7 + $0x70] ss:$8 sps:$4 sm:$0xff]  }
 0x226   : > { %v744_v35 = vpop.permute.xlu1 %743 }
 0x227   : > { %v781_v16 = vmul.f32 %v3800_v26, %v744_v35  ;;  %v1008_v62 = vadd.f32 %v976_v28, %v812_v3  ;;  %v1405_v35 = vadd.f32 %v4266_v42, %v4298_v10  ;;  %v3221_v42 = vld [vmem:[%s5141_s7 + $0x74] ss:$8 sps:$4 sm:$0xff]   ;;  %v1545_v3 = vpack.c.bf16 %v1415_v21, %v1411_v31 }
 0x228   : > { %2268 = vmatprep.subr.bf16.mxu0 %v3221_v42 }
 0x229   : > { %v813_v38 = vadd.f32 %v781_v16, %v617_v9  ;;  %v1543_v13 = vpack.c.bf16 %v1405_v35, %v1401_v27  ;;  %v1546_v16 = vpack.c.bf16 %v1417_v24, %v1413_v44  ;;  %2269 = vmatpush1.bf16.msra.mxu0 %v3219_v57  ;;  %v3242_v44 = vld [vmem:[%s5141_s7 + $0x4] ss:$8 sps:$4 sm:$0xff]  }
 0x22a   : > { %2270 = vmatprep.subr.bf16.mxu0 %v3224_v20 }
 0x22b   : > { %v940_v59 = vpop.permute.xlu1 %939 }
 0x22c   : > { %v977_v36 = vmul.f32 %v3814_v33, %v940_v59  ;;  %v1422_v33 = vpop.f32.mrf.mxu0  ;;  %v1575_v59 = vmax.bf16 %v5164_v1, %v1543_v13 }
 0x22d   : > { %v1423_v43 = vadd.f32 %v1422_v33, %v4287_v60  ;;  %2271 = vmatpush1.bf16.msra.mxu0 %v3222_v63  ;;  %v3228_v33 = vld [vmem:[%s5141_s7 + $0x40] ss:$8 sps:$4 sm:$0xff]  }
 0x22e   : > { %v1009_v26 = vadd.f32 %v977_v36, %v813_v38  ;;  %v1424_v61 = vpop.f32.mrf.mxu0  ;;  %v1578_v36 = vmax.bf16 %v5164_v1, %v1546_v16  ;;  %2272 = vmatprep.subr.bf16.mxu0 %v3227_v2  ;;  %v3240_v16 = vld [vmem:[%s5141_s7] ss:$8 sps:$4 sm:$0xff]  }
 0x230   : > { %v1132_v52 = vpop.permute.xlu1 %1131  ;;  %v1205_v41 = vadd.f32 %v1173_v7, %v1009_v26  ;;  %v1426_v11 = vpop.f32.mrf.mxu0  ;;  %v3225_v26 = vld [vmem:[%s5141_s7 + $0x50] ss:$8 sps:$4 sm:$0xff]   ;;  %v1425_v7 = vadd.f32 %v1424_v61, %v4298_v10 }
 0x231   : > { %v1172_v29 = vmul.f32 %v3830_v8, %v1132_v52  ;;  %v1397_v8 = vadd.f32 %v4249_v51, %v4287_v60  ;;  %v1395_v51 = vadd.f32 %v4246_v48, %v4298_v10  ;;  %v1427_v0 = vadd.f32 %v1426_v11, %v4287_v60  ;;  %2273 = vmatpush1.bf16.msra.mxu0 %v3225_v26 }
 0x232   : > { %v4310_v22 = vpop.f32.mrf.mxu0  ;;  %v1577_v52 = vmax.bf16 %v5164_v1, %v1545_v3 }
 0x233   : > { %v1204_v46 = vadd.f32 %v1172_v29, %v1008_v62  ;;  %v1542_v15 = vpack.c.bf16 %v1397_v8, %v1393_v55  ;;  %v1541_v6 = vpack.c.bf16 %v1395_v51, %v1391_v53  ;;  %v1548_v38 = vpack.c.bf16 %v1427_v0, %v1423_v43  ;;  %v3230_v62 = vld [vmem:[%s5141_s7 + $0x44] ss:$8 sps:$4 sm:$0xff]   ;;  %v3246_v43 = vld [vmem:[%s5141_s7 + $0xe0] ss:$8 sps:$4 sm:$0xff]  }
 0x234   : > { %v1432_v50 = vpop.f32.mrf.mxu0  ;;  %2274 = vmatprep.subr.bf16.mxu0 %v3230_v62  ;;  %v3236_v51 = vld [vmem:[%s5141_s7 + $0x24] ss:$8 sps:$4 sm:$0xff]  }
 0x235   : > { %v1221_v4 = vpack.c.bf16 %v1205_v41, %v1204_v46  ;;  %v1574_v54 = vmax.bf16 %v5164_v1, %v1542_v15  ;;  %v1573_v48 = vmax.bf16 %v5164_v1, %v1541_v6  ;;  %v1580_v47 = vmax.bf16 %v5164_v1, %v1548_v38  ;;  %2275 = vmatpush1.bf16.msra.mxu0 %v3228_v33 }
 0x236   : > { %v1434_v14 = vpop.f32.mrf.mxu0  ;;  %v1421_v41 = vadd.f32 %v4289_v45, %v4298_v10  ;;  %v3231_v45 = vld [vmem:[%s5141_s7 + $0x30] ss:$8 sps:$4 sm:$0xff]   ;;  %2276 = vmatprep.subr.bf16.mxu0 %v3233_v12  ;;  %v1431_v15 = vadd.f32 %v4310_v22, %v4298_v10  ;;  %v3239_v22 = vld [vmem:[%s5141_s7 + $0x14] ss:$8 sps:$4 sm:$0xff]   ;;  %v3252_v12 = vld [vmem:[%s5141_s7 + $0xc0] ss:$8 sps:$4 sm:$0xff]  }
 0x237   : > { %v1237_v30 = vmax.bf16 %v5164_v1, %v1221_v4  ;;  %v1433_v4 = vadd.f32 %v1432_v50, %v4287_v60 }
 0x238   : > { %v1436_v25 = vpop.f32.mrf.mxu0  ;;  %v1547_v32 = vpack.c.bf16 %v1425_v7, %v1421_v41  ;;  %v3249_v7 = vld [vmem:[%s5141_s7 + $0xd0] ss:$8 sps:$4 sm:$0xff]   ;;  %v3254_v41 = vld [vmem:[%s5141_s7 + $0xc4] ss:$8 sps:$4 sm:$0xff]  }
 0x239   : > { %1529 = vmatmul.mubr.bf16.gmra.mxu1 %v1237_v30  ;;  %v1437_v29 = vadd.f32 %v1436_v25, %v4287_v60  ;;  %2277 = vmatpush1.bf16.msra.mxu0 %v3231_v45  ;;  %v3255_v45 = vld [vmem:[%s5141_s7 + $0xb0] ss:$8 sps:$4 sm:$0xff]  }
 0x23a   : > { %1839 = vmatprep.mubr.bf16.mxu1 %v1572_v34  ;;  %v4330_v17 = vpop.f32.mrf.mxu0  ;;  %v1435_v34 = vadd.f32 %v1434_v14, %v4298_v10  ;;  %v1579_v55 = vmax.bf16 %v5164_v1, %v1547_v32  ;;  %2278 = vmatprep.subr.bf16.mxu0 %v3236_v51 }
 0x23b   : > { %v1550_v30 = vpack.c.bf16 %v1437_v29, %v1433_v4  ;;  %v1441_v27 = vadd.f32 %v4330_v17, %v4298_v10  ;;  %v3245_v17 = vld [vmem:[%s5141_s7 + $0xf4] ss:$8 sps:$4 sm:$0xff]  }
 0x23c   : > { %v1442_v9 = vpop.f32.mrf.mxu0  ;;  %v1549_v53 = vpack.c.bf16 %v1435_v34, %v1431_v15  ;;  %v3260_v15 = vld [vmem:[%s5141_s7 + $0xa4] ss:$8 sps:$4 sm:$0xff]  }
 0x23d   : > { %v1582_v11 = vmax.bf16 %v5164_v1, %v1550_v30  ;;  %v1443_v40 = vadd.f32 %v1442_v9, %v4287_v60  ;;  %v3243_v9 = vld [vmem:[%s5141_s7 + $0xf0] ss:$8 sps:$4 sm:$0xff]  }
 0x23e   : > { %v1444_v28 = vpop.f32.mrf.mxu0 }
 0x23f   : > { %v1445_v14 = vadd.f32 %v1444_v28, %v4298_v10  ;;  %v3251_v28 = vld [vmem:[%s5141_s7 + $0xd4] ss:$8 sps:$4 sm:$0xff]  }
 0x240   : > { %v1446_v56 = vpop.f32.mrf.mxu0 }
 0x241   : > { %1840 = vmatmul.mubr.bf16.vlgmr.msra.gmra.mxu1 %v1571_v49  ;;  %v1447_v5 = vadd.f32 %v1446_v56, %v4287_v60  ;;  %v1551_v42 = vpack.c.bf16 %v1445_v14, %v1441_v27 }
 0x242   : > { %1849 = vmatprep.mubr.bf16.mxu1 %v1574_v54  ;;  %v4370_v46 = vpop.f32.mrf.mxu0  ;;  %v3234_v54 = vld [vmem:[%s5141_s7 + $0x20] ss:$8 sps:$4 sm:$0xff]  }
 0x243   : > { %v1552_v58 = vpack.c.bf16 %v1447_v5, %v1443_v40  ;;  %2279 = vmatpush1.bf16.msra.mxu0 %v3234_v54  ;;  %v1583_v0 = vmax.bf16 %v5164_v1, %v1551_v42  ;;  %v1451_v63 = vadd.f32 %v4370_v46, %v4298_v10 }
 0x244   : > { %v1452_v8 = vpop.f32.mrf.mxu0  ;;  %2280 = vmatprep.subr.bf16.mxu0 %v3239_v22 }
 0x245   : > { %v1453_v13 = vadd.f32 %v1452_v8, %v4287_v60 }
 0x246   : > { %v1454_v49 = vpop.f32.mrf.mxu0 }
 0x247   : > { %2281 = vmatpush1.bf16.msra.mxu0 %v3237_v39 }
 0x248   : > { %v1456_v6 = vpop.f32.mrf.mxu0  ;;  %2282 = vmatprep.subr.bf16.mxu0 %v3242_v44 }
 0x249   : > { %1850 = vmatmul.mubr.bf16.gmra.mxu1 %v1573_v48  ;;  %v4376_v61 = vpop.f32.mrf.mxu1  ;;  %v1581_v48 = vmax.bf16 %v5164_v1, %v1549_v53  ;;  %v1457_v24 = vadd.f32 %v1456_v6, %v4287_v60  ;;  %v3261_v6 = vld [vmem:[%s5141_s7 + $0x90] ss:$8 sps:$4 sm:$0xff]  }
 0x24a   : > { %1859 = vmatprep.mubr.bf16.mxu1 %v1576_v18  ;;  %v1584_v18 = vmax.bf16 %v5164_v1, %v1552_v58  ;;  %v1461_v33 = vadd.f32 %v4376_v61, %v4298_v10  ;;  %v3257_v61 = vld [vmem:[%s5141_s7 + $0xb4] ss:$8 sps:$4 sm:$0xff]  }
 0x24b   : > { %v1462_v23 = vpop.f32.mrf.mxu1  ;;  %v1554_v57 = vpack.c.bf16 %v1457_v24, %v1453_v13  ;;  %2283 = vmatpush1.bf16.msra.mxu0 %v3240_v16  ;;  %v3264_v24 = vld [vmem:[%s5141_s7 + $0x80] ss:$8 sps:$4 sm:$0xff]  }
 0x24c   : > { %2284 = vmatprep.subr.bf16.mxu0 %v3245_v17  ;;  %v1463_v38 = vadd.f32 %v1462_v23, %v4287_v60 }
 0x24d   : > { %v1464_v50 = vpop.f32.mrf.mxu1  ;;  %v1586_v20 = vmax.bf16 %v5164_v1, %v1554_v57 }
 0x24f   : > { %v1466_v35 = vpop.f32.mrf.mxu1  ;;  %2285 = vmatpush2.bf16.msra.mxu0 %v3243_v9 }
 0x250   : > { %v1467_v31 = vadd.f32 %v1466_v35, %v4287_v60 }
 0x251   : > { %1860 = vmatmul.mubr.bf16.gmra.mxu1 %v1575_v59  ;;  %v1455_v59 = vadd.f32 %v1454_v49, %v4298_v10  ;;  %v3258_v49 = vld [vmem:[%s5141_s7 + $0xa0] ss:$8 sps:$4 sm:$0xff]  }
 0x252   : > { %1869 = vmatprep.mubr.bf16.mxu1 %v1578_v36  ;;  %v3248_v36 = vld [vmem:[%s5141_s7 + $0xe4] ss:$8 sps:$4 sm:$0xff]   ;;  %v1556_v26 = vpack.c.bf16 %v1467_v31, %v1463_v38 }
 0x253   : > { %2286 = vmatprep.subr.bf16.mxu0 %v3248_v36  ;;  %v1553_v2 = vpack.c.bf16 %v1455_v59, %v1451_v63 }
 0x254   : > { %2287 = vmatpush2.bf16.msra.mxu0 %v3246_v43 }
 0x255   : > { %2288 = vmatprep.subr.bf16.mxu0 %v3251_v28  ;;  %v1585_v62 = vmax.bf16 %v5164_v1, %v1553_v2 }
 0x258   : > { %2289 = vmatpush2.bf16.msra.mxu0 %v3249_v7 }
 0x259   : > { %1870 = vmatmul.mubr.bf16.gmra.mxu1 %v1577_v52  ;;  %v1465_v52 = vadd.f32 %v1464_v50, %v4298_v10  ;;  %2290 = vmatprep.subr.bf16.mxu0 %v3254_v41  ;;  %v3263_v50 = vld [vmem:[%s5141_s7 + $0x94] ss:$8 sps:$4 sm:$0xff]  }
 0x25a   : > { %1879 = vmatprep.mubr.bf16.mxu1 %v1580_v47  ;;  %v1588_v47 = vmax.bf16 %v5164_v1, %v1556_v26 }
 0x25b   : > { %v1555_v4 = vpack.c.bf16 %v1465_v52, %v1461_v33 }
 0x25c   : > { %2291 = vmatpush2.bf16.msra.mxu0 %v3252_v12 }
 0x25d   : > { %v1587_v23 = vmax.bf16 %v5164_v1, %v1555_v4  ;;  %2292 = vmatprep.subr.bf16.mxu0 %v3257_v61 }
 0x260   : > { %2293 = vmatpush2.bf16.msra.mxu0 %v3255_v45 }
 0x261   : > { %1880 = vmatmul.mubr.bf16.gmra.mxu1 %v1579_v55  ;;  %v1470_v25 = vpop.f32.mrf.mxu1  ;;  %2294 = vmatprep.subr.bf16.mxu0 %v3260_v15 }
 0x262   : > { %1889 = vmatprep.mubr.bf16.mxu1 %v1582_v11  ;;  %v1471_v5 = vadd.f32 %v1470_v25, %v4298_v10 }
 0x263   : > { %v1472_v21 = vpop.f32.mrf.mxu1 }
 0x264   : > { %v1473_v46 = vadd.f32 %v1472_v21, %v4287_v60  ;;  %2295 = vmatpush2.bf16.msra.mxu0 %v3258_v49 }
 0x265   : > { %v1474_v3 = vpop.f32.mrf.mxu1  ;;  %2296 = vmatprep.subr.bf16.mxu0 %v3263_v50 }
 0x266   : > { %v1475_v8 = vadd.f32 %v1474_v3, %v4298_v10 }
 0x267   : > { %v1476_v56 = vpop.f32.mrf.mxu1 }
 0x268   : > { %v1477_v29 = vadd.f32 %v1476_v56, %v4287_v60  ;;  %v1557_v51 = vpack.c.bf16 %v1475_v8, %v1471_v5  ;;  %2297 = vmatpush2.bf16.msra.mxu0 %v3261_v6 }
 0x269   : > { %1890 = vmatmul.mubr.bf16.gmra.mxu1 %v1581_v48  ;;  %v3266_v48 = vld [vmem:[%s5141_s7 + $0x84] ss:$8 sps:$4 sm:$0xff]  }
 0x26a   : > { %1899 = vmatprep.mubr.bf16.mxu1 %v1584_v18  ;;  %v1558_v32 = vpack.c.bf16 %v1477_v29, %v1473_v46  ;;  %v1589_v39 = vmax.bf16 %v5164_v1, %v1557_v51  ;;  %2298 = vmatprep.subr.bf16.mxu0 %v3266_v48 }
 0x26c   : > { %v1590_v55 = vmax.bf16 %v5164_v1, %v1558_v32  ;;  %2299 = vmatpush2.bf16.msra.mxu0 %v3264_v24  ;;  %v1635_v24 = vld [vmem:[%s5140_s6] sm:$0x3] }
 0x271   : > { %1900 = vmatmul.mubr.bf16.gmra.mxu1 %v1583_v0 }
 0x272   : > { %1909 = vmatprep.mubr.bf16.mxu1 %v1586_v20 }
 0x279   : > { %1910 = vmatmul.mubr.bf16.gmra.mxu1 %v1585_v62 }
 0x27a   : > { %1919 = vmatprep.mubr.bf16.mxu1 %v1588_v47 }
 0x27d   : > { %v1480_v30 = vpop.f32.mrf.mxu1 }
 0x27e   : > { %v1481_v35 = vadd.f32 %v1480_v30, %v4298_v10 }
 0x27f   : > { %v1482_v34 = vpop.f32.mrf.mxu1 }
 0x280   : > { %v1483_v54 = vadd.f32 %v1482_v34, %v4287_v60 }
 0x281   : > { %v1484_v11 = vpop.f32.mrf.mxu1  ;;  %1920 = vmatmul.mubr.bf16.gmra.mxu1 %v1587_v23 }
 0x282   : > { %1929 = vmatprep.mubr.bf16.mxu1 %v1590_v55  ;;  %v1485_v22 = vadd.f32 %v1484_v11, %v4298_v10 }
 0x283   : > { %v1486_v40 = vpop.f32.mrf.mxu1 }
 0x284   : > { %v1487_v53 = vadd.f32 %v1486_v40, %v4287_v60  ;;  %v1559_v18 = vpack.c.bf16 %v1485_v22, %v1481_v35 }
 0x286   : > { %v1560_v58 = vpack.c.bf16 %v1487_v53, %v1483_v54  ;;  %v1591_v27 = vmax.bf16 %v5164_v1, %v1559_v18 }
 0x288   : > { %v1592_v14 = vmax.bf16 %v5164_v1, %v1560_v58 }
 0x289   : > { %1930 = vmatmul.mubr.bf16.gmra.mxu1 %v1589_v39 }
 0x28a   : > { %1939 = vmatprep.mubr.bf16.mxu1 %v1592_v14 }
 0x291   : > { %1940 = vmatmul.mubr.bf16.gmra.mxu1 %v1591_v27 }
 0x295   : > { %v1490_v25 = vpop.f32.mrf.mxu1 }
 0x296   : > { %v1491_v42 = vadd.f32 %v1490_v25, %v4298_v10 }
 0x297   : > { %v1492_v44 = vpop.f32.mrf.mxu1 }
 0x298   : > { %v1493_v21 = vadd.f32 %v1492_v44, %v4287_v60  ;;  %v4518_v44 = vrot.slane %v1635_v24, %v5168_v37 }
 0x299   : > { %v1494_v13 = vpop.f32.mrf.mxu1 }
 0x29a   : > { %v1495_v16 = vadd.f32 %v1494_v13, %v4298_v10 }
 0x29b   : > { %v1496_v57 = vpop.f32.mrf.mxu1 }
 0x29c   : > { %v1497_v17 = vadd.f32 %v1496_v57, %v4287_v60  ;;  %v1561_v9 = vpack.c.bf16 %v1495_v16, %v1491_v42  ;;  %v4521_v16 = vrot.slane %v1635_v24, %v3787_v19 }
 0x29e   : > { %v1562_v59 = vpack.c.bf16 %v1497_v17, %v1493_v21  ;;  %v1593_v36 = vmax.bf16 %v5164_v1, %v1561_v9 }
 0x2a0   : > { %v1594_v0 = vmax.bf16 %v5164_v1, %v1562_v59 }
 0x2a2   : > { %1949 = vmatprep.mubr.bf16.mxu1 %v1594_v0 }
 0x2a3   : > { %1950 = vmatmul.mubr.bf16.gmra.mxu1 %v1593_v36 }
 0x2ad   : > { %v1500_v31 = vpop.f32.mrf.mxu1 }
 0x2ae   : > { %v1501_v3 = vadd.f32 %v1500_v31, %v4298_v10 }
 0x2af   : > { %v1502_v20 = vpop.f32.mrf.mxu1 }
 0x2b0   : > { %v1503_v38 = vadd.f32 %v1502_v20, %v4287_v60 }
 0x2b1   : > { %v1504_v43 = vpop.f32.mrf.mxu1 }
 0x2b2   : > { %v1505_v63 = vadd.f32 %v1504_v43, %v4298_v10 }
 0x2b3   : > { %v1506_v28 = vpop.f32.mrf.mxu1 }
 0x2b4   : > { %v1507_v2 = vadd.f32 %v1506_v28, %v4287_v60  ;;  %v1563_v26 = vpack.c.bf16 %v1505_v63, %v1501_v3 }
 0x2b6   : > { %v1564_v7 = vpack.c.bf16 %v1507_v2, %v1503_v38  ;;  %v1595_v52 = vmax.bf16 %v5164_v1, %v1563_v26 }
 0x2b8   : > { %v1596_v56 = vmax.bf16 %v5164_v1, %v1564_v7 }
 0x2ba   : > { %1959 = vmatprep.mubr.bf16.mxu1 %v1596_v56 }
 0x2bb   : > { %1960 = vmatmul.mubr.bf16.gmra.mxu1 %v1595_v52 }
 0x2c9   : > { %v1510_v62 = vpop.f32.mrf.mxu1 }
 0x2ca   : > { %v1511_v41 = vadd.f32 %v1510_v62, %v4298_v10 }
 0x2cb   : > { %v1512_v29 = vpop.f32.mrf.mxu1 }
 0x2cc   : > { %v1513_v12 = vadd.f32 %v1512_v29, %v4287_v60 }
 0x2cd   : > { %v1514_v47 = vpop.f32.mrf.mxu1 }
 0x2ce   : > { %v1515_v33 = vadd.f32 %v1514_v47, %v4298_v10 }
 0x2cf   : > { %v1516_v46 = vpop.f32.mrf.mxu1 }
 0x2d0   : > { %v1517_v4 = vadd.f32 %v1516_v46, %v4287_v60  ;;  %v1565_v32 = vpack.c.bf16 %v1515_v33, %v1511_v41 }
 0x2d2   : > { %v1566_v30 = vpack.c.bf16 %v1517_v4, %v1513_v12  ;;  %v1597_v45 = vmax.bf16 %v5164_v1, %v1565_v32 }
 0x2d4   : > { %v1598_v61 = vmax.bf16 %v5164_v1, %v1566_v30 }
 0x2d6   : > { %1969 = vmatprep.mubr.bf16.mxu1 %v1598_v61 }
 0x2d7   : > { %1970 = vmatmul.mubr.bf16.gmra.mxu1 %v1597_v45 }
 0x2e1   : > { %v1520_v8 = vpop.f32.mrf.mxu1 }
 0x2e2   : > { %v1521_v5 = vadd.f32 %v1520_v8, %v4298_v10 }
 0x2e3   : > { %v1522_v34 = vpop.f32.mrf.mxu1 }
 0x2e4   : > { %v1523_v15 = vadd.f32 %v1522_v34, %v4287_v60 }
 0x2e5   : > { %v1524_v23 = vpop.f32.mrf.mxu1 }
 0x2e6   : > { %v1525_v55 = vadd.f32 %v1524_v23, %v4298_v10 }
 0x2e7   : > { %v1526_v11 = vpop.f32.mrf.mxu1 }
 0x2e8   : > { %v1527_v49 = vadd.f32 %v1526_v11, %v4287_v60  ;;  %v1567_v51 = vpack.c.bf16 %v1525_v55, %v1521_v5 }
 0x2ea   : > { %v1568_v40 = vpack.c.bf16 %v1527_v49, %v1523_v15  ;;  %v1599_v53 = vmax.bf16 %v5164_v1, %v1567_v51 }
 0x2ec   : > { %v1600_v54 = vmax.bf16 %v5164_v1, %v1568_v40 }
 0x2ee   : > { %1979 = vmatprep.mubr.bf16.mxu1 %v1600_v54 }
 0x2ef   : > { %1980 = vmatmul.mubr.bf16.gmra.mxu1 %v1599_v53 }
 0x2f9   : > { %v1530_v50 = vpop.f32.mrf.mxu1 }
 0x2fa   : > { %v1531_v39 = vadd.f32 %v1530_v50, %v4298_v10 }
 0x2fb   : > { %v1532_v58 = vpop.f32.mrf.mxu1 }
 0x2fc   : > { %v1533_v35 = vadd.f32 %v1532_v58, %v4287_v60 }
 0x2fd   : > { %v1534_v6 = vpop.f32.mrf.mxu1 }
 0x2fe   : > { %v1535_v22 = vadd.f32 %v1534_v6, %v4298_v10 }
 0x2ff   : > { %v1536_v14 = vpop.f32.mrf.mxu1 }
 0x300   : > { %v1537_v48 = vadd.f32 %v1536_v14, %v4287_v60  ;;  %v1569_v18 = vpack.c.bf16 %v1535_v22, %v1531_v39 }
 0x301   : > { %v1841_v27 = vpop.f32.mrf.mxu1 }
 0x302   : > { %v1570_v25 = vpack.c.bf16 %v1537_v48, %v1533_v35  ;;  %v1601_v57 = vmax.bf16 %v5164_v1, %v1569_v18  ;;  %v1842_v21 = vadd.f32 %v1841_v27, %v4518_v44 }
 0x303   : > { %v1843_v13 = vpop.f32.mrf.mxu1 }
 0x304   : > { %v1602_v10 = vmax.bf16 %v5164_v1, %v1570_v25  ;;  %v1844_v9 = vadd.f32 %v1843_v13, %v4521_v16 }
 0x305   : > { %v1845_v42 = vpop.f32.mrf.mxu1 }
 0x306   : > { %v1846_v60 = vadd.f32 %v1845_v42, %v4518_v44  ;;  %1989 = vmatprep.mubr.bf16.mxu1 %v1602_v10 }
 0x307   : > { %v1847_v17 = vpop.f32.mrf.mxu1  ;;  %1990 = vmatmul.mubr.bf16.gmra.mxu1 %v1601_v57 }
 0x308   : > { %v1848_v59 = vadd.f32 %v1847_v17, %v4521_v16  ;;  %v2000_v0 = vpack.c.bf16 %v1846_v60, %v1842_v21 }
 0x309   : > { %v1851_v36 = vpop.f32.mrf.mxu1 }
 0x30a   : > { %v2001_v31 = vpack.c.bf16 %v1848_v59, %v1844_v9  ;;  %v2032_v63 = vmax.bf16 %v5164_v1, %v2000_v0  ;;  %v1852_v38 = vadd.f32 %v1851_v36, %v4518_v44 }
 0x30b   : > { %v1853_v20 = vpop.f32.mrf.mxu1 }
 0x30c   : > { %v2033_v43 = vmax.bf16 %v5164_v1, %v2001_v31  ;;  %v1854_v26 = vadd.f32 %v1853_v20, %v4521_v16 }
 0x30d   : > { %v1855_v3 = vpop.f32.mrf.mxu1 }
 0x30e   : > { %v1856_v28 = vadd.f32 %v1855_v3, %v4518_v44  ;;  %2300 = vmatprep.mubr.bf16.mxu0 %v2033_v43 }
 0x30f   : > { %v1857_v2 = vpop.f32.mrf.mxu1  ;;  %2301 = vmatmul.mubr.bf16.vlgmr.msra.gmra.mxu0 %v2032_v63 }
 0x310   : > { %v1858_v7 = vadd.f32 %v1857_v2, %v4521_v16  ;;  %v2002_v56 = vpack.c.bf16 %v1856_v28, %v1852_v38 }
 0x311   : > { %v1861_v52 = vpop.f32.mrf.mxu1 }
 0x312   : > { %v2003_v62 = vpack.c.bf16 %v1858_v7, %v1854_v26  ;;  %v2034_v41 = vmax.bf16 %v5164_v1, %v2002_v56  ;;  %v1862_v12 = vadd.f32 %v1861_v52, %v4518_v44 }
 0x313   : > { %v1863_v29 = vpop.f32.mrf.mxu1 }
 0x314   : > { %v2035_v47 = vmax.bf16 %v5164_v1, %v2003_v62  ;;  %v1864_v32 = vadd.f32 %v1863_v29, %v4521_v16 }
 0x315   : > { %v1865_v33 = vpop.f32.mrf.mxu1 }
 0x316   : > { %v1866_v46 = vadd.f32 %v1865_v33, %v4518_v44  ;;  %2310 = vmatprep.mubr.bf16.mxu0 %v2035_v47 }
 0x317   : > { %v1867_v4 = vpop.f32.mrf.mxu1  ;;  %2311 = vmatmul.mubr.bf16.gmra.mxu0 %v2034_v41 }
 0x318   : > { %v1868_v30 = vadd.f32 %v1867_v4, %v4521_v16  ;;  %v2004_v61 = vpack.c.bf16 %v1866_v46, %v1862_v12 }
 0x319   : > { %v1871_v45 = vpop.f32.mrf.mxu1 }
 0x31a   : > { %v2005_v8 = vpack.c.bf16 %v1868_v30, %v1864_v32  ;;  %v2036_v5 = vmax.bf16 %v5164_v1, %v2004_v61  ;;  %v1872_v15 = vadd.f32 %v1871_v45, %v4518_v44 }
 0x31b   : > { %v1873_v34 = vpop.f32.mrf.mxu1 }
 0x31c   : > { %v2037_v23 = vmax.bf16 %v5164_v1, %v2005_v8  ;;  %v1874_v51 = vadd.f32 %v1873_v34, %v4521_v16 }
 0x31d   : > { %v1875_v55 = vpop.f32.mrf.mxu1 }
 0x31e   : > { %v1876_v11 = vadd.f32 %v1875_v55, %v4518_v44  ;;  %2320 = vmatprep.mubr.bf16.mxu0 %v2037_v23 }
 0x31f   : > { %v1877_v49 = vpop.f32.mrf.mxu1  ;;  %2321 = vmatmul.mubr.bf16.gmra.mxu0 %v2036_v5 }
 0x320   : > { %v1878_v40 = vadd.f32 %v1877_v49, %v4521_v16  ;;  %v2006_v54 = vpack.c.bf16 %v1876_v11, %v1872_v15 }
 0x321   : > { %v1881_v53 = vpop.f32.mrf.mxu1 }
 0x322   : > { %v2007_v50 = vpack.c.bf16 %v1878_v40, %v1874_v51  ;;  %v2038_v39 = vmax.bf16 %v5164_v1, %v2006_v54  ;;  %v1882_v35 = vadd.f32 %v1881_v53, %v4518_v44 }
 0x323   : > { %v1883_v58 = vpop.f32.mrf.mxu1 }
 0x324   : > { %v2039_v6 = vmax.bf16 %v5164_v1, %v2007_v50  ;;  %v1884_v24 = vadd.f32 %v1883_v58, %v4521_v16 }
 0x325   : > { %v1885_v22 = vpop.f32.mrf.mxu1 }
 0x326   : > { %v1886_v14 = vadd.f32 %v1885_v22, %v4518_v44  ;;  %2330 = vmatprep.mubr.bf16.mxu0 %v2039_v6 }
 0x327   : > { %v1887_v48 = vpop.f32.mrf.mxu1  ;;  %2331 = vmatmul.mubr.bf16.gmra.mxu0 %v2038_v39 }
 0x328   : > { %v1888_v18 = vadd.f32 %v1887_v48, %v4521_v16  ;;  %v2008_v27 = vpack.c.bf16 %v1886_v14, %v1882_v35 }
 0x329   : > { %v1891_v25 = vpop.f32.mrf.mxu1 }
 0x32a   : > { %v2009_v13 = vpack.c.bf16 %v1888_v18, %v1884_v24  ;;  %v2040_v60 = vmax.bf16 %v5164_v1, %v2008_v27  ;;  %v1892_v17 = vadd.f32 %v1891_v25, %v4518_v44 }
 0x32b   : > { %v1893_v10 = vpop.f32.mrf.mxu1 }
 0x32c   : > { %v2041_v42 = vmax.bf16 %v5164_v1, %v2009_v13  ;;  %v1894_v59 = vadd.f32 %v1893_v10, %v4521_v16 }
 0x32d   : > { %v1895_v57 = vpop.f32.mrf.mxu1 }
 0x32e   : > { %v1896_v21 = vadd.f32 %v1895_v57, %v4518_v44  ;;  %2340 = vmatprep.mubr.bf16.mxu0 %v2041_v42 }
 0x32f   : > { %v1897_v9 = vpop.f32.mrf.mxu1  ;;  %2341 = vmatmul.mubr.bf16.gmra.mxu0 %v2040_v60 }
 0x330   : > { %v1898_v0 = vadd.f32 %v1897_v9, %v4521_v16  ;;  %v2010_v36 = vpack.c.bf16 %v1896_v21, %v1892_v17 }
 0x331   : > { %v1901_v31 = vpop.f32.mrf.mxu1 }
 0x332   : > { %v2011_v20 = vpack.c.bf16 %v1898_v0, %v1894_v59  ;;  %v2042_v28 = vmax.bf16 %v5164_v1, %v2010_v36  ;;  %v1902_v2 = vadd.f32 %v1901_v31, %v4518_v44 }
 0x333   : > { %v1903_v43 = vpop.f32.mrf.mxu1 }
 0x334   : > { %v2043_v63 = vmax.bf16 %v5164_v1, %v2011_v20  ;;  %v1904_v7 = vadd.f32 %v1903_v43, %v4521_v16 }
 0x335   : > { %v1905_v3 = vpop.f32.mrf.mxu1 }
 0x336   : > { %v1906_v38 = vadd.f32 %v1905_v3, %v4518_v44  ;;  %2350 = vmatprep.mubr.bf16.mxu0 %v2043_v63 }
 0x337   : > { %v1907_v26 = vpop.f32.mrf.mxu1  ;;  %2351 = vmatmul.mubr.bf16.gmra.mxu0 %v2042_v28 }
 0x338   : > { %v1908_v56 = vadd.f32 %v1907_v26, %v4521_v16  ;;  %v2012_v52 = vpack.c.bf16 %v1906_v38, %v1902_v2 }
 0x339   : > { %v1911_v62 = vpop.f32.mrf.mxu1 }
 0x33a   : > { %v2013_v29 = vpack.c.bf16 %v1908_v56, %v1904_v7  ;;  %v2044_v46 = vmax.bf16 %v5164_v1, %v2012_v52  ;;  %v1912_v4 = vadd.f32 %v1911_v62, %v4518_v44 }
 0x33b   : > { %v1913_v47 = vpop.f32.mrf.mxu1 }
 0x33c   : > { %v2045_v33 = vmax.bf16 %v5164_v1, %v2013_v29  ;;  %v1914_v30 = vadd.f32 %v1913_v47, %v4521_v16 }
 0x33d   : > { %v1915_v41 = vpop.f32.mrf.mxu1 }
 0x33e   : > { %v1916_v12 = vadd.f32 %v1915_v41, %v4518_v44  ;;  %2360 = vmatprep.mubr.bf16.mxu0 %v2045_v33 }
 0x33f   : > { %v1917_v32 = vpop.f32.mrf.mxu1  ;;  %2361 = vmatmul.mubr.bf16.gmra.mxu0 %v2044_v46 }
 0x340   : > { %v1918_v61 = vadd.f32 %v1917_v32, %v4521_v16  ;;  %v2014_v45 = vpack.c.bf16 %v1916_v12, %v1912_v4 }
 0x341   : > { %v1921_v8 = vpop.f32.mrf.mxu1 }
 0x342   : > { %v2015_v34 = vpack.c.bf16 %v1918_v61, %v1914_v30  ;;  %v2046_v11 = vmax.bf16 %v5164_v1, %v2014_v45  ;;  %v1922_v49 = vadd.f32 %v1921_v8, %v4518_v44 }
 0x343   : > { %v1923_v23 = vpop.f32.mrf.mxu1 }
 0x344   : > { %v2047_v55 = vmax.bf16 %v5164_v1, %v2015_v34  ;;  %v1924_v40 = vadd.f32 %v1923_v23, %v4521_v16 }
 0x345   : > { %v1925_v5 = vpop.f32.mrf.mxu1 }
 0x346   : > { %v1926_v15 = vadd.f32 %v1925_v5, %v4518_v44  ;;  %2370 = vmatprep.mubr.bf16.mxu0 %v2047_v55 }
 0x347   : > { %v1927_v51 = vpop.f32.mrf.mxu1  ;;  %2371 = vmatmul.mubr.bf16.gmra.mxu0 %v2046_v11 }
 0x348   : > { %v1928_v54 = vadd.f32 %v1927_v51, %v4521_v16  ;;  %v2016_v53 = vpack.c.bf16 %v1926_v15, %v1922_v49 }
 0x349   : > { %v1931_v50 = vpop.f32.mrf.mxu1 }
 0x34a   : > { %v2017_v58 = vpack.c.bf16 %v1928_v54, %v1924_v40  ;;  %v2048_v14 = vmax.bf16 %v5164_v1, %v2016_v53  ;;  %v1932_v48 = vadd.f32 %v1931_v50, %v4518_v44 }
 0x34b   : > { %v1933_v6 = vpop.f32.mrf.mxu1 }
 0x34c   : > { %v2049_v22 = vmax.bf16 %v5164_v1, %v2017_v58  ;;  %v1934_v18 = vadd.f32 %v1933_v6, %v4521_v16 }
 0x34d   : > { %v1935_v39 = vpop.f32.mrf.mxu1 }
 0x34e   : > { %v1936_v35 = vadd.f32 %v1935_v39, %v4518_v44  ;;  %2380 = vmatprep.mubr.bf16.mxu0 %v2049_v22 }
 0x34f   : > { %v1937_v24 = vpop.f32.mrf.mxu1  ;;  %2381 = vmatmul.mubr.bf16.gmra.mxu0 %v2048_v14 }
 0x350   : > { %v1938_v27 = vadd.f32 %v1937_v24, %v4521_v16  ;;  %v2018_v25 = vpack.c.bf16 %v1936_v35, %v1932_v48 }
 0x351   : > { %v1941_v13 = vpop.f32.mrf.mxu1 }
 0x352   : > { %v2019_v10 = vpack.c.bf16 %v1938_v27, %v1934_v18  ;;  %v2050_v21 = vmax.bf16 %v5164_v1, %v2018_v25  ;;  %v1942_v9 = vadd.f32 %v1941_v13, %v4518_v44 }
 0x353   : > { %v1943_v42 = vpop.f32.mrf.mxu1 }
 0x354   : > { %v2051_v57 = vmax.bf16 %v5164_v1, %v2019_v10  ;;  %v1944_v0 = vadd.f32 %v1943_v42, %v4521_v16 }
 0x355   : > { %v1945_v60 = vpop.f32.mrf.mxu1 }
 0x356   : > { %v1946_v17 = vadd.f32 %v1945_v60, %v4518_v44  ;;  %2390 = vmatprep.mubr.bf16.mxu0 %v2051_v57 }
 0x357   : > { %v1947_v59 = vpop.f32.mrf.mxu1  ;;  %2391 = vmatmul.mubr.bf16.gmra.mxu0 %v2050_v21 }
 0x358   : > { %v1948_v36 = vadd.f32 %v1947_v59, %v4521_v16  ;;  %v2020_v31 = vpack.c.bf16 %v1946_v17, %v1942_v9  ;;  %v2096_v17 = vld [vmem:[%s5142_s8] sm:$0x3] }
 0x35a   : > { %v2021_v20 = vpack.c.bf16 %v1948_v36, %v1944_v0  ;;  %v2052_v63 = vmax.bf16 %v5164_v1, %v2020_v31  ;;  %v4620_v0 = vrot.slane %v2096_v17, %v5168_v37 }
 0x35c   : > { %v2053_v43 = vmax.bf16 %v5164_v1, %v2021_v20 }
 0x35e   : > { %2400 = vmatprep.mubr.bf16.mxu0 %v2053_v43 }
 0x35f   : > { %2401 = vmatmul.mubr.bf16.gmra.mxu0 %v2052_v63  ;;  %v4626_v63 = vrot.slane %v2096_v17, %v3787_v19 }
 0x363   : > { %v1951_v3 = vpop.f32.mrf.mxu1 }
 0x364   : > { %v1952_v26 = vadd.f32 %v1951_v3, %v4518_v44 }
 0x365   : > { %v1953_v28 = vpop.f32.mrf.mxu1 }
 0x366   : > { %v1954_v56 = vadd.f32 %v1953_v28, %v4521_v16 }
 0x367   : > { %v1955_v38 = vpop.f32.mrf.mxu1 }
 0x368   : > { %v1956_v2 = vadd.f32 %v1955_v38, %v4518_v44 }
 0x369   : > { %v1957_v7 = vpop.f32.mrf.mxu1 }
 0x36a   : > { %v1958_v52 = vadd.f32 %v1957_v7, %v4521_v16  ;;  %v2022_v62 = vpack.c.bf16 %v1956_v2, %v1952_v26 }
 0x36c   : > { %v2023_v29 = vpack.c.bf16 %v1958_v52, %v1954_v56  ;;  %v2054_v33 = vmax.bf16 %v5164_v1, %v2022_v62 }
 0x36e   : > { %v2055_v47 = vmax.bf16 %v5164_v1, %v2023_v29 }
 0x370   : > { %2410 = vmatprep.mubr.bf16.mxu0 %v2055_v47 }
 0x371   : > { %2411 = vmatmul.mubr.bf16.gmra.mxu0 %v2054_v33 }
 0x37b   : > { %v1961_v41 = vpop.f32.mrf.mxu1 }
 0x37c   : > { %v1962_v32 = vadd.f32 %v1961_v41, %v4518_v44 }
 0x37d   : > { %v1963_v46 = vpop.f32.mrf.mxu1 }
 0x37e   : > { %v1964_v61 = vadd.f32 %v1963_v46, %v4521_v16 }
 0x37f   : > { %v1965_v12 = vpop.f32.mrf.mxu1 }
 0x380   : > { %v1966_v4 = vadd.f32 %v1965_v12, %v4518_v44 }
 0x381   : > { %v1967_v30 = vpop.f32.mrf.mxu1 }
 0x382   : > { %v1968_v45 = vadd.f32 %v1967_v30, %v4521_v16  ;;  %v2024_v8 = vpack.c.bf16 %v1966_v4, %v1962_v32 }
 0x384   : > { %v2025_v34 = vpack.c.bf16 %v1968_v45, %v1964_v61  ;;  %v2056_v55 = vmax.bf16 %v5164_v1, %v2024_v8 }
 0x386   : > { %v2057_v23 = vmax.bf16 %v5164_v1, %v2025_v34 }
 0x388   : > { %2420 = vmatprep.mubr.bf16.mxu0 %v2057_v23 }
 0x389   : > { %2421 = vmatmul.mubr.bf16.gmra.mxu0 %v2056_v55 }
 0x397   : > { %v1971_v5 = vpop.f32.mrf.mxu1 }
 0x398   : > { %v1972_v51 = vadd.f32 %v1971_v5, %v4518_v44 }
 0x399   : > { %v1973_v11 = vpop.f32.mrf.mxu1 }
 0x39a   : > { %v1974_v54 = vadd.f32 %v1973_v11, %v4521_v16 }
 0x39b   : > { %v1975_v15 = vpop.f32.mrf.mxu1 }
 0x39c   : > { %v1976_v49 = vadd.f32 %v1975_v15, %v4518_v44 }
 0x39d   : > { %v1977_v40 = vpop.f32.mrf.mxu1 }
 0x39e   : > { %v1978_v53 = vadd.f32 %v1977_v40, %v4521_v16  ;;  %v2026_v50 = vpack.c.bf16 %v1976_v49, %v1972_v51 }
 0x3a0   : > { %v2027_v58 = vpack.c.bf16 %v1978_v53, %v1974_v54  ;;  %v2058_v22 = vmax.bf16 %v5164_v1, %v2026_v50 }
 0x3a2   : > { %v2059_v6 = vmax.bf16 %v5164_v1, %v2027_v58 }
 0x3a4   : > { %2430 = vmatprep.mubr.bf16.mxu0 %v2059_v6 }
 0x3a5   : > { %2431 = vmatmul.mubr.bf16.gmra.mxu0 %v2058_v22 }
 0x3af   : > { %v1981_v39 = vpop.f32.mrf.mxu1 }
 0x3b0   : > { %v1982_v24 = vadd.f32 %v1981_v39, %v4518_v44 }
 0x3b1   : > { %v1983_v14 = vpop.f32.mrf.mxu1 }
 0x3b2   : > { %v1984_v27 = vadd.f32 %v1983_v14, %v4521_v16 }
 0x3b3   : > { %v1985_v35 = vpop.f32.mrf.mxu1 }
 0x3b4   : > { %v1986_v48 = vadd.f32 %v1985_v35, %v4518_v44 }
 0x3b5   : > { %v1987_v18 = vpop.f32.mrf.mxu1 }
 0x3b6   : > { %v1988_v25 = vadd.f32 %v1987_v18, %v4521_v16  ;;  %v2028_v13 = vpack.c.bf16 %v1986_v48, %v1982_v24 }
 0x3b8   : > { %v2029_v10 = vpack.c.bf16 %v1988_v25, %v1984_v27  ;;  %v2060_v57 = vmax.bf16 %v5164_v1, %v2028_v13 }
 0x3ba   : > { %v2061_v42 = vmax.bf16 %v5164_v1, %v2029_v10 }
 0x3bc   : > { %2440 = vmatprep.mubr.bf16.mxu0 %v2061_v42 }
 0x3bd   : > { %2441 = vmatmul.mubr.bf16.gmra.mxu0 %v2060_v57 }
 0x3c7   : > { %v1991_v60 = vpop.f32.mrf.mxu1 }
 0x3c8   : > { %v1992_v36 = vadd.f32 %v1991_v60, %v4518_v44 }
 0x3c9   : > { %v1993_v21 = vpop.f32.mrf.mxu1 }
 0x3ca   : > { %v1994_v20 = vadd.f32 %v1993_v21, %v4521_v16 }
 0x3cb   : > { %v1995_v9 = vpop.f32.mrf.mxu1 }
 0x3cc   : > { %v1996_v59 = vadd.f32 %v1995_v9, %v4518_v44 }
 0x3cd   : > { %v1997_v31 = vpop.f32.mrf.mxu1 }
 0x3ce   : > { %v1998_v43 = vadd.f32 %v1997_v31, %v4521_v16  ;;  %v2030_v3 = vpack.c.bf16 %v1996_v59, %v1992_v36 }
 0x3cf   : > { %v2302_v28 = vpop.f32.mrf.mxu0 }
 0x3d0   : > { %v2031_v38 = vpack.c.bf16 %v1998_v43, %v1994_v20  ;;  %v4629_v2 = vadd.f32 %v2302_v28, %v4620_v0  ;;  %v2062_v56 = vmax.bf16 %v5164_v1, %v2030_v3 }
 0x3d1   : > { %v2304_v26 = vpop.f32.mrf.mxu0 }
 0x3d2   : > { %v4632_v37 = vadd.f32 %v2304_v26, %v4626_v63  ;;  %v2063_v44 = vmax.bf16 %v5164_v1, %v2031_v38  ;;  %v2461_v16 = vmul.f32 %v4629_v2, %v4629_v2 }
 0x3d3   : > { %v2306_v7 = vpop.f32.mrf.mxu0 }
 0x3d4   : > { %v2462_v19 = vmul.f32 %v4632_v37, %v4632_v37  ;;  %v4641_v52 = vadd.f32 %v2306_v7, %v4620_v0  ;;  %2450 = vmatprep.mubr.bf16.mxu0 %v2063_v44 }
 0x3d5   : > { %v2308_v62 = vpop.f32.mrf.mxu0  ;;  %2451 = vmatmul.mubr.bf16.gmra.mxu0 %v2062_v56 }
 0x3d6   : > { %v4644_v29 = vadd.f32 %v2308_v62, %v4626_v63  ;;  %v2525_v47 = vadd.f32 %v2462_v19, %v2461_v16  ;;  %v2463_v1 = vmul.f32 %v4641_v52, %v4641_v52 }
 0x3d7   : > { %v2312_v33 = vpop.f32.mrf.mxu0 }
 0x3d8   : > { %v2464_v41 = vmul.f32 %v4644_v29, %v4644_v29  ;;  %v4651_v46 = vadd.f32 %v2312_v33, %v4620_v0  ;;  %2526 = vadd.xlane.f32.xlu1 %v2525_v47 }
 0x3d9   : > { %v2314_v12 = vpop.f32.mrf.mxu0 }
 0x3da   : > { %v4654_v4 = vadd.f32 %v2314_v12, %v4626_v63  ;;  %v2528_v32 = vadd.f32 %v2464_v41, %v2463_v1  ;;  %v2465_v61 = vmul.f32 %v4651_v46, %v4651_v46 }
 0x3db   : > { %v2316_v30 = vpop.f32.mrf.mxu0 }
 0x3dc   : > { %v2466_v45 = vmul.f32 %v4654_v4, %v4654_v4  ;;  %v4661_v8 = vadd.f32 %v2316_v30, %v4620_v0  ;;  %2529 = vadd.xlane.f32.xlu0 %v2528_v32 }
 0x3dd   : > { %v2318_v34 = vpop.f32.mrf.mxu0 }
 0x3de   : > { %v4664_v23 = vadd.f32 %v2318_v34, %v4626_v63  ;;  %v2531_v55 = vadd.f32 %v2466_v45, %v2465_v61  ;;  %v2467_v11 = vmul.f32 %v4661_v8, %v4661_v8 }
 0x3df   : > { %v2322_v5 = vpop.f32.mrf.mxu0 }
 0x3e0   : > { %v2468_v15 = vmul.f32 %v4664_v23, %v4664_v23  ;;  %v4671_v49 = vadd.f32 %v2322_v5, %v4620_v0  ;;  %2532 = vadd.xlane.f32.xlu1 %v2531_v55 }
 0x3e1   : > { %v2324_v51 = vpop.f32.mrf.mxu0 }
 0x3e2   : > { %v4674_v40 = vadd.f32 %v2324_v51, %v4626_v63  ;;  %v2534_v54 = vadd.f32 %v2468_v15, %v2467_v11  ;;  %v2469_v50 = vmul.f32 %v4671_v49, %v4671_v49 }
 0x3e3   : > { %v2326_v53 = vpop.f32.mrf.mxu0 }
 0x3e4   : > { %v2470_v58 = vmul.f32 %v4674_v40, %v4674_v40  ;;  %v4681_v6 = vadd.f32 %v2326_v53, %v4620_v0  ;;  %2535 = vadd.xlane.f32.xlu0 %v2534_v54 }
 0x3e5   : > { %v2328_v22 = vpop.f32.mrf.mxu0 }
 0x3e6   : > { %v4684_v39 = vadd.f32 %v2328_v22, %v4626_v63  ;;  %v2537_v14 = vadd.f32 %v2470_v58, %v2469_v50  ;;  %v2471_v48 = vmul.f32 %v4681_v6, %v4681_v6 }
 0x3e7   : > { %v2332_v35 = vpop.f32.mrf.mxu0 }
 0x3e8   : > { %v2472_v24 = vmul.f32 %v4684_v39, %v4684_v39  ;;  %v4691_v18 = vadd.f32 %v2332_v35, %v4620_v0  ;;  %2538 = vadd.xlane.f32.xlu1 %v2537_v14 }
 0x3e9   : > { %v2334_v27 = vpop.f32.mrf.mxu0 }
 0x3ea   : > { %v4694_v25 = vadd.f32 %v2334_v27, %v4626_v63  ;;  %v2540_v13 = vadd.f32 %v2472_v24, %v2471_v48  ;;  %v2473_v42 = vmul.f32 %v4691_v18, %v4691_v18 }
 0x3eb   : > { %v2336_v10 = vpop.f32.mrf.mxu0 }
 0x3ec   : > { %v2474_v57 = vmul.f32 %v4694_v25, %v4694_v25  ;;  %v4701_v60 = vadd.f32 %v2336_v10, %v4620_v0  ;;  %2541 = vadd.xlane.f32.xlu0 %v2540_v13 }
 0x3ed   : > { %v2338_v21 = vpop.f32.mrf.mxu0 }
 0x3ee   : > { %v4704_v17 = vadd.f32 %v2338_v21, %v4626_v63  ;;  %v2543_v9 = vadd.f32 %v2474_v57, %v2473_v42  ;;  %v2475_v36 = vmul.f32 %v4701_v60, %v4701_v60 }
 0x3ef   : > { %v2342_v59 = vpop.f32.mrf.mxu0 }
 0x3f0   : > { %v2476_v31 = vmul.f32 %v4704_v17, %v4704_v17  ;;  %v4711_v20 = vadd.f32 %v2342_v59, %v4620_v0  ;;  %2544 = vadd.xlane.f32.xlu1 %v2543_v9 }
 0x3f1   : > { %v2344_v43 = vpop.f32.mrf.mxu0 }
 0x3f2   : > { %v4714_v3 = vadd.f32 %v2344_v43, %v4626_v63  ;;  %v2546_v28 = vadd.f32 %v2476_v31, %v2475_v36  ;;  %v2477_v26 = vmul.f32 %v4711_v20, %v4711_v20 }
 0x3f3   : > { %v2346_v38 = vpop.f32.mrf.mxu0 }
 0x3f4   : > { %v2478_v44 = vmul.f32 %v4714_v3, %v4714_v3  ;;  %v4721_v7 = vadd.f32 %v2346_v38, %v4620_v0  ;;  %2547 = vadd.xlane.f32.xlu0 %v2546_v28 }
 0x3f5   : > { %v2348_v56 = vpop.f32.mrf.mxu0 }
 0x3f6   : > { %v4724_v16 = vadd.f32 %v2348_v56, %v4626_v63  ;;  %v2549_v19 = vadd.f32 %v2478_v44, %v2477_v26  ;;  %v2479_v47 = vmul.f32 %v4721_v7, %v4721_v7 }
 0x3f7   : > { %v2352_v62 = vpop.f32.mrf.mxu0 }
 0x3f8   : > { %v2480_v33 = vmul.f32 %v4724_v16, %v4724_v16  ;;  %v4731_v1 = vadd.f32 %v2352_v62, %v4620_v0  ;;  %2550 = vadd.xlane.f32.xlu1 %v2549_v19 }
 0x3f9   : > { %v2354_v41 = vpop.f32.mrf.mxu0 }
 0x3fa   : > { %v4734_v12 = vadd.f32 %v2354_v41, %v4626_v63  ;;  %v2552_v32 = vadd.f32 %v2480_v33, %v2479_v47  ;;  %v2481_v61 = vmul.f32 %v4731_v1, %v4731_v1 }
 0x3fb   : > { %v2356_v30 = vpop.f32.mrf.mxu0 }
 0x3fc   : > { %v2482_v45 = vmul.f32 %v4734_v12, %v4734_v12  ;;  %v4741_v34 = vadd.f32 %v2356_v30, %v4620_v0  ;;  %2553 = vadd.xlane.f32.xlu0 %v2552_v32 }
 0x3fd   : > { %v2358_v55 = vpop.f32.mrf.mxu0 }
 0x3fe   : > { %v4744_v5 = vadd.f32 %v2358_v55, %v4626_v63  ;;  %v2555_v11 = vadd.f32 %v2482_v45, %v2481_v61  ;;  %v2483_v51 = vmul.f32 %v4741_v34, %v4741_v34 }
 0x3ff   : > { %v2362_v15 = vpop.f32.mrf.mxu0 }
 0x400   : > { %v2484_v54 = vmul.f32 %v4744_v5, %v4744_v5  ;;  %v4751_v53 = vadd.f32 %v2362_v15, %v4620_v0  ;;  %2556 = vadd.xlane.f32.xlu1 %v2555_v11 }
 0x401   : > { %v2364_v50 = vpop.f32.mrf.mxu0 }
 0x402   : > { %v4754_v58 = vadd.f32 %v2364_v50, %v4626_v63  ;;  %v2558_v22 = vadd.f32 %v2484_v54, %v2483_v51  ;;  %v2485_v35 = vmul.f32 %v4751_v53, %v4751_v53 }
 0x403   : > { %v2366_v14 = vpop.f32.mrf.mxu0 }
 0x404   : > { %v2486_v48 = vmul.f32 %v4754_v58, %v4754_v58  ;;  %v4761_v24 = vadd.f32 %v2366_v14, %v4620_v0  ;;  %2559 = vadd.xlane.f32.xlu0 %v2558_v22 }
 0x405   : > { %v2368_v27 = vpop.f32.mrf.mxu0 }
 0x406   : > { %v4764_v13 = vadd.f32 %v2368_v27, %v4626_v63  ;;  %v2561_v10 = vadd.f32 %v2486_v48, %v2485_v35  ;;  %v2487_v57 = vmul.f32 %v4761_v24, %v4761_v24 }
 0x407   : > { %v2372_v42 = vpop.f32.mrf.mxu0 }
 0x408   : > { %v2488_v21 = vmul.f32 %v4764_v13, %v4764_v13  ;;  %v4771_v9 = vadd.f32 %v2372_v42, %v4620_v0  ;;  %2562 = vadd.xlane.f32.xlu1 %v2561_v10 }
 0x409   : > { %v2374_v59 = vpop.f32.mrf.mxu0 }
 0x40a   : > { %v4774_v36 = vadd.f32 %v2374_v59, %v4626_v63  ;;  %v2564_v31 = vadd.f32 %v2488_v21, %v2487_v57  ;;  %v2489_v28 = vmul.f32 %v4771_v9, %v4771_v9 }
 0x40b   : > { %v2376_v43 = vpop.f32.mrf.mxu0 }
 0x40c   : > { %v2490_v38 = vmul.f32 %v4774_v36, %v4774_v36  ;;  %v4781_v26 = vadd.f32 %v2376_v43, %v4620_v0  ;;  %2565 = vadd.xlane.f32.xlu0 %v2564_v31 }
 0x40d   : > { %v2378_v44 = vpop.f32.mrf.mxu0 }
 0x40e   : > { %v4784_v56 = vadd.f32 %v2378_v44, %v4626_v63  ;;  %v2567_v19 = vadd.f32 %v2490_v38, %v2489_v28  ;;  %v2491_v47 = vmul.f32 %v4781_v26, %v4781_v26 }
 0x40f   : > { %v2382_v62 = vpop.f32.mrf.mxu0 }
 0x410   : > { %v2492_v33 = vmul.f32 %v4784_v56, %v4784_v56  ;;  %v4791_v41 = vadd.f32 %v2382_v62, %v4620_v0  ;;  %2568 = vadd.xlane.f32.xlu1 %v2567_v19 }
 0x411   : > { %v2384_v32 = vpop.f32.mrf.mxu0 }
 0x412   : > { %v4794_v30 = vadd.f32 %v2384_v32, %v4626_v63  ;;  %v2570_v61 = vadd.f32 %v2492_v33, %v2491_v47  ;;  %v2493_v55 = vmul.f32 %v4791_v41, %v4791_v41 }
 0x413   : > { %v2386_v45 = vpop.f32.mrf.mxu0 }
 0x414   : > { %v2494_v11 = vmul.f32 %v4794_v30, %v4794_v30  ;;  %v4801_v15 = vadd.f32 %v2386_v45, %v4620_v0  ;;  %2571 = vadd.xlane.f32.xlu0 %v2570_v61 }
 0x415   : > { %v2388_v51 = vpop.f32.mrf.mxu0 }
 0x416   : > { %v4804_v54 = vadd.f32 %v2388_v51, %v4626_v63  ;;  %v2573_v50 = vadd.f32 %v2494_v11, %v2493_v55  ;;  %v2495_v14 = vmul.f32 %v4801_v15, %v4801_v15 }
 0x417   : > { %v2392_v22 = vpop.f32.mrf.mxu0 }
 0x418   : > { %v2496_v35 = vmul.f32 %v4804_v54, %v4804_v54  ;;  %v4811_v48 = vadd.f32 %v2392_v22, %v4620_v0  ;;  %2574 = vadd.xlane.f32.xlu1 %v2573_v50 }
 0x419   : > { %v2394_v27 = vpop.f32.mrf.mxu0 }
 0x41a   : > { %v4814_v10 = vadd.f32 %v2394_v27, %v4626_v63  ;;  %v2576_v42 = vadd.f32 %v2496_v35, %v2495_v14  ;;  %v2497_v21 = vmul.f32 %v4811_v48, %v4811_v48 }
 0x41b   : > { %v2396_v57 = vpop.f32.mrf.mxu0 }
 0x41c   : > { %v2498_v59 = vmul.f32 %v4814_v10, %v4814_v10  ;;  %v4821_v31 = vadd.f32 %v2396_v57, %v4620_v0  ;;  %2577 = vadd.xlane.f32.xlu0 %v2576_v42 }
 0x41d   : > { %v2398_v43 = vpop.f32.mrf.mxu0 }
 0x41e   : > { %v4824_v28 = vadd.f32 %v2398_v43, %v4626_v63  ;;  %v2579_v38 = vadd.f32 %v2498_v59, %v2497_v21  ;;  %v2499_v19 = vmul.f32 %v4821_v31, %v4821_v31 }
 0x41f   : > { %v2402_v44 = vpop.f32.mrf.mxu0 }
 0x420   : > { %v2500_v62 = vmul.f32 %v4824_v28, %v4824_v28  ;;  %v4831_v47 = vadd.f32 %v2402_v44, %v4620_v0  ;;  %2580 = vadd.xlane.f32.xlu1 %v2579_v38 }
 0x421   : > { %v2404_v33 = vpop.f32.mrf.mxu0 }
 0x422   : > { %v4834_v32 = vadd.f32 %v2404_v33, %v4626_v63  ;;  %v2582_v61 = vadd.f32 %v2500_v62, %v2499_v19  ;;  %v2501_v55 = vmul.f32 %v4831_v47, %v4831_v47 }
 0x423   : > { %v2406_v45 = vpop.f32.mrf.mxu0 }
 0x424   : > { %v2502_v11 = vmul.f32 %v4834_v32, %v4834_v32  ;;  %v4841_v51 = vadd.f32 %v2406_v45, %v4620_v0  ;;  %2583 = vadd.xlane.f32.xlu0 %v2582_v61 }
 0x425   : > { %v2408_v50 = vpop.f32.mrf.mxu0 }
 0x426   : > { %v4844_v22 = vadd.f32 %v2408_v50, %v4626_v63  ;;  %v2585_v14 = vadd.f32 %v2502_v11, %v2501_v55  ;;  %v2503_v35 = vmul.f32 %v4841_v51, %v4841_v51 }
 0x428   : > { %v2504_v27 = vmul.f32 %v4844_v22, %v4844_v22  ;;  %2586 = vadd.xlane.f32.xlu1 %v2585_v14 }
 0x42a   : > { %v2588_v42 = vadd.f32 %v2504_v27, %v2503_v35 }
 0x42c   : > { %2589 = vadd.xlane.f32.xlu0 %v2588_v42 }
 0x431   : > { %v2412_v57 = vpop.f32.mrf.mxu0 }
 0x432   : > { %v4851_v21 = vadd.f32 %v2412_v57, %v4620_v0 }
 0x433   : > { %v2414_v59 = vpop.f32.mrf.mxu0 }
 0x434   : > { %v4854_v43 = vadd.f32 %v2414_v59, %v4626_v63  ;;  %v2505_v44 = vmul.f32 %v4851_v21, %v4851_v21 }
 0x435   : > { %v2416_v38 = vpop.f32.mrf.mxu0 }
 0x436   : > { %v2506_v19 = vmul.f32 %v4854_v43, %v4854_v43  ;;  %v4861_v62 = vadd.f32 %v2416_v38, %v4620_v0 }
 0x437   : > { %v2418_v33 = vpop.f32.mrf.mxu0 }
 0x438   : > { %v4864_v61 = vadd.f32 %v2418_v33, %v4626_v63  ;;  %v2591_v45 = vadd.f32 %v2506_v19, %v2505_v44  ;;  %v2507_v55 = vmul.f32 %v4861_v62, %v4861_v62 }
 0x43a   : > { %v2508_v11 = vmul.f32 %v4864_v61, %v4864_v61  ;;  %2592 = vadd.xlane.f32.xlu1 %v2591_v45 }
 0x43c   : > { %v2594_v50 = vadd.f32 %v2508_v11, %v2507_v55 }
 0x43e   : > { %2595 = vadd.xlane.f32.xlu0 %v2594_v50 }
 0x449   : > { %v2422_v14 = vpop.f32.mrf.mxu0 }
 0x44a   : > { %v4871_v35 = vadd.f32 %v2422_v14, %v4620_v0 }
 0x44b   : > { %v2424_v27 = vpop.f32.mrf.mxu0 }
 0x44c   : > { %5169 = vst [vmem:[#allocation8_spill] sm:$0xff] %v4871_v35  ;;  %v4874_v42 = vadd.f32 %v2424_v27, %v4626_v63  ;;  %v2509_v59 = vmul.f32 %v4871_v35, %v4871_v35 }
 0x44d   : > { %v2426_v57 = vpop.f32.mrf.mxu0 }
 0x44e   : > { %5170 = vst [vmem:[#allocation9_spill] sm:$0xff] %v4874_v42  ;;  %v2510_v38 = vmul.f32 %v4874_v42, %v4874_v42  ;;  %v4881_v44 = vadd.f32 %v2426_v57, %v4620_v0 }
 0x44f   : > { %v2428_v19 = vpop.f32.mrf.mxu0 }
 0x450   : > { %5171 = vst [vmem:[#allocation10_spill] sm:$0xff] %v4881_v44  ;;  %v4884_v33 = vadd.f32 %v2428_v19, %v4626_v63  ;;  %v2597_v45 = vadd.f32 %v2510_v38, %v2509_v59  ;;  %v2511_v55 = vmul.f32 %v4881_v44, %v4881_v44 }
 0x452   : > { %5172 = vst [vmem:[#allocation11_spill] sm:$0xff] %v4884_v33  ;;  %v2512_v11 = vmul.f32 %v4884_v33, %v4884_v33  ;;  %2598 = vadd.xlane.f32.xlu1 %v2597_v45 }
 0x454   : > { %v2600_v50 = vadd.f32 %v2512_v11, %v2511_v55 }
 0x456   : > { %2601 = vadd.xlane.f32.xlu0 %v2600_v50 }
 0x461   : > { %v2527_v14 = vpop.xlane.xlu1 %2526 }
 0x462   : > { %v2621_v27 = vmax.f32 %v2527_v14, 1e-24 }
 0x464   : > { %3267 = vrsqrt.f32 %v2621_v27 }
 0x465   : > { %v2432_v57 = vpop.f32.mrf.mxu0  ;;  %v2530_v42 = vpop.xlane.xlu0 %2529 }
 0x466   : > { %v4891_v35 = vadd.f32 %v2432_v57, %v4620_v0  ;;  %v2622_v19 = vmax.f32 %v2530_v42, 1e-24 }
 0x467   : > { %v2434_v59 = vpop.f32.mrf.mxu0 }
 0x468   : > { %5173 = vst [vmem:[#allocation12_spill] sm:$0xff] %v4891_v35  ;;  %3269 = vrsqrt.f32 %v2622_v19  ;;  %v4894_v38 = vadd.f32 %v2434_v59, %v4626_v63  ;;  %v2513_v55 = vmul.f32 %v4891_v35, %v4891_v35 }
 0x469   : > { %v2436_v33 = vpop.f32.mrf.mxu0  ;;  %v2533_v45 = vpop.xlane.xlu1 %2532 }
 0x46a   : > { %5174 = vst [vmem:[#allocation13_spill] sm:$0xff] %v4894_v38  ;;  %v2514_v11 = vmul.f32 %v4894_v38, %v4894_v38  ;;  %v4901_v50 = vadd.f32 %v2436_v33, %v4620_v0  ;;  %v2623_v14 = vmax.f32 %v2533_v45, 1e-24 }
 0x46b   : > { %v2438_v42 = vpop.f32.mrf.mxu0 }
 0x46c   : > { %3271 = vrsqrt.f32 %v2623_v14  ;;  %v4905_v27 = vadd.f32 %v2438_v42, %v4626_v63  ;;  %v2603_v57 = vadd.f32 %v2514_v11, %v2513_v55  ;;  %v2515_v59 = vmul.f32 %v4901_v50, %v4901_v50 }
 0x46d   : > { %v2536_v19 = vpop.xlane.xlu0 %2535 }
 0x46e   : > { %v2516_v38 = vmul.f32 %v4905_v27, %v4905_v27  ;;  %v2624_v35 = vmax.f32 %v2536_v19, 1e-24  ;;  %2604 = vadd.xlane.f32.xlu1 %v2603_v57 }
 0x470   : > { %3273 = vrsqrt.f32 %v2624_v35  ;;  %v2606_v33 = vadd.f32 %v2516_v38, %v2515_v59 }
 0x471   : > { %v3268_v45 = vpop.eup %3267  ;;  %v2539_v44 = vpop.xlane.xlu1 %2538 }
 0x472   : > { %v2685_v14 = vmul.f32 %v3268_v45, %v4629_v2  ;;  %v2686_v42 = vmul.f32 %v3268_v45, %v4632_v37  ;;  %v2625_v55 = vmax.f32 %v2539_v44, 1e-24  ;;  %2607 = vadd.xlane.f32.xlu0 %v2606_v33 }
 0x474   : > { %2749 = vst [vmem:[%s4915_s17] sm:$0xff] %v2685_v14  ;;  %2750 = vst [vmem:[%s4915_s17 + $0x8] sm:$0xff] %v2686_v42  ;;  %3275 = vrsqrt.f32 %v2625_v55 }
 0x475   : > { %v3270_v35 = vpop.eup %3269  ;;  %v2542_v38 = vpop.xlane.xlu0 %2541 }
 0x476   : > { %v2687_v11 = vmul.f32 %v3270_v35, %v4641_v52  ;;  %v2688_v2 = vmul.f32 %v3270_v35, %v4644_v29  ;;  %v2626_v37 = vmax.f32 %v2542_v38, 1e-24 }
 0x478   : > { %2751 = vst [vmem:[%s4915_s17 + $0x10] sm:$0xff] %v2687_v11  ;;  %2752 = vst [vmem:[%s4915_s17 + $0x18] sm:$0xff] %v2688_v2  ;;  %3277 = vrsqrt.f32 %v2626_v37 }
 0x479   : > { %v3272_v44 = vpop.eup %3271  ;;  %v2545_v57 = vpop.xlane.xlu1 %2544 }
 0x47a   : > { %v2689_v19 = vmul.f32 %v3272_v44, %v4651_v46  ;;  %v2690_v59 = vmul.f32 %v3272_v44, %v4654_v4  ;;  %v2627_v33 = vmax.f32 %v2545_v57, 1e-24 }
 0x47c   : > { %2753 = vst [vmem:[%s4915_s17 + $0x20] sm:$0xff] %v2689_v19  ;;  %2754 = vst [vmem:[%s4915_s17 + $0x28] sm:$0xff] %v2690_v59  ;;  %3279 = vrsqrt.f32 %v2627_v33 }
 0x47d   : > { %v3274_v45 = vpop.eup %3273  ;;  %v2442_v52 = vpop.f32.mrf.mxu0 }
 0x47e   : > { %v2548_v14 = vpop.xlane.xlu0 %2547  ;;  %v2691_v29 = vmul.f32 %v3274_v45, %v4661_v8  ;;  %v2692_v42 = vmul.f32 %v3274_v45, %v4664_v23  ;;  %v4930_v55 = vadd.f32 %v2442_v52, %v4620_v0 }
 0x47f   : > { %v2628_v35 = vmax.f32 %v2548_v14, 1e-24  ;;  %v2444_v38 = vpop.f32.mrf.mxu0 }
 0x480   : > { %2755 = vst [vmem:[%s4915_s17 + $0x30] sm:$0xff] %v2691_v29  ;;  %2756 = vst [vmem:[%s4915_s17 + $0x38] sm:$0xff] %v2692_v42  ;;  %v4935_v46 = vadd.f32 %v2444_v38, %v4626_v63  ;;  %v2517_v11 = vmul.f32 %v4930_v55, %v4930_v55 }
 0x481   : > { %3281 = vrsqrt.f32 %v2628_v35  ;;  %v3276_v4 = vpop.eup %3275  ;;  %v2446_v8 = vpop.f32.mrf.mxu0 }
 0x482   : > { %v2551_v2 = vpop.xlane.xlu1 %2550  ;;  %v2693_v23 = vmul.f32 %v3276_v4, %v4671_v49  ;;  %v2694_v37 = vmul.f32 %v3276_v4, %v4674_v40  ;;  %v2518_v44 = vmul.f32 %v4935_v46, %v4935_v46  ;;  %v4944_v57 = vadd.f32 %v2446_v8, %v4620_v0 }
 0x483   : > { %v2629_v19 = vmax.f32 %v2551_v2, 1e-24  ;;  %v2448_v59 = vpop.f32.mrf.mxu0 }
 0x484   : > { %2757 = vst [vmem:[%s4915_s17 + $0x40] sm:$0xff] %v2693_v23  ;;  %2758 = vst [vmem:[%s4915_s17 + $0x48] sm:$0xff] %v2694_v37  ;;  %v4949_v33 = vadd.f32 %v2448_v59, %v4626_v63  ;;  %v2609_v45 = vadd.f32 %v2518_v44, %v2517_v11  ;;  %v2519_v49 = vmul.f32 %v4944_v57, %v4944_v57 }
 0x485   : > { %v3278_v52 = vpop.eup %3277  ;;  %3283 = vrsqrt.f32 %v2629_v19  ;;  %v2554_v40 = vpop.xlane.xlu0 %2553 }
 0x486   : > { %v2695_v14 = vmul.f32 %v3278_v52, %v4681_v6  ;;  %v2696_v29 = vmul.f32 %v3278_v52, %v4684_v39  ;;  %v2520_v42 = vmul.f32 %v4949_v33, %v4949_v33  ;;  %v2630_v35 = vmax.f32 %v2554_v40, 1e-24  ;;  %2610 = vadd.xlane.f32.xlu1 %v2609_v45 }
 0x488   : > { %2759 = vst [vmem:[%s4915_s17 + $0x50] sm:$0xff] %v2695_v14  ;;  %2760 = vst [vmem:[%s4915_s17 + $0x58] sm:$0xff] %v2696_v29  ;;  %3285 = vrsqrt.f32 %v2630_v35  ;;  %v2612_v38 = vadd.f32 %v2520_v42, %v2519_v49 }
 0x489   : > { %v3280_v4 = vpop.eup %3279  ;;  %v2557_v11 = vpop.xlane.xlu1 %2556 }
 0x48a   : > { %v2697_v8 = vmul.f32 %v3280_v4, %v4691_v18  ;;  %v2698_v6 = vmul.f32 %v3280_v4, %v4694_v25  ;;  %v2631_v2 = vmax.f32 %v2557_v11, 1e-24  ;;  %2613 = vadd.xlane.f32.xlu0 %v2612_v38 }
 0x48c   : > { %2761 = vst [vmem:[%s4915_s17 + $0x60] sm:$0xff] %v2697_v8  ;;  %2762 = vst [vmem:[%s4915_s17 + $0x68] sm:$0xff] %v2698_v6  ;;  %3287 = vrsqrt.f32 %v2631_v2 }
 0x48d   : > { %v2560_v23 = vpop.xlane.xlu0 %2559 }
 0x48e   : > { %v3282_v39 = vpop.eup %3281  ;;  %v2632_v19 = vmax.f32 %v2560_v23, 1e-24 }
 0x48f   : > { %v2699_v37 = vmul.f32 %v3282_v39, %v4701_v60  ;;  %v2700_v44 = vmul.f32 %v3282_v39, %v4704_v17 }
 0x490   : > { %3289 = vrsqrt.f32 %v2632_v19 }
 0x491   : > { %2763 = vst [vmem:[%s4915_s17 + $0x70] sm:$0xff] %v2699_v37  ;;  %2764 = vst [vmem:[%s4915_s17 + $0x78] sm:$0xff] %v2700_v44  ;;  %v2563_v18 = vpop.xlane.xlu1 %2562 }
 0x492   : > { %v3284_v25 = vpop.eup %3283  ;;  %v2633_v59 = vmax.f32 %v2563_v18, 1e-24 }
 0x493   : > { %v2701_v45 = vmul.f32 %v3284_v25, %v4711_v20  ;;  %v2702_v52 = vmul.f32 %v3284_v25, %v4714_v3 }
 0x494   : > { %3291 = vrsqrt.f32 %v2633_v59 }
 0x495   : > { %v3286_v49 = vpop.eup %3285  ;;  %2765 = vst [vmem:[%s4915_s17 + $0x80] sm:$0xff] %v2701_v45  ;;  %2766 = vst [vmem:[%s4915_s17 + $0x88] sm:$0xff] %v2702_v52  ;;  %v2566_v60 = vpop.xlane.xlu0 %2565 }
 0x496   : > { %v2452_v40 = vpop.f32.mrf.mxu0  ;;  %v2703_v17 = vmul.f32 %v3286_v49, %v4721_v7  ;;  %v2704_v14 = vmul.f32 %v3286_v49, %v4724_v16  ;;  %v2634_v29 = vmax.f32 %v2566_v60, 1e-24 }
 0x497   : > { %v4974_v42 = vadd.f32 %v2452_v40, %v4620_v0 }
 0x498   : > { %v2454_v35 = vpop.f32.mrf.mxu0  ;;  %2767 = vst [vmem:[%s4915_s17 + $0x90] sm:$0xff] %v2703_v17  ;;  %2768 = vst [vmem:[%s4915_s17 + $0x98] sm:$0xff] %v2704_v14  ;;  %3293 = vrsqrt.f32 %v2634_v29 }
 0x499   : > { %v4979_v20 = vadd.f32 %v2454_v35, %v4626_v63  ;;  %v3288_v3 = vpop.eup %3287  ;;  %v2521_v38 = vmul.f32 %v4974_v42, %v4974_v42  ;;  %v2569_v7 = vpop.xlane.xlu1 %2568 }
 0x49a   : > { %v2456_v4 = vpop.f32.mrf.mxu0  ;;  %v2705_v16 = vmul.f32 %v3288_v3, %v4731_v1  ;;  %v2706_v11 = vmul.f32 %v3288_v3, %v4734_v12  ;;  %v2635_v6 = vmax.f32 %v2569_v7, 1e-24 }
 0x49b   : > { %v2522_v8 = vmul.f32 %v4979_v20, %v4979_v20  ;;  %v4988_v2 = vadd.f32 %v2456_v4, %v4620_v0 }
 0x49c   : > { %v2458_v39 = vpop.f32.mrf.mxu0  ;;  %2769 = vst [vmem:[%s4915_s17 + $0xa0] sm:$0xff] %v2705_v16  ;;  %2770 = vst [vmem:[%s4915_s17 + $0xa8] sm:$0xff] %v2706_v11  ;;  %3295 = vrsqrt.f32 %v2635_v6 }
 0x49d   : > { %v4993_v23 = vadd.f32 %v2458_v39, %v4626_v63  ;;  %v2615_v37 = vadd.f32 %v2522_v8, %v2521_v38  ;;  %v3290_v1 = vpop.eup %3289  ;;  %v2523_v12 = vmul.f32 %v4988_v2, %v4988_v2  ;;  %v2572_v44 = vpop.xlane.xlu0 %2571 }
 0x49e   : > { %v2707_v19 = vmul.f32 %v3290_v1, %v4741_v34  ;;  %v2708_v0 = vmul.f32 %v3290_v1, %v4744_v5  ;;  %v2636_v25 = vmax.f32 %v2572_v44, 1e-24 }
 0x49f   : > { %v2524_v18 = vmul.f32 %v4993_v23, %v4993_v23  ;;  %2616 = vadd.xlane.f32.xlu1 %v2615_v37 }
 0x4a0   : > { %2771 = vst [vmem:[%s4915_s17 + $0xb0] sm:$0xff] %v2707_v19  ;;  %2772 = vst [vmem:[%s4915_s17 + $0xb8] sm:$0xff] %v2708_v0  ;;  %3297 = vrsqrt.f32 %v2636_v25 }
 0x4a1   : > { %v2618_v63 = vadd.f32 %v2524_v18, %v2523_v12  ;;  %v3292_v59 = vpop.eup %3291  ;;  %v2575_v45 = vpop.xlane.xlu1 %2574 }
 0x4a2   : > { %v2709_v52 = vmul.f32 %v3292_v59, %v4751_v53  ;;  %v2710_v34 = vmul.f32 %v3292_v59, %v4754_v58  ;;  %v2637_v49 = vmax.f32 %v2575_v45, 1e-24 }
 0x4a3   : > { %2619 = vadd.xlane.f32.xlu0 %v2618_v63 }
 0x4a4   : > { %2773 = vst [vmem:[%s4915_s17 + $0xc0] sm:$0xff] %v2709_v52  ;;  %2774 = vst [vmem:[%s4915_s17 + $0xc8] sm:$0xff] %v2710_v34  ;;  %3299 = vrsqrt.f32 %v2637_v49 }
 0x4a5   : > { %v3294_v5 = vpop.eup %3293  ;;  %v2578_v60 = vpop.xlane.xlu0 %2577 }
 0x4a6   : > { %v2711_v40 = vmul.f32 %v3294_v5, %v4761_v24  ;;  %v2712_v17 = vmul.f32 %v3294_v5, %v4764_v13  ;;  %v2638_v14 = vmax.f32 %v2578_v60, 1e-24  ;;  %v5175_v5 = vld [vmem:[#allocation8_spill] sm:$0xff] }
 0x4a8   : > { %2775 = vst [vmem:[%s4915_s17 + $0xd0] sm:$0xff] %v2711_v40  ;;  %2776 = vst [vmem:[%s4915_s17 + $0xd8] sm:$0xff] %v2712_v17  ;;  %3301 = vrsqrt.f32 %v2638_v14  ;;  %v5176_v40 = vld [vmem:[#allocation9_spill] sm:$0xff] }
 0x4a9   : > { %v3296_v53 = vpop.eup %3295  ;;  %v2581_v58 = vpop.xlane.xlu1 %2580 }
 0x4aa   : > { %v2713_v29 = vmul.f32 %v3296_v53, %v4771_v9  ;;  %v2714_v35 = vmul.f32 %v3296_v53, %v4774_v36  ;;  %v2639_v3 = vmax.f32 %v2581_v58, 1e-24  ;;  %v5178_v53 = vld [vmem:[#allocation11_spill] sm:$0xff] }
 0x4ac   : > { %2777 = vst [vmem:[%s4915_s17 + $0xe0] sm:$0xff] %v2713_v29  ;;  %2778 = vst [vmem:[%s4915_s17 + $0xe8] sm:$0xff] %v2714_v35  ;;  %3303 = vrsqrt.f32 %v2639_v3 }
 0x4ad   : > { %v3298_v24 = vpop.eup %3297  ;;  %v2584_v13 = vpop.xlane.xlu0 %2583 }
 0x4ae   : > { %v2715_v38 = vmul.f32 %v3298_v24, %v4781_v26  ;;  %v2716_v7 = vmul.f32 %v3298_v24, %v4784_v56  ;;  %v2640_v4 = vmax.f32 %v2584_v13, 1e-24 }
 0x4b0   : > { %2779 = vst [vmem:[%s4915_s17 + $0xf0] sm:$0xff] %v2715_v38  ;;  %2780 = vst [vmem:[%s4915_s17 + $0xf8] sm:$0xff] %v2716_v7  ;;  %3305 = vrsqrt.f32 %v2640_v4  ;;  %v5179_v38 = vld [vmem:[#allocation12_spill] sm:$0xff]  ;;  %v5180_v4 = vld [vmem:[#allocation13_spill] sm:$0xff] }
 0x4b1   : > { %v3300_v9 = vpop.eup %3299  ;;  %v2587_v36 = vpop.xlane.xlu1 %2586 }
 0x4b2   : > { %v2717_v16 = vmul.f32 %v3300_v9, %v4791_v41  ;;  %v2718_v11 = vmul.f32 %v3300_v9, %v4794_v30  ;;  %v2641_v8 = vmax.f32 %v2587_v36, 1e-24 }
 0x4b4   : > { %2781 = vst [vmem:[%s4915_s17 + $0x100] sm:$0xff] %v2717_v16  ;;  %2782 = vst [vmem:[%s4915_s17 + $0x108] sm:$0xff] %v2718_v11  ;;  %3307 = vrsqrt.f32 %v2641_v8 }
 0x4b5   : > { %v3302_v26 = vpop.eup %3301  ;;  %v2590_v56 = vpop.xlane.xlu0 %2589 }
 0x4b6   : > { %v2719_v6 = vmul.f32 %v3302_v26, %v4801_v15  ;;  %v2720_v39 = vmul.f32 %v3302_v26, %v4804_v54  ;;  %v2642_v37 = vmax.f32 %v2590_v56, 1e-24 }
 0x4b8   : > { %2783 = vst [vmem:[%s4915_s17 + $0x110] sm:$0xff] %v2719_v6  ;;  %2784 = vst [vmem:[%s4915_s17 + $0x118] sm:$0xff] %v2720_v39  ;;  %3309 = vrsqrt.f32 %v2642_v37 }
 0x4b9   : > { %v3304_v41 = vpop.eup %3303 }
 0x4ba   : > { %v2721_v30 = vmul.f32 %v3304_v41, %v4811_v48  ;;  %v2722_v1 = vmul.f32 %v3304_v41, %v4814_v10 }
 0x4bc   : > { %2785 = vst [vmem:[%s4915_s17 + $0x120] sm:$0xff] %v2721_v30  ;;  %2786 = vst [vmem:[%s4915_s17 + $0x128] sm:$0xff] %v2722_v1 }
 0x4bd   : > { %v3306_v12 = vpop.eup %3305 }
 0x4be   : > { %v2723_v44 = vmul.f32 %v3306_v12, %v4821_v31  ;;  %v2724_v15 = vmul.f32 %v3306_v12, %v4824_v28 }
 0x4c0   : > { %2787 = vst [vmem:[%s4915_s17 + $0x130] sm:$0xff] %v2723_v44  ;;  %2788 = vst [vmem:[%s4915_s17 + $0x138] sm:$0xff] %v2724_v15 }
 0x4c1   : > { %v3308_v54 = vpop.eup %3307 }
 0x4c2   : > { %v2725_v19 = vmul.f32 %v3308_v54, %v4831_v47  ;;  %v2726_v0 = vmul.f32 %v3308_v54, %v4834_v32 }
 0x4c3   : > { %v2593_v18 = vpop.xlane.xlu1 %2592 }
 0x4c4   : > { %2789 = vst [vmem:[%s4915_s17 + $0x140] sm:$0xff] %v2725_v19  ;;  %2790 = vst [vmem:[%s4915_s17 + $0x148] sm:$0xff] %v2726_v0  ;;  %v2643_v48 = vmax.f32 %v2593_v18, 1e-24 }
 0x4c5   : > { %v3310_v10 = vpop.eup %3309 }
 0x4c6   : > { %v2727_v31 = vmul.f32 %v3310_v10, %v4841_v51  ;;  %v2728_v28 = vmul.f32 %v3310_v10, %v4844_v22  ;;  %3311 = vrsqrt.f32 %v2643_v48 }
 0x4c7   : > { %v2596_v25 = vpop.xlane.xlu0 %2595 }
 0x4c8   : > { %2791 = vst [vmem:[%s4915_s17 + $0x150] sm:$0xff] %v2727_v31  ;;  %2792 = vst [vmem:[%s4915_s17 + $0x158] sm:$0xff] %v2728_v28  ;;  %v2644_v47 = vmax.f32 %v2596_v25, 1e-24 }
 0x4ca   : > { %3313 = vrsqrt.f32 %v2644_v47 }
 0x4d3   : > { %v3312_v32 = vpop.eup %3311 }
 0x4d4   : > { %v2729_v63 = vmul.f32 %v3312_v32, %v4851_v21  ;;  %v2730_v59 = vmul.f32 %v3312_v32, %v4854_v43 }
 0x4d6   : > { %2793 = vst [vmem:[%s4915_s17 + $0x160] sm:$0xff] %v2729_v63  ;;  %2794 = vst [vmem:[%s4915_s17 + $0x168] sm:$0xff] %v2730_v59 }
 0x4d7   : > { %v3314_v51 = vpop.eup %3313 }
 0x4d8   : > { %v2731_v45 = vmul.f32 %v3314_v51, %v4861_v62  ;;  %v2732_v22 = vmul.f32 %v3314_v51, %v4864_v61  ;;  %v5177_v61 = vld [vmem:[#allocation10_spill] sm:$0xff] }
 0x4da   : > { %2795 = vst [vmem:[%s4915_s17 + $0x170] sm:$0xff] %v2731_v45  ;;  %2796 = vst [vmem:[%s4915_s17 + $0x178] sm:$0xff] %v2732_v22 }
 0x4db   : > { %v2599_v52 = vpop.xlane.xlu1 %2598 }
 0x4dc   : > { %v2645_v34 = vmax.f32 %v2599_v52, 1e-24 }
 0x4de   : > { %3315 = vrsqrt.f32 %v2645_v34 }
 0x4df   : > { %v2602_v49 = vpop.xlane.xlu0 %2601 }
 0x4e0   : > { %v2646_v21 = vmax.f32 %v2602_v49, 1e-24 }
 0x4e2   : > { %3317 = vrsqrt.f32 %v2646_v21 }
 0x4eb   : > { %v3316_v43 = vpop.eup %3315 }
 0x4ec   : > { %v2733_v60 = vmul.f32 %v3316_v43, %v5175_v5  ;;  %v2734_v17 = vmul.f32 %v3316_v43, %v5176_v40 }
 0x4ee   : > { %2797 = vst [vmem:[%s4915_s17 + $0x180] sm:$0xff] %v2733_v60  ;;  %2798 = vst [vmem:[%s4915_s17 + $0x188] sm:$0xff] %v2734_v17 }
 0x4ef   : > { %v3318_v62 = vpop.eup %3317 }
 0x4f0   : > { %v2735_v14 = vmul.f32 %v3318_v62, %v5177_v61  ;;  %v2736_v58 = vmul.f32 %v3318_v62, %v5178_v53 }
 0x4f2   : > { %2799 = vst [vmem:[%s4915_s17 + $0x190] sm:$0xff] %v2735_v14  ;;  %2800 = vst [vmem:[%s4915_s17 + $0x198] sm:$0xff] %v2736_v58 }
 0x4f7   : > { %v2605_v29 = vpop.xlane.xlu1 %2604 }
 0x4f8   : > { %v2647_v35 = vmax.f32 %v2605_v29, 1e-24 }
 0x4fa   : > { %3319 = vrsqrt.f32 %v2647_v35 }
 0x4fb   : > { %v2608_v3 = vpop.xlane.xlu0 %2607 }
 0x4fc   : > { %v2648_v24 = vmax.f32 %v2608_v3, 1e-24 }
 0x4fe   : > { %3321 = vrsqrt.f32 %v2648_v24 }
 0x507   : > { %v3320_v13 = vpop.eup %3319 }
 0x508   : > { %v2737_v7 = vmul.f32 %v3320_v13, %v5179_v38  ;;  %v2738_v9 = vmul.f32 %v3320_v13, %v5180_v4 }
 0x50a   : > { %2801 = vst [vmem:[%s4915_s17 + $0x1a0] sm:$0xff] %v2737_v7  ;;  %2802 = vst [vmem:[%s4915_s17 + $0x1a8] sm:$0xff] %v2738_v9 }
 0x50b   : > { %v3322_v36 = vpop.eup %3321 }
 0x50c   : > { %v2739_v16 = vmul.f32 %v3322_v36, %v4901_v50  ;;  %v2740_v11 = vmul.f32 %v3322_v36, %v4905_v27 }
 0x50e   : > { %2803 = vst [vmem:[%s4915_s17 + $0x1b0] sm:$0xff] %v2739_v16  ;;  %2804 = vst [vmem:[%s4915_s17 + $0x1b8] sm:$0xff] %v2740_v11 }
 0x50f   : > { %v2611_v8 = vpop.xlane.xlu1 %2610 }
 0x510   : > { %v2649_v26 = vmax.f32 %v2611_v8, 1e-24 }
 0x512   : > { %3323 = vrsqrt.f32 %v2649_v26 }
 0x513   : > { %v2614_v56 = vpop.xlane.xlu0 %2613 }
 0x514   : > { %v2650_v6 = vmax.f32 %v2614_v56, 1e-24 }
 0x516   : > { %3325 = vrsqrt.f32 %v2650_v6 }
 0x51f   : > { %v3324_v39 = vpop.eup %3323 }
 0x520   : > { %v2741_v37 = vmul.f32 %v3324_v39, %v4930_v55  ;;  %v2742_v41 = vmul.f32 %v3324_v39, %v4935_v46 }
 0x522   : > { %2805 = vst [vmem:[%s4915_s17 + $0x1c0] sm:$0xff] %v2741_v37  ;;  %2806 = vst [vmem:[%s4915_s17 + $0x1c8] sm:$0xff] %v2742_v41 }
 0x523   : > { %v3326_v50 = vpop.eup %3325 }
 0x524   : > { %v2743_v27 = vmul.f32 %v3326_v50, %v4944_v57  ;;  %v2744_v30 = vmul.f32 %v3326_v50, %v4949_v33 }
 0x526   : > { %2807 = vst [vmem:[%s4915_s17 + $0x1d0] sm:$0xff] %v2743_v27  ;;  %2808 = vst [vmem:[%s4915_s17 + $0x1d8] sm:$0xff] %v2744_v30 }
 0x528   : > { %v2617_v1 = vpop.xlane.xlu1 %2616 }
 0x529   : > { %v2651_v12 = vmax.f32 %v2617_v1, 1e-24 }
 0x52b   : > { %3327 = vrsqrt.f32 %v2651_v12 }
 0x52c   : > { %v2620_v55 = vpop.xlane.xlu0 %2619 }
 0x52d   : > { %v2652_v46 = vmax.f32 %v2620_v55, 1e-24 }
 0x52f   : > { %3329 = vrsqrt.f32 %v2652_v46 }
 0x538   : > { %v3328_v44 = vpop.eup %3327 }
 0x539   : > { %v2745_v15 = vmul.f32 %v3328_v44, %v4974_v42  ;;  %v2746_v57 = vmul.f32 %v3328_v44, %v4979_v20 }
 0x53b   : > { %2809 = vst [vmem:[%s4915_s17 + $0x1e0] sm:$0xff] %v2745_v15  ;;  %2810 = vst [vmem:[%s4915_s17 + $0x1e8] sm:$0xff] %v2746_v57 }
 0x53c   : > { %v3330_v33 = vpop.eup %3329 }
 0x53d   : > { %v2747_v42 = vmul.f32 %v3330_v33, %v4988_v2  ;;  %v2748_v54 = vmul.f32 %v3330_v33, %v4993_v23 }
 0x53f   : > { %2811 = vst [vmem:[%s4915_s17 + $0x1f0] sm:$0xff] %v2747_v42  ;;  %2812 = vst [vmem:[%s4915_s17 + $0x1f8] sm:$0xff] %v2748_v54 }
 0x540   : > { %3371 = shalt.err (!%p3368_p0)
}
 0x541   : > { %s3372_s14 = scalar_lea.hbm %s5084_s25, 8192  ;;  %s3376_s21 = scalar_lea.hbm %s5143_s9, 16384 }
 0x542   : > { %p3373_p1 = scmp.ne.s32.totalorder %s5084_s25, %s3372_s14  ;;  %p3377_p4 = scmp.lt.s32.totalorder %s5084_s25, %s5143_s9 }
 0x543   : > { %p3378_p7 = scmp.lt.s32.totalorder %s3376_s21, %s3372_s14 }
 0x544   : > { %p3374_p2 = pnand %p3373_p1, %p3522_p5 }
 0x545   : > { %p3379_p6 = por %p3378_p7, %p3377_p4 }
 0x546   : > { %p3375_p3 = pneg %p3374_p2 }
 0x548   : > { %p3380_p8 = pnand %p3379_p6, %p3375_p3 }
 0x54a   : > { %3383 = shalt.err (!%p3380_p8)
}
 0x54b   : > { %s3432_s26 = smov 256   ;;  %s3433_s27 = smov 16  }
 0x54c   : > { %3020 = dma.vmem_to_hbm [thread:$0]  (%p3522_p5), %s5086_s22, 8192, %s5084_s25, %s5094_s13, %s3432_s26, %s3432_s26, %s3433_s27  }
 0x54d PF: > { %p3032_p9 = scmp.ge.s32.totalorder %s3422_s12, 2  ;;  %s2843_s28 = sand.u32 1, %s3410_s30  }
 0x54e   : > { %p5181_p10 = scmp.ne.s32.totalorder %s5161_s20, 0  ;;  %s2844_s29 = scalar_lea.sflag [#allocation4], %s2843_s28 }
 0x550   : > { %p3027_p11 = pnand %p3032_p9, %p5181_p10 }
 0x552   : > { %p3028_p12 = pneg %p3027_p11 }
 0x554   : > { %3405 = dma.done.wait (%p3028_p12), %s2844_s29, 8192  }
 0x555   : > { %3407 = vsyncadd (%p3028_p12), %s2844_s29, 4294959104  ;;  %p20_p13 = scmp.ge.s32.totalorder %s3509_s15, 4   ;;  %s5182_s30 = smov %s3414_s10 }
 0x556   : > { %s5183_s10 = smov %s3418_s11  ;;  %s5184_s11 = smov %s3520_s18 }
 0x557   : > { %s5185_s12 = smov %s3509_s15  ;;  %22 = sbr.rel (!%p20_p13) target bundleno = 4 (0x4), region = 96 }
 0x55c   :  { %2849 = vsyncpa [#allocation3], 1 }
 0x55d   :  { %2851 = vsyncpa [#allocation3 + $0x1], 1 }
 0x55e   :  { %2852 = vsyncpa [#allocation4], 1 }
 0x55f   :  { %2854 = vsyncpa [#allocation4 + $0x1], 1 }

</bundles_post_ra>
